<compile_context>
chip_gen: v5e
topology: v5e:2x2
jax: 0.10.0
libtpu: 0.0.40
codegen_flags: <defaults>
</compile_context>

<pallas_src>
import functools
import math

import jax
import jax.numpy as jnp
from jax.experimental import pallas as pl
from jax.experimental.pallas import tpu as pltpu


# ------------- fused conv3x3(same) + bias + ReLU + maxpool2x2 kernel -------------

def _conv_relu_pool_kernel(x_ref, w_ref, b_ref, o_ref, s_ref, *, H, W, C, Cout):
    """One batch element per grid step.

    x_ref : (P2, C)      bf16  zero-padded image, spatial flattened row-major,
                               P2 = (H+2)*(W+2) + 2 (2 extra zero rows keep all
                               shifted slab reads in bounds).
    w_ref : (9*C, Cout)  bf16  conv weights, rows ordered (kh, kw, cin).
    b_ref : (1, Cout)    f32
    o_ref : (Ho, Wo, Cout) bf16  pooled output.
    s_ref : (H*L, Cout)  f32 VMEM scratch holding the pre-pool ReLU'd conv map.
    """
    L = W + 2           # padded row length
    HL = H * L
    Ho, Wo = H // 2, W // 2

    # 3x3 "same" conv as 9 shifted-slab matmul accumulations.  conv(i, j) for
    # flat slab row m = i*L + j reads x_flat[m + kh*L + kw]; columns j in
    # [W, W+2) are junk and are simply never read by the pooling step.
    acc = jnp.zeros((HL, Cout), jnp.float32)
    for kh in range(3):
        for kw in range(3):
            tap = kh * 3 + kw
            xs = x_ref[pl.ds(kh * L + kw, HL), :]          # (HL, C) bf16
            wk = w_ref[pl.ds(tap * C, C), :]               # (C, Cout) bf16
            acc = acc + jnp.dot(xs, wk, preferred_element_type=jnp.float32)
    acc = jnp.maximum(acc + b_ref[...], 0.0)               # bias + ReLU (f32)
    s_ref[...] = acc

    # 2x2 stride-2 max pool via strided sublane reads from the VMEM scratch.
    for i in range(Ho):                                    # static unroll, Ho <= 8
        r0 = (2 * i) * L
        r1 = r0 + L
        a = s_ref[pl.ds(r0, Wo, stride=2), :]
        b = s_ref[pl.ds(r0 + 1, Wo, stride=2), :]
        c = s_ref[pl.ds(r1, Wo, stride=2), :]
        d = s_ref[pl.ds(r1 + 1, Wo, stride=2), :]
        o_ref[i, :, :] = jnp.maximum(jnp.maximum(a, b),
                                     jnp.maximum(c, d)).astype(o_ref.dtype)


def conv3x3_relu_pool(x_nhwc, w2d, b):
    """x_nhwc: (N,H,W,C) bf16; w2d: (9C,Cout) bf16; b: (1,Cout) f32 -> (N,H/2,W/2,Cout) bf16."""
    N, H, W, C = x_nhwc.shape
    Cout = w2d.shape[-1]
    Ho, Wo = H // 2, W // 2
    L = W + 2
    P2 = (H + 2) * (W + 2) + 2

    # host-side glue (~1x data, no 9x im2col): zero-pad border, flatten spatial,
    # append 2 zero rows so every shifted slab read stays in bounds.
    xp = jnp.pad(x_nhwc, ((0, 0), (1, 1), (1, 1), (0, 0)))
    xf = jnp.pad(xp.reshape(N, (H + 2) * (W + 2), C), ((0, 0), (0, 2), (0, 0)))

    kernel = functools.partial(_conv_relu_pool_kernel, H=H, W=W, C=C, Cout=Cout)
    return pl.pallas_call(
        kernel,
        out_shape=jax.ShapeDtypeStruct((N, Ho, Wo, Cout), jnp.bfloat16),
        grid=(N,),
        in_specs=[
            pl.BlockSpec((None, P2, C), lambda n: (n, 0, 0)),      # whole image in VMEM
            pl.BlockSpec((9 * C, Cout), lambda n: (0, 0)),
            pl.BlockSpec((1, Cout), lambda n: (0, 0)),
        ],
        out_specs=pl.BlockSpec((None, Ho, Wo, Cout), lambda n: (n, 0, 0, 0)),
        scratch_shapes=[pltpu.VMEM((H * L, Cout), jnp.float32)],
        compiler_params=pltpu.CompilerParams(
            dimension_semantics=("parallel",)),                    # 2 TCs on v7x
    )(xf, w2d, b)


# ------------- fused classifier (fc1+ReLU, fc2+ReLU, hash, tanh(scale*y)) -------------

def _mlp_hash_kernel(scale_ref, x_ref, w1_ref, b1_ref, w2_ref, b2_ref,
                     wh_ref, bh_ref, o_ref):
    # TODO(synk): Dropout layers are identity (eval mode); training-mode dropout
    # is not implemented.
    h = jnp.dot(x_ref[...], w1_ref[...], preferred_element_type=jnp.float32)
    h = jnp.maximum(h + b1_ref[...], 0.0)
    h = jnp.dot(h.astype(jnp.bfloat16), w2_ref[...],
                preferred_element_type=jnp.float32)
    h = jnp.maximum(h + b2_ref[...], 0.0)
    y = jnp.dot(h.astype(jnp.bfloat16), wh_ref[...],
                preferred_element_type=jnp.float32) + bh_ref[...]
    o_ref[...] = jnp.tanh(scale_ref[0] * y).astype(o_ref.dtype)


def mlp_hash(x, w1, b1, w2, b2, wh, bh, scale):
    B = x.shape[0]
    hb = wh.shape[-1]

    def vspec(shp):
        return pl.BlockSpec(shp, lambda i: (0, 0))

    return pl.pallas_call(
        _mlp_hash_kernel,
        out_shape=jax.ShapeDtypeStruct((B, hb), jnp.float32),
        grid=(1,),
        in_specs=[
            pl.BlockSpec(memory_space=pltpu.MemorySpace.SMEM),     # scale scalar
            vspec(x.shape), vspec(w1.shape), vspec(b1.shape),
            vspec(w2.shape), vspec(b2.shape), vspec(wh.shape), vspec(bh.shape),
        ],
        out_specs=pl.BlockSpec((B, hb), lambda i: (0, 0)),
        compiler_params=pltpu.CompilerParams(
            dimension_semantics=("arbitrary",)),
    )(scale, x, w1, b1, w2, b2, wh, bh)


# -------------------- VGGFc (scaled-down, synthetic weights) --------------------

class VGGFcPallas:
    """Mini VGG 'features' + 2-layer classifier + hash layer, a la VGGFc."""

    def __init__(self, hash_bit=16, key=jax.random.PRNGKey(0)):
        # feature config: conv3x3(3->8) relu pool, conv(8->16) relu pool,
        # conv(16->32) relu pool  => flatten dim 32*2*2 = 128 (the "25088" analog).
        conv_cfg = [(3, 8), (8, 16), (16, 32)]
        keys = jax.random.split(key, 8)
        ki = iter(range(8))
        self.convs = []
        for cin, cout in conv_cfg:
            w = 0.1 * jax.random.normal(keys[next(ki)], (3, 3, cin, cout), jnp.float32)
            w2d = w.reshape(9 * cin, cout).astype(jnp.bfloat16)   # (kh,kw,cin) row order
            b = jnp.zeros((1, cout), jnp.float32)
            self.convs.append((w2d, b))

        Hf, Wf, Cf = 2, 2, 32
        feat_dim, hid = Hf * Wf * Cf, 64
        # fc1 generated in torch's CHW-flatten convention, then rows permuted once
        # at init so the kernel can consume the HWC flatten order directly
        # (removes the NHWC->NCHW transpose from the hot path).
        fc1_chw = 0.05 * jax.random.normal(keys[next(ki)], (feat_dim, hid), jnp.float32)
        hh, ww, cc = jnp.meshgrid(jnp.arange(Hf), jnp.arange(Wf), jnp.arange(Cf),
                                  indexing="ij")
        perm = (cc * (Hf * Wf) + hh * Wf + ww).reshape(-1)        # HWC pos -> CHW row
        self.fc1_w = fc1_chw[perm].astype(jnp.bfloat16)
        self.fc1_b = jnp.zeros((1, hid), jnp.float32)
        self.fc2_w = (0.05 * jax.random.normal(keys[next(ki)], (hid, hid),
                                               jnp.float32)).astype(jnp.bfloat16)
        self.fc2_b = jnp.zeros((1, hid), jnp.float32)
        # hash layer: weight ~ N(0, 0.01), bias = 0  (matches reference init)
        self.hash_w = (0.01 * jax.random.normal(keys[next(ki)], (hid, hash_bit),
                                                jnp.float32)).astype(jnp.bfloat16)
        self.hash_b = jnp.zeros((1, hash_bit), jnp.float32)

        self.iter_num = 0
        self.step_size = 200
        self.gamma = 0.005
        self.power = 0.5
        self.init_scale = 1.0
        self.scale = self.init_scale
        self.training = False
        self._in_features = hash_bit

    def output_num(self):
        return self._in_features

    def forward(self, x_nchw):
        if self.training:
            self.iter_num += 1
        # NCHW -> NHWC (channels on lanes) and bf16 MXU operands.
        x = jnp.transpose(x_nchw, (0, 2, 3, 1)).astype(jnp.bfloat16)
        # ---- self.features: fused [conv3x3 + ReLU + maxpool2x2] per layer ----
        for (w2d, b) in self.convs:
            x = conv3x3_relu_pool(x, w2d, b)
        # ---- flatten in (H, W, C) order (fc1 rows pre-permuted at init) ----
        x = x.reshape(x.shape[0], -1)
        # ---- scale schedule (same arithmetic as the PyTorch module) ----
        if self.iter_num % self.step_size == 0:
            self.scale = self.init_scale * math.pow(
                1.0 + self.gamma * self.iter_num, self.power)
        scale = jnp.asarray([self.scale], dtype=jnp.float32)      # SMEM scalar input
        # ---- fused classifier + hash layer + tanh(scale * y) ----
        return mlp_hash(x, self.fc1_w, self.fc1_b, self.fc2_w, self.fc2_b,
                        self.hash_w, self.hash_b, scale)


if __name__ == "__main__":
    key = jax.random.PRNGKey(0)
    k_x, k_p = jax.random.split(key)
    x = jax.random.normal(k_x, (2, 3, 16, 16), jnp.float32)       # NCHW, like PyTorch
    model = VGGFcPallas(hash_bit=16, key=k_p)
    y = model.forward(x)
    y = jax.block_until_ready(y)
    assert y.shape == (2, 16), y.shape
    assert bool(jnp.all(jnp.isfinite(y)))
    assert bool(jnp.all(jnp.abs(y) <= 1.0))                       # tanh output range
    print("KERNEL_OK")
</pallas_src>

<mosaic_0001>
module attributes {stable_mosaic.version = 11 : i64} {
  func.func @_conv_relu_pool_kernel(%arg0: i32, %arg1: memref<1x326x3xbf16, #tpu.memory_space<vmem>>, %arg2: memref<27x8xbf16, #tpu.memory_space<vmem>>, %arg3: memref<1x8xf32, #tpu.memory_space<vmem>>, %arg4: memref<1x8x8x8xbf16, #tpu.memory_space<vmem>>, %arg5: memref<288x8xf32, #tpu.memory_space<vmem>>) attributes {dimension_semantics = [#tpu.dimension_semantics<parallel>], iteration_bounds = array<i64: 2>, scalar_prefetch = 0 : i64, scratch_operands = 1 : i64, tpu.core_type = #tpu.core_type<tc>, window_params = [{transform_indices = @transform_0, window_bounds = array<i64: 1, 326, 3>}, {pipeline_mode = #tpu.pipeline_mode<synchronous>, transform_indices = @transform_1, window_bounds = array<i64: 27, 8>}, {pipeline_mode = #tpu.pipeline_mode<synchronous>, transform_indices = @transform_2, window_bounds = array<i64: 1, 8>}, {transform_indices = @transform_3, window_bounds = array<i64: 1, 8, 8, 8>}]} {
    %cst = arith.constant 0.000000e+00 : f32
    %0 = vector.broadcast %cst : f32 to vector<288x8xf32>
    %c0 = arith.constant 0 : index
    %c0_0 = arith.constant 0 : index
    %c0_1 = arith.constant 0 : index
    %1 = vector.load %arg1[%c0, %c0_0, %c0_1] : memref<1x326x3xbf16, #tpu.memory_space<vmem>>, vector<1x288x3xbf16>
    %2 = vector.shape_cast %1 : vector<1x288x3xbf16> to vector<288x3xbf16>
    %c0_2 = arith.constant 0 : index
    %c0_3 = arith.constant 0 : index
    %3 = vector.load %arg2[%c0_2, %c0_3] : memref<27x8xbf16, #tpu.memory_space<vmem>>, vector<3x8xbf16>
    %cst_4 = arith.constant dense<0.000000e+00> : vector<288x8xf32>
    %4 = tpu.matmul %2, %3, %cst_4 {dimension_numbers = #tpu.dot_dimension_numbers<[1], [0], [0], [1], [0, 0, 1, 1], [], []>} : vector<288x3xbf16>, vector<3x8xbf16>, vector<288x8xf32> -> vector<288x8xf32>
    %5 = arith.addf %0, %4 : vector<288x8xf32>
    %c0_5 = arith.constant 0 : index
    %c1 = arith.constant 1 : index
    %c0_6 = arith.constant 0 : index
    %6 = vector.load %arg1[%c0_5, %c1, %c0_6] : memref<1x326x3xbf16, #tpu.memory_space<vmem>>, vector<1x288x3xbf16>
    %7 = vector.shape_cast %6 : vector<1x288x3xbf16> to vector<288x3xbf16>
    %c3 = arith.constant 3 : index
    %c0_7 = arith.constant 0 : index
    %8 = vector.load %arg2[%c3, %c0_7] : memref<27x8xbf16, #tpu.memory_space<vmem>>, vector<3x8xbf16>
    %cst_8 = arith.constant dense<0.000000e+00> : vector<288x8xf32>
    %9 = tpu.matmul %7, %8, %cst_8 {dimension_numbers = #tpu.dot_dimension_numbers<[1], [0], [0], [1], [0, 0, 1, 1], [], []>} : vector<288x3xbf16>, vector<3x8xbf16>, vector<288x8xf32> -> vector<288x8xf32>
    %10 = arith.addf %5, %9 : vector<288x8xf32>
    %c0_9 = arith.constant 0 : index
    %c2 = arith.constant 2 : index
    %c0_10 = arith.constant 0 : index
    %11 = vector.load %arg1[%c0_9, %c2, %c0_10] : memref<1x326x3xbf16, #tpu.memory_space<vmem>>, vector<1x288x3xbf16>
    %12 = vector.shape_cast %11 : vector<1x288x3xbf16> to vector<288x3xbf16>
    %c6 = arith.constant 6 : index
    %c0_11 = arith.constant 0 : index
    %13 = vector.load %arg2[%c6, %c0_11] : memref<27x8xbf16, #tpu.memory_space<vmem>>, vector<3x8xbf16>
    %cst_12 = arith.constant dense<0.000000e+00> : vector<288x8xf32>
    %14 = tpu.matmul %12, %13, %cst_12 {dimension_numbers = #tpu.dot_dimension_numbers<[1], [0], [0], [1], [0, 0, 1, 1], [], []>} : vector<288x3xbf16>, vector<3x8xbf16>, vector<288x8xf32> -> vector<288x8xf32>
    %15 = arith.addf %10, %14 : vector<288x8xf32>
    %c0_13 = arith.constant 0 : index
    %c18 = arith.constant 18 : index
    %c0_14 = arith.constant 0 : index
    %16 = vector.load %arg1[%c0_13, %c18, %c0_14] : memref<1x326x3xbf16, #tpu.memory_space<vmem>>, vector<1x288x3xbf16>
    %17 = vector.shape_cast %16 : vector<1x288x3xbf16> to vector<288x3xbf16>
    %c9 = arith.constant 9 : index
    %c0_15 = arith.constant 0 : index
    %18 = vector.load %arg2[%c9, %c0_15] : memref<27x8xbf16, #tpu.memory_space<vmem>>, vector<3x8xbf16>
    %cst_16 = arith.constant dense<0.000000e+00> : vector<288x8xf32>
    %19 = tpu.matmul %17, %18, %cst_16 {dimension_numbers = #tpu.dot_dimension_numbers<[1], [0], [0], [1], [0, 0, 1, 1], [], []>} : vector<288x3xbf16>, vector<3x8xbf16>, vector<288x8xf32> -> vector<288x8xf32>
    %20 = arith.addf %15, %19 : vector<288x8xf32>
    %c0_17 = arith.constant 0 : index
    %c19 = arith.constant 19 : index
    %c0_18 = arith.constant 0 : index
    %21 = vector.load %arg1[%c0_17, %c19, %c0_18] : memref<1x326x3xbf16, #tpu.memory_space<vmem>>, vector<1x288x3xbf16>
    %22 = vector.shape_cast %21 : vector<1x288x3xbf16> to vector<288x3xbf16>
    %c12 = arith.constant 12 : index
    %c0_19 = arith.constant 0 : index
    %23 = vector.load %arg2[%c12, %c0_19] : memref<27x8xbf16, #tpu.memory_space<vmem>>, vector<3x8xbf16>
    %cst_20 = arith.constant dense<0.000000e+00> : vector<288x8xf32>
    %24 = tpu.matmul %22, %23, %cst_20 {dimension_numbers = #tpu.dot_dimension_numbers<[1], [0], [0], [1], [0, 0, 1, 1], [], []>} : vector<288x3xbf16>, vector<3x8xbf16>, vector<288x8xf32> -> vector<288x8xf32>
    %25 = arith.addf %20, %24 : vector<288x8xf32>
    %c0_21 = arith.constant 0 : index
    %c20 = arith.constant 20 : index
    %c0_22 = arith.constant 0 : index
    %26 = vector.load %arg1[%c0_21, %c20, %c0_22] : memref<1x326x3xbf16, #tpu.memory_space<vmem>>, vector<1x288x3xbf16>
    %27 = vector.shape_cast %26 : vector<1x288x3xbf16> to vector<288x3xbf16>
    %c15 = arith.constant 15 : index
    %c0_23 = arith.constant 0 : index
    %28 = vector.load %arg2[%c15, %c0_23] : memref<27x8xbf16, #tpu.memory_space<vmem>>, vector<3x8xbf16>
    %cst_24 = arith.constant dense<0.000000e+00> : vector<288x8xf32>
    %29 = tpu.matmul %27, %28, %cst_24 {dimension_numbers = #tpu.dot_dimension_numbers<[1], [0], [0], [1], [0, 0, 1, 1], [], []>} : vector<288x3xbf16>, vector<3x8xbf16>, vector<288x8xf32> -> vector<288x8xf32>
    %30 = arith.addf %25, %29 : vector<288x8xf32>
    %c0_25 = arith.constant 0 : index
    %c36 = arith.constant 36 : index
    %c0_26 = arith.constant 0 : index
    %31 = vector.load %arg1[%c0_25, %c36, %c0_26] : memref<1x326x3xbf16, #tpu.memory_space<vmem>>, vector<1x288x3xbf16>
    %32 = vector.shape_cast %31 : vector<1x288x3xbf16> to vector<288x3xbf16>
    %c18_27 = arith.constant 18 : index
    %c0_28 = arith.constant 0 : index
    %33 = vector.load %arg2[%c18_27, %c0_28] : memref<27x8xbf16, #tpu.memory_space<vmem>>, vector<3x8xbf16>
    %cst_29 = arith.constant dense<0.000000e+00> : vector<288x8xf32>
    %34 = tpu.matmul %32, %33, %cst_29 {dimension_numbers = #tpu.dot_dimension_numbers<[1], [0], [0], [1], [0, 0, 1, 1], [], []>} : vector<288x3xbf16>, vector<3x8xbf16>, vector<288x8xf32> -> vector<288x8xf32>
    %35 = arith.addf %30, %34 : vector<288x8xf32>
    %c0_30 = arith.constant 0 : index
    %c37 = arith.constant 37 : index
    %c0_31 = arith.constant 0 : index
    %36 = vector.load %arg1[%c0_30, %c37, %c0_31] : memref<1x326x3xbf16, #tpu.memory_space<vmem>>, vector<1x288x3xbf16>
    %37 = vector.shape_cast %36 : vector<1x288x3xbf16> to vector<288x3xbf16>
    %c21 = arith.constant 21 : index
    %c0_32 = arith.constant 0 : index
    %38 = vector.load %arg2[%c21, %c0_32] : memref<27x8xbf16, #tpu.memory_space<vmem>>, vector<3x8xbf16>
    %cst_33 = arith.constant dense<0.000000e+00> : vector<288x8xf32>
    %39 = tpu.matmul %37, %38, %cst_33 {dimension_numbers = #tpu.dot_dimension_numbers<[1], [0], [0], [1], [0, 0, 1, 1], [], []>} : vector<288x3xbf16>, vector<3x8xbf16>, vector<288x8xf32> -> vector<288x8xf32>
    %40 = arith.addf %35, %39 : vector<288x8xf32>
    %c0_34 = arith.constant 0 : index
    %c38 = arith.constant 38 : index
    %c0_35 = arith.constant 0 : index
    %41 = vector.load %arg1[%c0_34, %c38, %c0_35] : memref<1x326x3xbf16, #tpu.memory_space<vmem>>, vector<1x288x3xbf16>
    %42 = vector.shape_cast %41 : vector<1x288x3xbf16> to vector<288x3xbf16>
    %c24 = arith.constant 24 : index
    %c0_36 = arith.constant 0 : index
    %43 = vector.load %arg2[%c24, %c0_36] : memref<27x8xbf16, #tpu.memory_space<vmem>>, vector<3x8xbf16>
    %cst_37 = arith.constant dense<0.000000e+00> : vector<288x8xf32>
    %44 = tpu.matmul %42, %43, %cst_37 {dimension_numbers = #tpu.dot_dimension_numbers<[1], [0], [0], [1], [0, 0, 1, 1], [], []>} : vector<288x3xbf16>, vector<3x8xbf16>, vector<288x8xf32> -> vector<288x8xf32>
    %45 = arith.addf %40, %44 : vector<288x8xf32>
    %c0_38 = arith.constant 0 : index
    %c0_39 = arith.constant 0 : index
    %46 = vector.load %arg3[%c0_38, %c0_39] : memref<1x8xf32, #tpu.memory_space<vmem>>, vector<1x8xf32>
    %47 = vector.broadcast %46 : vector<1x8xf32> to vector<288x8xf32>
    %48 = arith.addf %45, %47 : vector<288x8xf32>
    %cst_40 = arith.constant 0.000000e+00 : f32
    %49 = vector.broadcast %cst_40 : f32 to vector<288x8xf32>
    %50 = arith.maximumf %48, %49 : vector<288x8xf32>
    %c0_41 = arith.constant 0 : index
    %c0_42 = arith.constant 0 : index
    %51 = vector.load %arg5[%c0_41, %c0_42] : memref<288x8xf32, #tpu.memory_space<vmem>>, vector<288x8xf32>
    tpu.vector_store %arg5[%c0_41, %c0_42], %50 {strides = array<i32>} : memref<288x8xf32, #tpu.memory_space<vmem>>, vector<288x8xf32>,
    %c0_43 = arith.constant 0 : index
    %c0_44 = arith.constant 0 : index
    %52 = tpu.strided_load %arg5[%c0_43, %c0_44] {strides = array<i32: 2, 1>} : memref<288x8xf32, #tpu.memory_space<vmem>>, vector<8x8xf32>
    %c1_45 = arith.constant 1 : index
    %c0_46 = arith.constant 0 : index
    %53 = tpu.strided_load %arg5[%c1_45, %c0_46] {strides = array<i32: 2, 1>} : memref<288x8xf32, #tpu.memory_space<vmem>>, vector<8x8xf32>
    %c18_47 = arith.constant 18 : index
    %c0_48 = arith.constant 0 : index
    %54 = tpu.strided_load %arg5[%c18_47, %c0_48] {strides = array<i32: 2, 1>} : memref<288x8xf32, #tpu.memory_space<vmem>>, vector<8x8xf32>
    %c19_49 = arith.constant 19 : index
    %c0_50 = arith.constant 0 : index
    %55 = tpu.strided_load %arg5[%c19_49, %c0_50] {strides = array<i32: 2, 1>} : memref<288x8xf32, #tpu.memory_space<vmem>>, vector<8x8xf32>
    %56 = arith.maximumf %52, %53 : vector<8x8xf32>
    %57 = arith.maximumf %54, %55 : vector<8x8xf32>
    %58 = arith.maximumf %56, %57 : vector<8x8xf32>
    %59 = arith.truncf %58 : vector<8x8xf32> to vector<8x8xbf16>
    %c0_51 = arith.constant 0 : index
    %c0_52 = arith.constant 0 : index
    %c0_53 = arith.constant 0 : index
    %c0_54 = arith.constant 0 : index
    %60 = vector.load %arg4[%c0_51, %c0_52, %c0_53, %c0_54] : memref<1x8x8x8xbf16, #tpu.memory_space<vmem>>, vector<1x1x8x8xbf16>
    %61 = vector.shape_cast %60 : vector<1x1x8x8xbf16> to vector<8x8xbf16>
    %62 = vector.shape_cast %59 : vector<8x8xbf16> to vector<1x1x8x8xbf16>
    tpu.vector_store %arg4[%c0_51, %c0_52, %c0_53, %c0_54], %62 {strides = array<i32>} : memref<1x8x8x8xbf16, #tpu.memory_space<vmem>>, vector<1x1x8x8xbf16>,
    %c36_55 = arith.constant 36 : index
    %c0_56 = arith.constant 0 : index
    %63 = tpu.strided_load %arg5[%c36_55, %c0_56] {strides = array<i32: 2, 1>} : memref<288x8xf32, #tpu.memory_space<vmem>>, vector<8x8xf32>
    %c37_57 = arith.constant 37 : index
    %c0_58 = arith.constant 0 : index
    %64 = tpu.strided_load %arg5[%c37_57, %c0_58] {strides = array<i32: 2, 1>} : memref<288x8xf32, #tpu.memory_space<vmem>>, vector<8x8xf32>
    %c54 = arith.constant 54 : index
    %c0_59 = arith.constant 0 : index
    %65 = tpu.strided_load %arg5[%c54, %c0_59] {strides = array<i32: 2, 1>} : memref<288x8xf32, #tpu.memory_space<vmem>>, vector<8x8xf32>
    %c55 = arith.constant 55 : index
    %c0_60 = arith.constant 0 : index
    %66 = tpu.strided_load %arg5[%c55, %c0_60] {strides = array<i32: 2, 1>} : memref<288x8xf32, #tpu.memory_space<vmem>>, vector<8x8xf32>
    %67 = arith.maximumf %63, %64 : vector<8x8xf32>
    %68 = arith.maximumf %65, %66 : vector<8x8xf32>
    %69 = arith.maximumf %67, %68 : vector<8x8xf32>
    %70 = arith.truncf %69 : vector<8x8xf32> to vector<8x8xbf16>
    %c0_61 = arith.constant 0 : index
    %c1_62 = arith.constant 1 : index
    %c0_63 = arith.constant 0 : index
    %c0_64 = arith.constant 0 : index
    %71 = vector.load %arg4[%c0_61, %c1_62, %c0_63, %c0_64] : memref<1x8x8x8xbf16, #tpu.memory_space<vmem>>, vector<1x1x8x8xbf16>
    %72 = vector.shape_cast %71 : vector<1x1x8x8xbf16> to vector<8x8xbf16>
    %73 = vector.shape_cast %70 : vector<8x8xbf16> to vector<1x1x8x8xbf16>
    tpu.vector_store %arg4[%c0_61, %c1_62, %c0_63, %c0_64], %73 {strides = array<i32>} : memref<1x8x8x8xbf16, #tpu.memory_space<vmem>>, vector<1x1x8x8xbf16>,
    %c72 = arith.constant 72 : index
    %c0_65 = arith.constant 0 : index
    %74 = tpu.strided_load %arg5[%c72, %c0_65] {strides = array<i32: 2, 1>} : memref<288x8xf32, #tpu.memory_space<vmem>>, vector<8x8xf32>
    %c73 = arith.constant 73 : index
    %c0_66 = arith.constant 0 : index
    %75 = tpu.strided_load %arg5[%c73, %c0_66] {strides = array<i32: 2, 1>} : memref<288x8xf32, #tpu.memory_space<vmem>>, vector<8x8xf32>
    %c90 = arith.constant 90 : index
    %c0_67 = arith.constant 0 : index
    %76 = tpu.strided_load %arg5[%c90, %c0_67] {strides = array<i32: 2, 1>} : memref<288x8xf32, #tpu.memory_space<vmem>>, vector<8x8xf32>
    %c91 = arith.constant 91 : index
    %c0_68 = arith.constant 0 : index
    %77 = tpu.strided_load %arg5[%c91, %c0_68] {strides = array<i32: 2, 1>} : memref<288x8xf32, #tpu.memory_space<vmem>>, vector<8x8xf32>
    %78 = arith.maximumf %74, %75 : vector<8x8xf32>
    %79 = arith.maximumf %76, %77 : vector<8x8xf32>
    %80 = arith.maximumf %78, %79 : vector<8x8xf32>
    %81 = arith.truncf %80 : vector<8x8xf32> to vector<8x8xbf16>
    %c0_69 = arith.constant 0 : index
    %c2_70 = arith.constant 2 : index
    %c0_71 = arith.constant 0 : index
    %c0_72 = arith.constant 0 : index
    %82 = vector.load %arg4[%c0_69, %c2_70, %c0_71, %c0_72] : memref<1x8x8x8xbf16, #tpu.memory_space<vmem>>, vector<1x1x8x8xbf16>
    %83 = vector.shape_cast %82 : vector<1x1x8x8xbf16> to vector<8x8xbf16>
    %84 = vector.shape_cast %81 : vector<8x8xbf16> to vector<1x1x8x8xbf16>
    tpu.vector_store %arg4[%c0_69, %c2_70, %c0_71, %c0_72], %84 {strides = array<i32>} : memref<1x8x8x8xbf16, #tpu.memory_space<vmem>>, vector<1x1x8x8xbf16>,
    %c108 = arith.constant 108 : index
    %c0_73 = arith.constant 0 : index
    %85 = tpu.strided_load %arg5[%c108, %c0_73] {strides = array<i32: 2, 1>} : memref<288x8xf32, #tpu.memory_space<vmem>>, vector<8x8xf32>
    %c109 = arith.constant 109 : index
    %c0_74 = arith.constant 0 : index
    %86 = tpu.strided_load %arg5[%c109, %c0_74] {strides = array<i32: 2, 1>} : memref<288x8xf32, #tpu.memory_space<vmem>>, vector<8x8xf32>
    %c126 = arith.constant 126 : index
    %c0_75 = arith.constant 0 : index
    %87 = tpu.strided_load %arg5[%c126, %c0_75] {strides = array<i32: 2, 1>} : memref<288x8xf32, #tpu.memory_space<vmem>>, vector<8x8xf32>
    %c127 = arith.constant 127 : index
    %c0_76 = arith.constant 0 : index
    %88 = tpu.strided_load %arg5[%c127, %c0_76] {strides = array<i32: 2, 1>} : memref<288x8xf32, #tpu.memory_space<vmem>>, vector<8x8xf32>
    %89 = arith.maximumf %85, %86 : vector<8x8xf32>
    %90 = arith.maximumf %87, %88 : vector<8x8xf32>
    %91 = arith.maximumf %89, %90 : vector<8x8xf32>
    %92 = arith.truncf %91 : vector<8x8xf32> to vector<8x8xbf16>
    %c0_77 = arith.constant 0 : index
    %c3_78 = arith.constant 3 : index
    %c0_79 = arith.constant 0 : index
    %c0_80 = arith.constant 0 : index
    %93 = vector.load %arg4[%c0_77, %c3_78, %c0_79, %c0_80] : memref<1x8x8x8xbf16, #tpu.memory_space<vmem>>, vector<1x1x8x8xbf16>
    %94 = vector.shape_cast %93 : vector<1x1x8x8xbf16> to vector<8x8xbf16>
    %95 = vector.shape_cast %92 : vector<8x8xbf16> to vector<1x1x8x8xbf16>
    tpu.vector_store %arg4[%c0_77, %c3_78, %c0_79, %c0_80], %95 {strides = array<i32>} : memref<1x8x8x8xbf16, #tpu.memory_space<vmem>>, vector<1x1x8x8xbf16>,
    %c144 = arith.constant 144 : index
    %c0_81 = arith.constant 0 : index
    %96 = tpu.strided_load %arg5[%c144, %c0_81] {strides = array<i32: 2, 1>} : memref<288x8xf32, #tpu.memory_space<vmem>>, vector<8x8xf32>
    %c145 = arith.constant 145 : index
    %c0_82 = arith.constant 0 : index
    %97 = tpu.strided_load %arg5[%c145, %c0_82] {strides = array<i32: 2, 1>} : memref<288x8xf32, #tpu.memory_space<vmem>>, vector<8x8xf32>
    %c162 = arith.constant 162 : index
    %c0_83 = arith.constant 0 : index
    %98 = tpu.strided_load %arg5[%c162, %c0_83] {strides = array<i32: 2, 1>} : memref<288x8xf32, #tpu.memory_space<vmem>>, vector<8x8xf32>
    %c163 = arith.constant 163 : index
    %c0_84 = arith.constant 0 : index
    %99 = tpu.strided_load %arg5[%c163, %c0_84] {strides = array<i32: 2, 1>} : memref<288x8xf32, #tpu.memory_space<vmem>>, vector<8x8xf32>
    %100 = arith.maximumf %96, %97 : vector<8x8xf32>
    %101 = arith.maximumf %98, %99 : vector<8x8xf32>
    %102 = arith.maximumf %100, %101 : vector<8x8xf32>
    %103 = arith.truncf %102 : vector<8x8xf32> to vector<8x8xbf16>
    %c0_85 = arith.constant 0 : index
    %c4 = arith.constant 4 : index
    %c0_86 = arith.constant 0 : index
    %c0_87 = arith.constant 0 : index
    %104 = vector.load %arg4[%c0_85, %c4, %c0_86, %c0_87] : memref<1x8x8x8xbf16, #tpu.memory_space<vmem>>, vector<1x1x8x8xbf16>
    %105 = vector.shape_cast %104 : vector<1x1x8x8xbf16> to vector<8x8xbf16>
    %106 = vector.shape_cast %103 : vector<8x8xbf16> to vector<1x1x8x8xbf16>
    tpu.vector_store %arg4[%c0_85, %c4, %c0_86, %c0_87], %106 {strides = array<i32>} : memref<1x8x8x8xbf16, #tpu.memory_space<vmem>>, vector<1x1x8x8xbf16>,
    %c180 = arith.constant 180 : index
    %c0_88 = arith.constant 0 : index
    %107 = tpu.strided_load %arg5[%c180, %c0_88] {strides = array<i32: 2, 1>} : memref<288x8xf32, #tpu.memory_space<vmem>>, vector<8x8xf32>
    %c181 = arith.constant 181 : index
    %c0_89 = arith.constant 0 : index
    %108 = tpu.strided_load %arg5[%c181, %c0_89] {strides = array<i32: 2, 1>} : memref<288x8xf32, #tpu.memory_space<vmem>>, vector<8x8xf32>
    %c198 = arith.constant 198 : index
    %c0_90 = arith.constant 0 : index
    %109 = tpu.strided_load %arg5[%c198, %c0_90] {strides = array<i32: 2, 1>} : memref<288x8xf32, #tpu.memory_space<vmem>>, vector<8x8xf32>
    %c199 = arith.constant 199 : index
    %c0_91 = arith.constant 0 : index
    %110 = tpu.strided_load %arg5[%c199, %c0_91] {strides = array<i32: 2, 1>} : memref<288x8xf32, #tpu.memory_space<vmem>>, vector<8x8xf32>
    %111 = arith.maximumf %107, %108 : vector<8x8xf32>
    %112 = arith.maximumf %109, %110 : vector<8x8xf32>
    %113 = arith.maximumf %111, %112 : vector<8x8xf32>
    %114 = arith.truncf %113 : vector<8x8xf32> to vector<8x8xbf16>
    %c0_92 = arith.constant 0 : index
    %c5 = arith.constant 5 : index
    %c0_93 = arith.constant 0 : index
    %c0_94 = arith.constant 0 : index
    %115 = vector.load %arg4[%c0_92, %c5, %c0_93, %c0_94] : memref<1x8x8x8xbf16, #tpu.memory_space<vmem>>, vector<1x1x8x8xbf16>
    %116 = vector.shape_cast %115 : vector<1x1x8x8xbf16> to vector<8x8xbf16>
    %117 = vector.shape_cast %114 : vector<8x8xbf16> to vector<1x1x8x8xbf16>
    tpu.vector_store %arg4[%c0_92, %c5, %c0_93, %c0_94], %117 {strides = array<i32>} : memref<1x8x8x8xbf16, #tpu.memory_space<vmem>>, vector<1x1x8x8xbf16>,
    %c216 = arith.constant 216 : index
    %c0_95 = arith.constant 0 : index
    %118 = tpu.strided_load %arg5[%c216, %c0_95] {strides = array<i32: 2, 1>} : memref<288x8xf32, #tpu.memory_space<vmem>>, vector<8x8xf32>
    %c217 = arith.constant 217 : index
    %c0_96 = arith.constant 0 : index
    %119 = tpu.strided_load %arg5[%c217, %c0_96] {strides = array<i32: 2, 1>} : memref<288x8xf32, #tpu.memory_space<vmem>>, vector<8x8xf32>
    %c234 = arith.constant 234 : index
    %c0_97 = arith.constant 0 : index
    %120 = tpu.strided_load %arg5[%c234, %c0_97] {strides = array<i32: 2, 1>} : memref<288x8xf32, #tpu.memory_space<vmem>>, vector<8x8xf32>
    %c235 = arith.constant 235 : index
    %c0_98 = arith.constant 0 : index
    %121 = tpu.strided_load %arg5[%c235, %c0_98] {strides = array<i32: 2, 1>} : memref<288x8xf32, #tpu.memory_space<vmem>>, vector<8x8xf32>
    %122 = arith.maximumf %118, %119 : vector<8x8xf32>
    %123 = arith.maximumf %120, %121 : vector<8x8xf32>
    %124 = arith.maximumf %122, %123 : vector<8x8xf32>
    %125 = arith.truncf %124 : vector<8x8xf32> to vector<8x8xbf16>
    %c0_99 = arith.constant 0 : index
    %c6_100 = arith.constant 6 : index
    %c0_101 = arith.constant 0 : index
    %c0_102 = arith.constant 0 : index
    %126 = vector.load %arg4[%c0_99, %c6_100, %c0_101, %c0_102] : memref<1x8x8x8xbf16, #tpu.memory_space<vmem>>, vector<1x1x8x8xbf16>
    %127 = vector.shape_cast %126 : vector<1x1x8x8xbf16> to vector<8x8xbf16>
    %128 = vector.shape_cast %125 : vector<8x8xbf16> to vector<1x1x8x8xbf16>
    tpu.vector_store %arg4[%c0_99, %c6_100, %c0_101, %c0_102], %128 {strides = array<i32>} : memref<1x8x8x8xbf16, #tpu.memory_space<vmem>>, vector<1x1x8x8xbf16>,
    %c252 = arith.constant 252 : index
    %c0_103 = arith.constant 0 : index
    %129 = tpu.strided_load %arg5[%c252, %c0_103] {strides = array<i32: 2, 1>} : memref<288x8xf32, #tpu.memory_space<vmem>>, vector<8x8xf32>
    %c253 = arith.constant 253 : index
    %c0_104 = arith.constant 0 : index
    %130 = tpu.strided_load %arg5[%c253, %c0_104] {strides = array<i32: 2, 1>} : memref<288x8xf32, #tpu.memory_space<vmem>>, vector<8x8xf32>
    %c270 = arith.constant 270 : index
    %c0_105 = arith.constant 0 : index
    %131 = tpu.strided_load %arg5[%c270, %c0_105] {strides = array<i32: 2, 1>} : memref<288x8xf32, #tpu.memory_space<vmem>>, vector<8x8xf32>
    %c271 = arith.constant 271 : index
    %c0_106 = arith.constant 0 : index
    %132 = tpu.strided_load %arg5[%c271, %c0_106] {strides = array<i32: 2, 1>} : memref<288x8xf32, #tpu.memory_space<vmem>>, vector<8x8xf32>
    %133 = arith.maximumf %129, %130 : vector<8x8xf32>
    %134 = arith.maximumf %131, %132 : vector<8x8xf32>
    %135 = arith.maximumf %133, %134 : vector<8x8xf32>
    %136 = arith.truncf %135 : vector<8x8xf32> to vector<8x8xbf16>
    %c0_107 = arith.constant 0 : index
    %c7 = arith.constant 7 : index
    %c0_108 = arith.constant 0 : index
    %c0_109 = arith.constant 0 : index
    %137 = vector.load %arg4[%c0_107, %c7, %c0_108, %c0_109] : memref<1x8x8x8xbf16, #tpu.memory_space<vmem>>, vector<1x1x8x8xbf16>
    %138 = vector.shape_cast %137 : vector<1x1x8x8xbf16> to vector<8x8xbf16>
    %139 = vector.shape_cast %136 : vector<8x8xbf16> to vector<1x1x8x8xbf16>
    tpu.vector_store %arg4[%c0_107, %c7, %c0_108, %c0_109], %139 {strides = array<i32>} : memref<1x8x8x8xbf16, #tpu.memory_space<vmem>>, vector<1x1x8x8xbf16>,
    return
  }
  func.func @transform_0(%arg0: i32) -> (i32, i32, i32) {
    %c0_i32 = arith.constant 0 : i32
    %c0_i32_0 = arith.constant 0 : i32
    %c0_i32_1 = arith.constant 0 : i32
    return %arg0, %c0_i32, %c0_i32_0 : i32, i32, i32
  }
  func.func @transform_1(%arg0: i32) -> (i32, i32) {
    %c0_i32 = arith.constant 0 : i32
    %c0_i32_0 = arith.constant 0 : i32
    %c0_i32_1 = arith.constant 0 : i32
    return %c0_i32, %c0_i32_0 : i32, i32
  }
  func.func @transform_2(%arg0: i32) -> (i32, i32) {
    %c0_i32 = arith.constant 0 : i32
    %c0_i32_0 = arith.constant 0 : i32
    %c0_i32_1 = arith.constant 0 : i32
    return %c0_i32, %c0_i32_0 : i32, i32
  }
  func.func @transform_3(%arg0: i32) -> (i32, i32, i32, i32) {
    %c0_i32 = arith.constant 0 : i32
    %c0_i32_0 = arith.constant 0 : i32
    %c0_i32_1 = arith.constant 0 : i32
    %c0_i32_2 = arith.constant 0 : i32
    return %arg0, %c0_i32, %c0_i32_0, %c0_i32_1 : i32, i32, i32, i32
  }
}

</mosaic_0001>

<bundles_post_ra>
// kernel: tpu_custom_call.1
= control target key start
LH: loop header
LB: loop body
LE: loop exit
PB: predicated region body
PF: predicated region fallthrough
CT: control target
= control target key end

     0   :  { %8 = vsyncpa [#allocation4], 0  ;;  %s5065_s0 = inlined_call_operand.vmem [shape: bf16[2,326,3], index: 0, kind: input, shape index: {}]   ;;  %s5066_s1 = inlined_call_operand.vmem [shape: bf16[27,8], index: 1, kind: input, shape index: {}]   ;;  %s5067_s2 = inlined_call_operand.vmem [shape: f32[1,8], index: 2, kind: input, shape index: {}]   ;;  %s5068_s3 = inlined_call_operand.hbm [shape: bf16[2,8,8,8], index: 3, kind: output, shape index: {}]  }
   0x1   :  { %10 = vsyncpa [#allocation4 + $0x1], 0  ;;  %s3882_s12 = smov 0   ;;  %s3884_s13 = smov 0  }
   0x2   :  { %s3886_s14 = smov 0   ;;  %s3888_s15 = smov 0  }
   0x3 LB: > { %s3903_s16 = sadd.s32 4294967295, %s3857_s15   ;;  %s3274_s17 = sadd.s32 4294967294, %s3857_s15   ;;  %s3857_s15 = sphi %s3888_s15, %s5098_s15   ;;  %s3853_s14 = sphi %s3886_s14, %s5097_s14   ;;  %s3849_s13 = sphi %s3884_s13, %s5096_s13   ;;  %s3845_s12 = sphi %s3882_s12, %s5095_s12  }
   0x4   : > { %s3907_s18 = sadd.s32 1, %s3857_s15   ;;  %s91_s19 = sadd.s32 1, %s3853_s14 }
   0x5   : > { %s88_s20 = ssub.s32 %s3857_s15, %s3907_s18  ;;  %p101_p0 = scmp.ne.s32.totalorder %s3853_s14, %s3849_s13 }
   0x6   : > { %p89_p1 = scmp.eq.s32.totalorder %s88_s20, 0  ;;  %p102_p2 = scmp.eq.s32.totalorder %s3903_s16, 1 }
   0x7   : > { %p107_p3 = scmp.ne.s32.totalorder %s3849_s13, %s3845_s12  ;;  %p108_p4 = scmp.eq.s32.totalorder %s3274_s17, 1 }
   0x8   : > { %s3918_s21 = scalar_select %p89_p1, %s3853_s14, %s91_s19  }
   0x9   : > { %p3920_p5 = por %p102_p2, %p101_p0  ;;  %p3924_p6 = por %p108_p4, %p107_p3 }
   0xa   : > { %p3277_p7 = scmp.ge.s32.totalorder %s3857_s15, 1  ;;  %p140_p8 = scmp.lt.s32.totalorder %s3857_s15, 3 }
   0xc   : > { %p141_p9 = pnand %p3277_p7, %p140_p8 }
   0xe   : > { %144 = sbr.rel (%p141_p9) target bundleno = 843 (0x34b), region = 32 }
  0x13   : > { %v208_v0 = vld [vmem:[%s5066_s1] sm:$0x6]  ;;  %p164_p10 = scmp.lt.s32.totalorder %s3903_s16, 1  ;;  %vm517_vm0 = vcmask 1040384   ;;  %v3386_v2 = vld [vmem:[%s5066_s1] sm:$0x8] }
  0x14   : > { %v452_v1 = vunpack.c.l.b16 %v208_v0  ;;  %v3683_v3 = vld [vmem:[%s5066_s1] sm:$0x10]  ;;  %v1374_v6 = vld [vmem:[%s5066_s1 + $0x4] sm:$0xc]  ;;  %vm518_vm1 = vcmask 1041408   ;;  %v3859_v7 = vmov 65535  }
  0x15   : > { %s165_s28 = scalar_select %p164_p10, %s3903_s16, 1  ;;  %v3387_v5 = vor.u32 %v3683_v3, %v3386_v2  ;;  %v519_v8 = vsel %vm517_vm0, 4294967295, %v3859_v7  ;;  %v1550_v9 = vunpack.c.l.b16 %v1374_v6  ;;  %v206_v13 = vld [vmem:[%s5066_s1] sm:$0x3]  ;;  %vm302_vm2 = vsmask.f32 7424 }
  0x16   : > { %v453_v4 = vpack.c.b16 %v452_v1, %v452_v1  ;;  %v3952_v17 = vsel %vm518_vm1, %v519_v8, 0  ;;  %vm462_vm3 = vcmask 23552   ;;  %v1040_v61 = vld [vmem:[%s5066_s1 + $0x4] sm:$0x3]  ;;  %vm767_vm4 = vcmask 1046528   ;;  %s161_s8 = sand.u32 1, %s3849_s13  }
  0x17   : > { %s3730_s6 = smul.u32 164, %s165_s28  ;;  %v810_v12 = vrot.slane %v3387_v5, 3  ;;  %v1551_v14 = vpack.c.b16 %v1550_v9, %v1550_v9  ;;  %v660_v25 = vand.u32 %v3952_v17, %v206_v13  ;;  %v1172_v6 = vunpack.c.l.b16 %v1040_v61  ;;  %s3278_s9 = sshll.u32 %s161_s8, 5 }
  0x18   : > { %v455_v10 = vshrl.u32 %v453_v4, 16  ;;  %v458_v11 = vshll.u32 %v453_v4, 16  ;;  %vm1378_vm5 = vsmask.f32 6400  ;;  %vm2363_vm6 = vsmask.f32 5376 }
  0x19   : > { %s3950_s11 = scalar_lea.vmem %s5065_s0, %s3730_s6  ;;  %v866_v22 = vand.u32 %v810_v12, %v3952_v17  ;;  %v1552_v26 = vrot.slane %v1551_v14, 2  ;;  %v1173_v9 = vpack.c.b16 %v1172_v6, %v1172_v6  ;;  %vm1751_vm7 = vcmask 1045504   ;;  %s4811_s10 = scalar_lea.vmem [#allocation3], %s3278_s9 }
  0x1a   : > { %v457_v15 = vrot.slane %v455_v10, 1  ;;  %v460_v16 = vrot.slane %v458_v11, 2  ;;  %v3955_v18 = vld [vmem:[%s3950_s11 + $0x28] sm:$0xff]  ;;  %v3958_v19 = vld [vmem:[%s3950_s11 + $0x30] sm:$0xff]  ;;  %v3964_v21 = vld [vmem:[%s3950_s11 + $0x58] sm:$0xff]  ;;  %vm2742_vm8 = vcmask 1044480  }
  0x1b   : > { %v3961_v20 = vld [vmem:[%s3950_s11 + $0x50] sm:$0xff]  ;;  %v3968_v23 = vld [vmem:[%s3950_s11] sm:$0xff]   ;;  %v3971_v24 = vld [vmem:[%s3950_s11 + $0x8] sm:$0xff]  ;;  %v343_v28 = vshll.u32 %v3955_v18, 16  ;;  %v347_v29 = vshrl.u32 %v3955_v18, 16  ;;  %v351_v30 = vshll.u32 %v3958_v19, 16  ;;  %v1608_v42 = vand.u32 %v1552_v26, %v3952_v17 }
  0x1c   : > { %v461_v27 = vor.u32 %v460_v16, %v457_v15  ;;  %v383_v31 = vshll.u32 %v3961_v20, 16  ;;  %v387_v32 = vshrl.u32 %v3961_v20, 16  ;;  %v391_v33 = vshll.u32 %v3964_v21, 16  ;;  %v3680_v45 = vld [vmem:[%s3950_s11 + $0x78] sm:$0xff]  ;;  %v3681_v48 = vld [vmem:[%s3950_s11 + $0x80] sm:$0xff]  ;;  %v4006_v58 = vld [vmem:[%s3950_s11 + $0x10] sm:$0xff] }
  0x1d   : > { %v304_v34 = vshrl.u32 %v3968_v23, 16  ;;  %v3982_v36 = vrot.slane %v343_v28, 1  ;;  %v353_v37 = vrot.slane %v351_v30, 1  ;;  %v306_v38 = vshll.u32 %v3968_v23, 16  ;;  %v3999_v53 = vld [vmem:[%s3950_s11 + $0x38] sm:$0xff]  ;;  %v4003_v55 = vld [vmem:[%s3950_s11 + $0x60] sm:$0xff] }
  0x1e   : > { %v522_v35 = vand.u32 %v3952_v17, %v461_v27  ;;  %v3985_v39 = vrot.slane %v383_v31, 1  ;;  %v393_v40 = vrot.slane %v391_v33, 1  ;;  %v311_v41 = vshll.u32 %v3971_v24, 16  ;;  %v3682_v10 = vld [vmem:[%s3950_s11 + $0x88] sm:$0xff]  ;;  %v4033_v33 = vld [vmem:[%s3950_s11 + $0x40] sm:$0xff]  ;;  %s3719_s19 = sshll.u32 %s3903_s16, 5 }
  0x1f   : > { %v349_v43 = vor.u32 %v347_v29, %v3982_v36  ;;  %v308_v44 = vrot.slane %v306_v38, 1  ;;  %v423_v54 = vshll.u32 %v3680_v45, 16  ;;  %v427_v56 = vshrl.u32 %v3680_v45, 16  ;;  %v4024_v13 = vld [vmem:[%s3950_s11 + $0x48] sm:$0xff]  ;;  %s3208_s25 = scalar_lea.hbm %s5068_s3, %s3719_s19  ;;  %s3209_s26 = sshll.u32 %s4811_s10, 4  ;;  %s3210_s26 = int_to_ptr.vmem [resolvable:$true] %s3209_s26 }
  0x20   : > { %3727 = vmatpush.bf16.msra.mxu1 %v522_v35  ;;  %3728 = vmatpush.bf16.msra.mxu2 %v522_v35  ;;  %v389_v46 = vor.u32 %v387_v32, %v3985_v39  ;;  %v313_v47 = vrot.slane %v311_v41, 1  ;;  %v431_v57 = vshll.u32 %v3681_v48, 16  ;;  %v355_v62 = vshrl.u32 %v3958_v19, 16  ;;  %v4038_v38 = vld [vmem:[%s3950_s11 + $0x68] sm:$0xff]  ;;  %v207_v41 = vld [vmem:[%s3950_s11 + $0x90] sm:$0x1] }
  0x21   : > { %531 = vmatpush.bf16.msra.mxu0 %v522_v35  ;;  %v354_v49 = vsel %vm302_vm2, %v349_v43, %v353_v37  ;;  %v309_v50 = vor.u32 %v308_v44, %v304_v34  ;;  %3729 = vmatpush.bf16.msra.mxu3 %v522_v35  ;;  %v4008_v59 = vrot.slane %v423_v54, 1  ;;  %v359_v63 = vshll.u32 %v3999_v53, 16  ;;  %v4043_v43 = vld [vmem:[%s3950_s11 + $0x18] sm:$0xff]  ;;  %s3211_s27 = sshll.u32 %s3208_s25, 4  ;;  %s3197_s16 = scalar_lea.sflag [#allocation4], %s161_s8  ;;  %s3212_s27 = int_to_ptr.hbm [resolvable:$true] %s3211_s27 }
  0x22   : > { %v394_v51 = vsel %vm302_vm2, %v389_v46, %v393_v40  ;;  %v433_v60 = vrot.slane %v431_v57, 1  ;;  %v395_v1 = vshrl.u32 %v3964_v21, 16  ;;  %v399_v2 = vshll.u32 %v4003_v55, 16  ;;  %s3809_s28 = sshra.s32 %s3212_s27, 4  ;;  %s3815_s5 = scalar_lea.hbm %s5068_s3, 64  ;;  %s3810_s28 = int_to_ptr.hbm [resolvable:$true] %s3809_s28 }
  0x23   : > { %3353 = vmatmul.msk.bf16.vlgmr.msra.gmra.mxu1 %vm462_vm3, %v354_v49  ;;  %3358 = vmatmul.msk.bf16.vlgmr.msra.gmra.mxu2 %vm462_vm3, %v394_v51  ;;  %v314_v52 = vsel %vm302_vm2, %v309_v50, %v313_v47  ;;  %v429_v0 = vor.u32 %v427_v56, %v4008_v59  ;;  %v315_v3 = vshrl.u32 %v3971_v24, 16  ;;  %v319_v4 = vshll.u32 %v4006_v58, 16  ;;  %v4051_v51 = vld [vmem:[%s3950_s11 + $0x20] sm:$0xff]  ;;  %s3811_s29 = scalar_lea.hbm %s3810_s28, 32  ;;  %p3816_p0 = scmp.lt.s32.totalorder %s3810_s28, %s5068_s3 }
  0x24   : > { %875 = vmatpush.bf16.msrb.mxu2 %v866_v22  ;;  %669 = vmatpush.bf16.msrb.mxu1 %v660_v25  ;;  %v357_v7 = vor.u32 %v355_v62, %v353_v37  ;;  %v361_v8 = vrot.slane %v359_v63, 1  ;;  %v397_v11 = vor.u32 %v395_v1, %v393_v40  ;;  %v401_v12 = vrot.slane %v399_v2, 1  ;;  %p3812_p11 = scmp.ne.s32.totalorder %s3810_s28, %s3811_s29  ;;  %p3817_p1 = scmp.lt.s32.totalorder %s3815_s5, %s3811_s29 }
  0x25   : > { %1617 = vmatpush.bf16.msrb.mxu0 %v1608_v42  ;;  %v434_v5 = vsel %vm302_vm2, %v429_v0, %v433_v60  ;;  %v317_v14 = vor.u32 %v315_v3, %v313_v47  ;;  %v321_v15 = vrot.slane %v319_v4, 1  ;;  %v1175_v16 = vshrl.u32 %v1173_v9, 16 }
  0x26   : > { %3348 = vmatmul.msk.bf16.vlgmr.msra.gmra.mxu0 %vm462_vm3, %v314_v52  ;;  %3363 = vmatmul.msk.bf16.vlgmr.msra.gmra.mxu3 %vm462_vm3, %v434_v5  ;;  %v1177_v22 = vshll.u32 %v1173_v9, 16  ;;  %v362_v25 = vsel %vm302_vm2, %v357_v7, %v361_v8  ;;  %v435_v27 = vshrl.u32 %v3681_v48, 16  ;;  %v439_v28 = vshll.u32 %v3682_v10, 16  ;;  %p3813_p12 = pnand %p3812_p11, %p3920_p5  ;;  %p3818_p2 = por %p3817_p1, %p3816_p0 }
  0x27   : > { %v402_v29 = vsel %vm302_vm2, %v397_v11, %v401_v12  ;;  %v375_v30 = vshll.u32 %v4024_v13, 16  ;;  %v322_v31 = vsel %vm302_vm2, %v317_v14, %v321_v15  ;;  %v379_v42 = vshrl.u32 %v4024_v13, 16 }
  0x28   : > { %v1179_v26 = vrot.slane %v1177_v22, 1  ;;  %v437_v35 = vor.u32 %v435_v27, %v433_v60  ;;  %v441_v37 = vrot.slane %v439_v28, 1  ;;  %v363_v45 = vshrl.u32 %v3999_v53, 16  ;;  %v4084_v27 = vld [vmem:[%s3950_s11 + $0xc] sm:$0xf]  ;;  %p3814_p13 = pneg %p3813_p12 }
  0x29   : > { %v377_v40 = vrot.slane %v375_v30, 1  ;;  %v367_v46 = vshll.u32 %v4033_v33, 16  ;;  %v282_v48 = vunpack.c.l.b16 %v207_v41  ;;  %v403_v49 = vshrl.u32 %v4003_v55, 16 }
  0x2a   : > { %v1180_v32 = vor.u32 %v1179_v26, %v1175_v16  ;;  %v442_v47 = vsel %vm302_vm2, %v437_v35, %v441_v37  ;;  %v407_v50 = vshll.u32 %v4038_v38, 16  ;;  %v323_v54 = vshrl.u32 %v4006_v58, 16  ;;  %v1003_v26 = vld [vmem:[%s3950_s11 + $0x8] sm:$0xe]  ;;  %p3819_p3 = pnand %p3818_p2, %p3814_p13 }
  0x2b   : > { %v381_v44 = vor.u32 %v379_v42, %v377_v40  ;;  %v327_v56 = vshll.u32 %v4043_v43, 16  ;;  %v365_v57 = vor.u32 %v363_v45, %v361_v8  ;;  %v369_v60 = vrot.slane %v367_v46, 1 }
  0x2c   : > { %v1236_v34 = vand.u32 %v1180_v32, %v3952_v17  ;;  %v4060_v61 = vpack.c.b16 %v282_v48, %v282_v48  ;;  %v405_v62 = vor.u32 %v403_v49, %v401_v12  ;;  %v409_v63 = vrot.slane %v407_v50, 1  ;;  %v2359_v48 = vld [vmem:[%s5066_s1 + $0x8] sm:$0xc]  ;;  %v3512_v49 = vld [vmem:[%s5066_s1 + $0x4] sm:$0x8] }
  0x2d   : > { %v4055_v52 = vsel %vm302_vm2, %v381_v44, %v3985_v39  ;;  %v335_v0 = vshll.u32 %v4051_v51, 16  ;;  %v325_v1 = vor.u32 %v323_v54, %v321_v15  ;;  %v329_v2 = vrot.slane %v327_v56, 1  ;;  %v3701_v50 = vld [vmem:[%s5066_s1 + $0x4] sm:$0x10] }
  0x2e   : > { %1245 = vmatpush.bf16.msrb.mxu3 %v1236_v34  ;;  %v370_v39 = vsel %vm302_vm2, %v365_v57, %v369_v60  ;;  %v443_v3 = vshrl.u32 %v3682_v10, 16  ;;  %v447_v4 = vshll.u32 %v4060_v61, 16  ;;  %v410_v5 = vsel %vm302_vm2, %v405_v62, %v409_v63  ;;  %v4072_v10 = vld [vmem:[%s3950_s11 + $0x70] sm:$0xff]  ;;  %v2738_v57 = vld [vmem:[%s5066_s1 + $0xc] sm:$0x3] }
  0x2f   : > { %v337_v6 = vrot.slane %v335_v0, 1  ;;  %v339_v7 = vshrl.u32 %v4051_v51, 16  ;;  %v330_v8 = vsel %vm302_vm2, %v325_v1, %v329_v2  ;;  %v371_v15 = vshrl.u32 %v4033_v33, 16 }
  0x30   : > { %v445_v11 = vor.u32 %v443_v3, %v441_v37  ;;  %v449_v12 = vrot.slane %v447_v4, 1  ;;  %v411_v22 = vshrl.u32 %v4038_v38, 16  ;;  %v331_v28 = vshrl.u32 %v4043_v43, 16  ;;  %v3684_v37 = vld [vmem:[%s3950_s11 + $0x10] sm:$0xff] }
  0x31   : > { %v341_v9 = vor.u32 %v339_v7, %v337_v6  ;;  %v1078_v30 = vunpack.c.l.b16 %v1003_v26  ;;  %v1135_v46 = vrot.slane %v3684_v37, 1  ;;  %v2535_v54 = vunpack.c.l.b16 %v2359_v48  ;;  %v3685_v26 = vld [vmem:[%s3950_s11 + $0x18] sm:$0xff] }
  0x32   : > { %v450_v16 = vsel %vm302_vm2, %v445_v11, %v449_v12  ;;  %v333_v34 = vor.u32 %v331_v28, %v329_v2  ;;  %v3513_v56 = vor.u32 %v3701_v50, %v3512_v49  ;;  %v2835_v62 = vand.u32 %v2738_v57, %v3952_v17  ;;  %v3686_v50 = vld [vmem:[%s3950_s11 + $0x20] sm:$0xff] }
  0x33   : > { %3354 = vmatmul.msk.bf16.gmra.mxu1 %vm462_vm3, %v362_v25  ;;  %3359 = vmatmul.msk.bf16.gmra.mxu2 %vm462_vm3, %v402_v29  ;;  %v4076_v14 = vsel %vm302_vm2, %v341_v9, %v3982_v36  ;;  %v415_v25 = vshll.u32 %v4072_v10, 16  ;;  %v373_v29 = vor.u32 %v371_v15, %v369_v60  ;;  %v5069_v36 = vunpack.c.l.b16 %v4084_v27 }
  0x34   : > { %v338_v44 = vsel %vm302_vm2, %v333_v34, %v337_v6  ;;  %v2536_v0 = vpack.c.b16 %v2535_v54, %v2535_v54  ;;  %v1795_v1 = vshrl.u32 %v3513_v56, 16  ;;  %v1798_v2 = vshll.u32 %v3513_v56, 16  ;;  %2844 = vmatpush.bf16.msra.mxu0 %v2835_v62 }
  0x35   : > { %v417_v32 = vrot.slane %v415_v25, 1  ;;  %v378_v35 = vsel %vm302_vm2, %v373_v29, %v377_v40  ;;  %v1115_v41 = vpack.c.b16 %v5069_v36, %v1078_v30  ;;  %v1137_v29 = vrot.slane %v3685_v26, 1  ;;  %v3724_v30 = vld [vmem:[%s3950_s11] sm:$0xf0] }
  0x36   : > { %3349 = vmatmul.msk.bf16.gmra.mxu0 %vm462_vm3, %v322_v31  ;;  %3364 = vmatmul.msk.bf16.gmra.mxu3 %vm462_vm3, %v442_v47  ;;  %v413_v31 = vor.u32 %v411_v22, %v409_v63  ;;  %v2031_v47 = vld [vmem:[%s5066_s1 + $0x8] sm:$0x6]  ;;  %v2538_v4 = vshrl.u32 %v2536_v0, 16  ;;  %v1797_v6 = vrot.slane %v1795_v1, 3  ;;  %v1800_v7 = vrot.slane %v1798_v2, 4 }
  0x37   : > { %v1134_v45 = vrot.slane %v1115_v41, 1  ;;  %v2163_v40 = vunpack.c.l.b16 %v2031_v47  ;;  %v1388_v34 = vshrl.u32 %v3684_v37, 16  ;;  %v769_v48 = vrot.slane %v3971_v24, 1  ;;  %v3687_v1 = vld [vmem:[%s3950_s11 + $0x28] sm:$0xff] }
  0x38   : > { %v418_v42 = vsel %vm302_vm2, %v413_v31, %v417_v32  ;;  %v2540_v9 = vrot.slane %v2538_v4, 2  ;;  %v1801_v12 = vor.u32 %v1800_v7, %v1797_v6  ;;  %v3725_v31 = vld [vmem:[%s3950_s11] sm:$0xe]  ;;  %v1397_v54 = vshrl.u32 %v3685_v26, 16 }
  0x39   : > { %v2164_v60 = vpack.c.b16 %v2163_v40, %v2163_v40  ;;  %v1136_v63 = vsel %vm767_vm4, %v1134_v45, %v1135_v46  ;;  %v1390_v47 = vrot.slane %v1388_v34, 1  ;;  %v1400_v56 = vshll.u32 %v3685_v26, 16 }
  0x3a   : > { %v1857_v22 = vand.u32 %v1801_v12, %v3952_v17  ;;  %v1409_v4 = vshll.u32 %v3686_v50, 16  ;;  %vm3048_vm9 = vcmask 64512   ;;  %vm3096_vm10 = vcmask 60416  }
  0x3b   : > { %v2165_v3 = vrot.slane %v2164_v60, 1  ;;  %v1399_v60 = vrot.slane %v1397_v54, 1  ;;  %v1402_v62 = vrot.slane %v1400_v56, 2 }
  0x3c   : > { %1866 = vmatpush.bf16.msra.mxu1 %v1857_v22  ;;  %v1411_v7 = vrot.slane %v1409_v4, 2  ;;  %v1418_v22 = vshll.u32 %v3687_v1, 16 }
  0x43   : > { %3355 = vmatmul.msk.bf16.gmra.mxu1 %vm462_vm3, %v370_v39  ;;  %3360 = vmatmul.msk.bf16.gmra.mxu2 %vm462_vm3, %v410_v5  ;;  %v419_v39 = vshrl.u32 %v4072_v10, 16  ;;  %v2541_v5 = vshll.u32 %v2536_v0, 16  ;;  %v1403_v0 = vor.u32 %v1402_v62, %v1399_v60 }
  0x45   : > { %v2543_v11 = vrot.slane %v2541_v5, 3  ;;  %v421_v15 = vor.u32 %v419_v39, %v417_v32  ;;  %v1380_v32 = vshrl.u32 %v1115_v41, 16  ;;  %v1141_v39 = vrot.slane %v3687_v1, 1 }
  0x46   : > { %3350 = vmatmul.msk.bf16.gmra.mxu0 %vm462_vm3, %v330_v8  ;;  %3365 = vmatmul.msk.bf16.gmra.mxu3 %vm462_vm3, %v450_v16  ;;  %v2221_v8 = vand.u32 %v2165_v3, %v3952_v17  ;;  %v1406_v3 = vshrl.u32 %v3686_v50, 16 }
  0x47   : > { %v2544_v16 = vor.u32 %v2543_v11, %v2540_v9  ;;  %v426_v28 = vsel %vm302_vm2, %v421_v15, %v4008_v59  ;;  %v3726_v59 = vor.u32 %v3725_v31, %v3724_v30  ;;  %v3688_v11 = vld [vmem:[%s3950_s11 + $0x30] sm:$0xff] }
  0x48   : > { %2230 = vmatpush.bf16.msra.mxu2 %v2221_v8  ;;  %v1408_v6 = vrot.slane %v1406_v3, 1  ;;  %v773_v8 = vrot.slane %v4043_v43, 1  ;;  %v1143_v15 = vrot.slane %v3688_v11, 1  ;;  %v779_v3 = vrot.slane %v3958_v19, 1 }
  0x49   : > { %v2600_v25 = vand.u32 %v2544_v16, %v3952_v17  ;;  %v1383_v17 = vshll.u32 %v1115_v41, 16  ;;  %v768_v40 = vrot.slane %v3726_v59, 1  ;;  %v1415_v16 = vshrl.u32 %v3687_v1, 16 }
  0x4a   : > { %v1412_v9 = vor.u32 %v1411_v7, %v1408_v6  ;;  %v1427_v59 = vshll.u32 %v3688_v11, 16 }
  0x4b   : > { %2609 = vmatpush.bf16.msra.mxu3 %v2600_v25  ;;  %v1385_v45 = vrot.slane %v1383_v17, 2  ;;  %v770_v41 = vsel %vm767_vm4, %v768_v40, %v769_v48  ;;  %v1144_v25 = vsel %vm767_vm4, %v1141_v39, %v1143_v15  ;;  %v1417_v26 = vrot.slane %v1415_v16, 1 }
  0x4c   : > { %v1413_v12 = vsel %vm1378_vm5, %v1403_v0, %v1412_v9 }
  0x53   : > { %3356 = vmatmul.msk.bf16.gmra.mxu1 %vm462_vm3, %v378_v35  ;;  %3361 = vmatmul.msk.bf16.gmra.mxu2 %vm462_vm3, %v418_v42  ;;  %v1391_v35 = vshll.u32 %v3684_v37, 16  ;;  %v1138_v42 = vsel %vm767_vm4, %v1135_v46, %v1137_v29  ;;  %v1139_v46 = vrot.slane %v3686_v50, 1 }
  0x55   : > { %v1140_v57 = vsel %vm767_vm4, %v1137_v29, %v1139_v46  ;;  %v1142_v5 = vsel %vm767_vm4, %v1139_v46, %v1141_v39  ;;  %v775_v29 = vrot.slane %v4051_v51, 1 }
  0x56   : > { %3351 = vmatmul.msk.bf16.gmra.mxu0 %vm462_vm3, %v338_v44  ;;  %3474 = vmatmul.msk.bf16.vlgmr.msrb.gmra.mxu3 %vm462_vm3, %v1136_v63  ;;  %v1382_v44 = vrot.slane %v1380_v32, 1  ;;  %v771_v63 = vrot.slane %v4006_v58, 1  ;;  %v3689_v32 = vld [vmem:[%s3950_s11 + $0x38] sm:$0xff] }
  0x57   : > { %v1433_v60 = vshrl.u32 %v3689_v32, 16  ;;  %v1436_v62 = vshll.u32 %v3689_v32, 16 }
  0x59   : > { %v1435_v39 = vrot.slane %v1433_v60, 1 }
  0x63   : > { %3357 = vmatmul.msk.bf16.gmra.mxu1 %vm462_vm3, %v4055_v52  ;;  %3362 = vmatmul.msk.bf16.gmra.mxu2 %vm462_vm3, %v426_v28  ;;  %v1393_v52 = vrot.slane %v1391_v35, 2  ;;  %v1420_v28 = vrot.slane %v1418_v22, 2  ;;  %v1145_v35 = vrot.slane %v3689_v32, 1  ;;  %v781_v32 = vrot.slane %v3999_v53, 1 }
  0x65   : > { %v1394_v49 = vor.u32 %v1393_v52, %v1390_v47  ;;  %v1421_v30 = vor.u32 %v1420_v28, %v1417_v26  ;;  %v1146_v47 = vsel %vm767_vm4, %v1143_v15, %v1145_v35 }
  0x66   : > { %3352 = vmatmul.msk.bf16.gmra.mxu0 %vm462_vm3, %v4076_v14  ;;  %3475 = vmatmul.msk.bf16.gmra.mxu3 %vm462_vm3, %v1138_v42  ;;  %v1386_v14 = vor.u32 %v1385_v45, %v1382_v44  ;;  %v1424_v42 = vshrl.u32 %v3688_v11, 16 }
  0x67   : > { %v1404_v2 = vsel %vm1378_vm5, %v1394_v49, %v1403_v0  ;;  %v1422_v34 = vsel %vm1378_vm5, %v1412_v9, %v1421_v30 }
  0x68   : > { %v1395_v37 = vsel %vm1378_vm5, %v1386_v14, %v1394_v49  ;;  %v1426_v40 = vrot.slane %v1424_v42, 1 }
  0x73   : > { %3366 = vmatmul.msk.bf16.vlgmr.msrb.gmra.mxu1 %vm462_vm3, %v3968_v23  ;;  %3388 = vmatmul.msk.bf16.vlgmr.msrb.gmra.mxu2 %vm462_vm3, %v770_v41  ;;  %v772_v23 = vsel %vm767_vm4, %v769_v48, %v771_v63  ;;  %v1429_v48 = vrot.slane %v1427_v59, 2  ;;  %v3692_v59 = vld [vmem:[%s3950_s11 + $0x50] sm:$0xff] }
  0x75   : > { %v1430_v14 = vor.u32 %v1429_v48, %v1426_v40 }
  0x76   : > { %3492 = vmatmul.msk.bf16.vlgmr.msrb.gmra.mxu0 %vm462_vm3, %v1395_v37  ;;  %3476 = vmatmul.msk.bf16.gmra.mxu3 %vm462_vm3, %v1140_v57  ;;  %v3690_v37 = vld [vmem:[%s3950_s11 + $0x40] sm:$0xff] }
  0x77   : > { %v1431_v56 = vsel %vm1378_vm5, %v1421_v30, %v1430_v14  ;;  %v1147_v57 = vrot.slane %v3690_v37, 1  ;;  %v1442_v15 = vshrl.u32 %v3690_v37, 16  ;;  %v1445_v16 = vshll.u32 %v3690_v37, 16 }
  0x79   : > { %v1444_v30 = vrot.slane %v1442_v15, 1 }
  0x83   : > { %3367 = vmatmul.msk.bf16.gmra.mxu1 %vm462_vm3, %v3971_v24  ;;  %3389 = vmatmul.msk.bf16.gmra.mxu2 %vm462_vm3, %v772_v23  ;;  %v774_v24 = vsel %vm767_vm4, %v771_v63, %v773_v8  ;;  %v1148_v23 = vsel %vm767_vm4, %v1145_v35, %v1147_v57 }
  0x86   : > { %3493 = vmatmul.msk.bf16.gmra.mxu0 %vm462_vm3, %v1404_v2  ;;  %3477 = vmatmul.msk.bf16.gmra.mxu3 %vm462_vm3, %v1142_v5 }
  0x93   : > { %3368 = vmatmul.msk.bf16.gmra.mxu1 %vm462_vm3, %v4006_v58  ;;  %3390 = vmatmul.msk.bf16.gmra.mxu2 %vm462_vm3, %v774_v24  ;;  %v776_v58 = vsel %vm767_vm4, %v773_v8, %v775_v29  ;;  %v3691_v8 = vld [vmem:[%s3950_s11 + $0x48] sm:$0xff] }
  0x94   : > { %v1454_v37 = vshll.u32 %v3691_v8, 16 }
  0x96   : > { %3494 = vmatmul.msk.bf16.gmra.mxu0 %vm462_vm3, %v1413_v12  ;;  %3478 = vmatmul.msk.bf16.gmra.mxu3 %vm462_vm3, %v1144_v25  ;;  %v1149_v12 = vrot.slane %v3691_v8, 1 }
  0x98   : > { %v1150_v28 = vsel %vm767_vm4, %v1147_v57, %v1149_v12 }
  0xa0   : > { %v4163_v31 = vpop.f32.mrf.mxu1 }
  0xa3   : > { %v4167_v17 = vpop.f32.mrf.mxu0  ;;  %3369 = vmatmul.msk.bf16.gmra.mxu1 %vm462_vm3, %v4043_v43  ;;  %3391 = vmatmul.msk.bf16.gmra.mxu2 %vm462_vm3, %v776_v58  ;;  %v777_v43 = vrot.slane %v3955_v18, 1 }
  0xa5   : > { %v778_v46 = vsel %vm767_vm4, %v775_v29, %v777_v43  ;;  %v780_v9 = vsel %vm767_vm4, %v777_v43, %v779_v3  ;;  %v1151_v43 = vrot.slane %v3692_v59, 1 }
  0xa6   : > { %3495 = vmatmul.msk.bf16.gmra.mxu0 %vm462_vm3, %v1422_v34  ;;  %v4174_v44 = vpop.f32.mrf.mxu2  ;;  %3479 = vmatmul.msk.bf16.gmra.mxu3 %vm462_vm3, %v1146_v47  ;;  %v782_v47 = vsel %vm767_vm4, %v779_v3, %v781_v32 }
  0xa7   : > { %v1152_v60 = vsel %vm767_vm4, %v1149_v12, %v1151_v43 }
  0xa8   : > { %v4176_v45 = vpop.f32.mrf.mxu1 }
  0xa9   : > { %v4183_v49 = vpop.f32.mrf.mxu3 }
  0xaa   : > { %5073 = vst [vmem:[#allocation6_spill] sm:$0xff] %v4183_v49 }
  0xab   : > { %v4179_v52 = vpop.f32.mrf.mxu0 }
  0xae   : > { %v4185_v50 = vpop.f32.mrf.mxu2 }
  0xb0   : > { %v4187_v41 = vpop.f32.mrf.mxu1 }
  0xb1   : > { %v4198_v63 = vpop.f32.mrf.mxu3 }
  0xb2   : > { %5074 = vst [vmem:[#allocation7_spill] sm:$0xff] %v4198_v63 }
  0xb3   : > { %v4191_v54 = vpop.f32.mrf.mxu0  ;;  %3370 = vmatmul.msk.bf16.gmra.mxu1 %vm462_vm3, %v4051_v51  ;;  %3392 = vmatmul.msk.bf16.gmra.mxu2 %vm462_vm3, %v778_v46  ;;  %v1438_v51 = vrot.slane %v1436_v62, 2 }
  0xb5   : > { %v1439_v4 = vor.u32 %v1438_v51, %v1435_v39  ;;  %v783_v39 = vrot.slane %v4033_v33, 1 }
  0xb6   : > { %3496 = vmatmul.msk.bf16.gmra.mxu0 %vm462_vm3, %v1431_v56  ;;  %v4200_v0 = vpop.f32.mrf.mxu2  ;;  %3480 = vmatmul.msk.bf16.gmra.mxu3 %vm462_vm3, %v1148_v23 }
  0xb7   : > { %v1440_v24 = vsel %vm1378_vm5, %v1430_v14, %v1439_v4  ;;  %v1451_v14 = vshrl.u32 %v3691_v8, 16 }
  0xb8   : > { %v4202_v1 = vpop.f32.mrf.mxu1 }
  0xb9   : > { %v4209_v5 = vpop.f32.mrf.mxu3  ;;  %v1453_v23 = vrot.slane %v1451_v14, 1 }
  0xba   : > { %5075 = vst [vmem:[#allocation8_spill] sm:$0xff] %v4209_v5 }
  0xbb   : > { %v4205_v2 = vpop.f32.mrf.mxu0 }
  0xbe   : > { %v4211_v6 = vpop.f32.mrf.mxu2 }
  0xc0   : > { %v4213_v7 = vpop.f32.mrf.mxu1 }
  0xc1   : > { %v4224_v22 = vpop.f32.mrf.mxu3 }
  0xc2   : > { %5076 = vst [vmem:[#allocation9_spill] sm:$0xff] %v4224_v22 }
  0xc3   : > { %v4217_v11 = vpop.f32.mrf.mxu0  ;;  %3371 = vmatmul.msk.bf16.gmra.mxu1 %vm462_vm3, %v3955_v18  ;;  %3393 = vmatmul.msk.bf16.gmra.mxu2 %vm462_vm3, %v780_v9  ;;  %v1447_v18 = vrot.slane %v1445_v16, 2  ;;  %v3693_v9 = vld [vmem:[%s3950_s11 + $0x58] sm:$0xff] }
  0xc4   : > { %v1153_v16 = vrot.slane %v3693_v9, 1 }
  0xc5   : > { %v1448_v58 = vor.u32 %v1447_v18, %v1444_v30  ;;  %v1463_v30 = vshll.u32 %v3692_v59, 16 }
  0xc6   : > { %3497 = vmatmul.msk.bf16.gmra.mxu0 %vm462_vm3, %v1440_v24  ;;  %v4226_v25 = vpop.f32.mrf.mxu2  ;;  %3481 = vmatmul.msk.bf16.gmra.mxu3 %vm462_vm3, %v1150_v28  ;;  %v784_v24 = vsel %vm767_vm4, %v781_v32, %v783_v39  ;;  %v1460_v28 = vshrl.u32 %v3692_v59, 16  ;;  %v1154_v32 = vsel %vm767_vm4, %v1151_v43, %v1153_v16 }
  0xc7   : > { %v1449_v48 = vsel %vm1378_vm5, %v1439_v4, %v1448_v58 }
  0xc8   : > { %v4228_v26 = vpop.f32.mrf.mxu1 }
  0xc9   : > { %v4235_v34 = vpop.f32.mrf.mxu3 }
  0xca   : > { %5077 = vst [vmem:[#allocation10_spill] sm:$0xff] %v4235_v34 }
  0xcb   : > { %v4231_v29 = vpop.f32.mrf.mxu0 }
  0xce   : > { %v4237_v35 = vpop.f32.mrf.mxu2 }
  0xd0   : > { %v4239_v42 = vpop.f32.mrf.mxu1 }
  0xd1   : > { %v4250_v46 = vpop.f32.mrf.mxu3 }
  0xd2   : > { %5078 = vst [vmem:[#allocation11_spill] sm:$0xff] %v4250_v46 }
  0xd3   : > { %v4243_v40 = vpop.f32.mrf.mxu0  ;;  %3372 = vmatmul.msk.bf16.gmra.mxu1 %vm462_vm3, %v3958_v19  ;;  %3394 = vmatmul.msk.bf16.gmra.mxu2 %vm462_vm3, %v782_v47  ;;  %v1456_v19 = vrot.slane %v1454_v37, 2  ;;  %v1465_v37 = vrot.slane %v1463_v30, 2  ;;  %v1469_v30 = vshrl.u32 %v3693_v9, 16 }
  0xd5   : > { %v1457_v51 = vor.u32 %v1456_v19, %v1453_v23  ;;  %v1471_v63 = vrot.slane %v1469_v30, 1 }
  0xd6   : > { %3498 = vmatmul.msk.bf16.gmra.mxu0 %vm462_vm3, %v1449_v48  ;;  %v4252_v56 = vpop.f32.mrf.mxu2  ;;  %3482 = vmatmul.msk.bf16.gmra.mxu3 %vm462_vm3, %v1152_v60 }
  0xd7   : > { %v1458_v12 = vsel %vm1378_vm5, %v1448_v58, %v1457_v51  ;;  %v1462_v58 = vrot.slane %v1460_v28, 1 }
  0xd8   : > { %v4254_v57 = vpop.f32.mrf.mxu1 }
  0xd9   : > { %v1247_v3 = vpop.f32.mrf.mxu3  ;;  %v1466_v60 = vor.u32 %v1465_v37, %v1462_v58 }
  0xdb   : > { %v4257_v62 = vpop.f32.mrf.mxu0  ;;  %v1467_v46 = vsel %vm1378_vm5, %v1457_v51, %v1466_v60 }
  0xde   : > { %v4261_v4 = vpop.f32.mrf.mxu2 }
  0xe0   : > { %v4263_v8 = vpop.f32.mrf.mxu1 }
  0xe1   : > { %v1249_v18 = vpop.f32.mrf.mxu3 }
  0xe3   : > { %v4267_v15 = vpop.f32.mrf.mxu0  ;;  %3373 = vmatmul.msk.bf16.gmra.mxu1 %vm462_vm3, %v3999_v53  ;;  %3395 = vmatmul.msk.bf16.gmra.mxu2 %vm462_vm3, %v784_v24  ;;  %v785_v53 = vrot.slane %v4024_v13, 1  ;;  %v3694_v24 = vld [vmem:[%s3950_s11 + $0x60] sm:$0xff] }
  0xe4   : > { %v1155_v43 = vrot.slane %v3694_v24, 1 }
  0xe6   : > { %3499 = vmatmul.msk.bf16.gmra.mxu0 %vm462_vm3, %v1458_v12  ;;  %v4274_v47 = vpop.f32.mrf.mxu2  ;;  %3483 = vmatmul.msk.bf16.gmra.mxu3 %vm462_vm3, %v1154_v32  ;;  %v786_v12 = vsel %vm767_vm4, %v783_v39, %v785_v53  ;;  %v1472_v32 = vshll.u32 %v3693_v9, 16  ;;  %v1156_v22 = vsel %vm767_vm4, %v1153_v16, %v1155_v43 }
  0xe8   : > { %v4276_v48 = vpop.f32.mrf.mxu1 }
  0xe9   : > { %v1252_v23 = vpop.f32.mrf.mxu3 }
  0xeb   : > { %v4279_v14 = vpop.f32.mrf.mxu0 }
  0xee   : > { %v4283_v19 = vpop.f32.mrf.mxu2 }
  0xef   : > { %5079 = vst [vmem:[#allocation12_spill] sm:$0xff] %v4283_v19  ;;  %v3695_v19 = vld [vmem:[%s3950_s11 + $0x68] sm:$0xff] }
  0xf0   : > { %v671_v59 = vpop.f32.mrf.mxu1 }
  0xf1   : > { %v672_v28 = vadd.f32 %v671_v59, %v4167_v17  ;;  %v1254_v58 = vpop.f32.mrf.mxu3 }
  0xf3   : > { %v1619_v36 = vpop.f32.mrf.mxu0  ;;  %3374 = vmatmul.msk.bf16.gmra.mxu1 %vm462_vm3, %v4033_v33  ;;  %3396 = vmatmul.msk.bf16.gmra.mxu2 %vm462_vm3, %v786_v12  ;;  %v1474_v33 = vrot.slane %v1472_v32, 2 }
  0xf5   : > { %v1475_v9 = vor.u32 %v1474_v33, %v1471_v63  ;;  %v1481_v63 = vshll.u32 %v3694_v24, 16 }
  0xf6   : > { %3500 = vmatmul.msk.bf16.gmra.mxu0 %vm462_vm3, %v1467_v46  ;;  %v877_v37 = vpop.f32.mrf.mxu2  ;;  %3484 = vmatmul.msk.bf16.gmra.mxu3 %vm462_vm3, %v1156_v22  ;;  %v787_v46 = vrot.slane %v3961_v20, 1 }
  0xf7   : > { %v967_v34 = vadd.f32 %v877_v37, %v672_v28  ;;  %v1476_v30 = vsel %vm1378_vm5, %v1466_v60, %v1475_v9 }
  0xf8   : > { %v673_v39 = vpop.f32.mrf.mxu1  ;;  %v788_v16 = vsel %vm767_vm4, %v785_v53, %v787_v46 }
  0xf9   : > { %v1337_v51 = vadd.f32 %v1247_v3, %v967_v34  ;;  %v674_v17 = vadd.f32 %v673_v39, %v4179_v52  ;;  %v1257_v59 = vpop.f32.mrf.mxu3 }
  0xfb   : > { %v1621_v5 = vpop.f32.mrf.mxu0  ;;  %v4295_v12 = vadd.f32 %v1619_v36, %v1337_v51  ;;  %v1157_v36 = vrot.slane %v3695_v19, 1 }
  0xfd   : > { %v1158_v60 = vsel %vm767_vm4, %v1155_v43, %v1157_v36 }
  0xfe   : > { %v879_v49 = vpop.f32.mrf.mxu2 }
  0xff   : > { %v968_v28 = vadd.f32 %v879_v49, %v674_v17  ;;  %v1478_v49 = vshrl.u32 %v3694_v24, 16  ;;  %v1483_v17 = vrot.slane %v1481_v63, 2 }
 0x100   : > { %v676_v37 = vpop.f32.mrf.mxu1 }
 0x101   : > { %v1338_v34 = vadd.f32 %v1249_v18, %v968_v28  ;;  %v677_v52 = vadd.f32 %v676_v37, %v4191_v54  ;;  %v1259_v32 = vpop.f32.mrf.mxu3  ;;  %v1480_v33 = vrot.slane %v1478_v49, 1  ;;  %v789_v28 = vrot.slane %v3964_v21, 1 }
 0x103   : > { %v1624_v3 = vpop.f32.mrf.mxu0  ;;  %3375 = vmatmul.msk.bf16.gmra.mxu1 %vm462_vm3, %v4024_v13  ;;  %3397 = vmatmul.msk.bf16.gmra.mxu2 %vm462_vm3, %v788_v16  ;;  %v4305_v22 = vadd.f32 %v1621_v5, %v1338_v34  ;;  %v1484_v24 = vor.u32 %v1483_v17, %v1480_v33  ;;  %v790_v43 = vsel %vm767_vm4, %v787_v46, %v789_v28 }
 0x105   : > { %v1485_v49 = vsel %vm1378_vm5, %v1475_v9, %v1484_v24 }
 0x106   : > { %3501 = vmatmul.msk.bf16.gmra.mxu0 %vm462_vm3, %v1476_v30  ;;  %v882_v53 = vpop.f32.mrf.mxu2  ;;  %3485 = vmatmul.msk.bf16.gmra.mxu3 %vm462_vm3, %v1158_v60 }
 0x107   : > { %v969_v18 = vadd.f32 %v882_v53, %v677_v52  ;;  %v3696_v52 = vld [vmem:[%s3950_s11 + $0x70] sm:$0xff] }
 0x108   : > { %v678_v39 = vpop.f32.mrf.mxu1 }
 0x109   : > { %v1339_v51 = vadd.f32 %v1252_v23, %v969_v18  ;;  %v679_v54 = vadd.f32 %v678_v39, %v4205_v2  ;;  %v1262_v37 = vpop.f32.mrf.mxu3  ;;  %v1487_v18 = vshrl.u32 %v3695_v19, 16  ;;  %v1490_v39 = vshll.u32 %v3695_v19, 16 }
 0x10b   : > { %v1626_v13 = vpop.f32.mrf.mxu0  ;;  %v4311_v5 = vadd.f32 %v1624_v3, %v1339_v51  ;;  %v1159_v3 = vrot.slane %v3696_v52, 1  ;;  %v1489_v17 = vrot.slane %v1487_v18, 1 }
 0x10d   : > { %v1160_v9 = vsel %vm767_vm4, %v1157_v36, %v1159_v3 }
 0x10e   : > { %v884_v16 = vpop.f32.mrf.mxu2 }
 0x10f   : > { %v970_v34 = vadd.f32 %v884_v16, %v679_v54  ;;  %v1492_v54 = vrot.slane %v1490_v39, 2  ;;  %v791_v16 = vrot.slane %v4003_v55, 1 }
 0x110   : > { %v681_v30 = vpop.f32.mrf.mxu1 }
 0x111   : > { %v1340_v23 = vadd.f32 %v1254_v58, %v970_v34  ;;  %v682_v2 = vadd.f32 %v681_v30, %v4217_v11  ;;  %v1264_v60 = vpop.f32.mrf.mxu3  ;;  %v1493_v19 = vor.u32 %v1492_v54, %v1489_v17  ;;  %v792_v36 = vsel %vm767_vm4, %v789_v28, %v791_v16 }
 0x113   : > { %v1629_v53 = vpop.f32.mrf.mxu0  ;;  %3376 = vmatmul.msk.bf16.gmra.mxu1 %vm462_vm3, %v3961_v20  ;;  %3398 = vmatmul.msk.bf16.gmra.mxu2 %vm462_vm3, %v790_v43  ;;  %v4321_v63 = vadd.f32 %v1626_v13, %v1340_v23  ;;  %v1494_v18 = vsel %vm1378_vm5, %v1484_v24, %v1493_v19 }
 0x116   : > { %3502 = vmatmul.msk.bf16.gmra.mxu0 %vm462_vm3, %v1485_v49  ;;  %v887_v46 = vpop.f32.mrf.mxu2  ;;  %3486 = vmatmul.msk.bf16.gmra.mxu3 %vm462_vm3, %v1160_v9  ;;  %v3697_v49 = vld [vmem:[%s3950_s11 + $0x78] sm:$0xff] }
 0x117   : > { %v971_v58 = vadd.f32 %v887_v46, %v682_v2  ;;  %v1496_v46 = vshrl.u32 %v3696_v52, 16 }
 0x118   : > { %v683_v51 = vpop.f32.mrf.mxu1 }
 0x119   : > { %v1341_v33 = vadd.f32 %v1257_v59, %v971_v58  ;;  %v684_v11 = vadd.f32 %v683_v51, %v4231_v29  ;;  %v1267_v34 = vpop.f32.mrf.mxu3  ;;  %v1499_v58 = vshll.u32 %v3696_v52, 16  ;;  %v1498_v17 = vrot.slane %v1496_v46, 1 }
 0x11b   : > { %v1631_v20 = vpop.f32.mrf.mxu0  ;;  %v4327_v13 = vadd.f32 %v1629_v53, %v1341_v33  ;;  %v1161_v53 = vrot.slane %v3697_v49, 1  ;;  %v1501_v54 = vrot.slane %v1499_v58, 2  ;;  %v1505_v58 = vshrl.u32 %v3697_v49, 16 }
 0x11d   : > { %v1162_v24 = vsel %vm767_vm4, %v1159_v3, %v1161_v53  ;;  %v1502_v52 = vor.u32 %v1501_v54, %v1498_v17  ;;  %v795_v54 = vrot.slane %v4072_v10, 1 }
 0x11e   : > { %v889_v30 = vpop.f32.mrf.mxu2 }
 0x11f   : > { %v972_v43 = vadd.f32 %v889_v30, %v684_v11  ;;  %v793_v11 = vrot.slane %v4038_v38, 1 }
 0x120   : > { %v686_v23 = vpop.f32.mrf.mxu1 }
 0x121   : > { %v1342_v59 = vadd.f32 %v1259_v32, %v972_v43  ;;  %v687_v29 = vadd.f32 %v686_v23, %v4243_v40  ;;  %v1269_v51 = vpop.f32.mrf.mxu3  ;;  %v794_v3 = vsel %vm767_vm4, %v791_v16, %v793_v11 }
 0x123   : > { %v1634_v2 = vpop.f32.mrf.mxu0  ;;  %3377 = vmatmul.msk.bf16.gmra.mxu1 %vm462_vm3, %v3964_v21  ;;  %3399 = vmatmul.msk.bf16.gmra.mxu2 %vm462_vm3, %v792_v36  ;;  %v4337_v39 = vadd.f32 %v1631_v20, %v1342_v59  ;;  %v3698_v59 = vld [vmem:[%s3950_s11 + $0x80] sm:$0xff] }
 0x126   : > { %3503 = vmatmul.msk.bf16.gmra.mxu0 %vm462_vm3, %v1494_v18  ;;  %v892_v28 = vpop.f32.mrf.mxu2  ;;  %3487 = vmatmul.msk.bf16.gmra.mxu3 %vm462_vm3, %v1162_v24 }
 0x127   : > { %v973_v32 = vadd.f32 %v892_v28, %v687_v29  ;;  %v1503_v29 = vsel %vm1378_vm5, %v1493_v19, %v1502_v52  ;;  %v1508_v28 = vshll.u32 %v3697_v49, 16 }
 0x128   : > { %v688_v9 = vpop.f32.mrf.mxu1 }
 0x129   : > { %v1343_v33 = vadd.f32 %v1262_v37, %v973_v32  ;;  %v689_v40 = vadd.f32 %v688_v9, %v4257_v62  ;;  %v1272_v30 = vpop.f32.mrf.mxu3  ;;  %v1510_v17 = vrot.slane %v1508_v28, 2  ;;  %v1517_v28 = vshll.u32 %v3698_v59, 16 }
 0x12b   : > { %v1636_v21 = vpop.f32.mrf.mxu0  ;;  %v4343_v20 = vadd.f32 %v1634_v2, %v1343_v33  ;;  %v1163_v2 = vrot.slane %v3698_v59, 1  ;;  %v1507_v33 = vrot.slane %v1505_v58, 1  ;;  %v1514_v58 = vshrl.u32 %v3698_v59, 16 }
 0x12d   : > { %v1164_v19 = vsel %vm767_vm4, %v1161_v53, %v1163_v2  ;;  %v1511_v49 = vor.u32 %v1510_v17, %v1507_v33  ;;  %v796_v53 = vsel %vm767_vm4, %v793_v11, %v795_v54  ;;  %v3774_v33 = vld [vmem:[%s3950_s11 + $0x78] sm:$0xff] }
 0x12e   : > { %v894_v43 = vpop.f32.mrf.mxu2  ;;  %v797_v17 = vrot.slane %v3774_v33, 1 }
 0x12f   : > { %v974_v23 = vadd.f32 %v894_v43, %v689_v40 }
 0x130   : > { %v691_v36 = vpop.f32.mrf.mxu1 }
 0x131   : > { %v1344_v37 = vadd.f32 %v1264_v60, %v974_v23  ;;  %v692_v62 = vadd.f32 %v691_v36, %v4267_v15  ;;  %v1274_v32 = vpop.f32.mrf.mxu3 }
 0x133   : > { %v1639_v18 = vpop.f32.mrf.mxu0  ;;  %3378 = vmatmul.msk.bf16.gmra.mxu1 %vm462_vm3, %v4003_v55  ;;  %3400 = vmatmul.msk.bf16.gmra.mxu2 %vm462_vm3, %v794_v3  ;;  %v4353_v46 = vadd.f32 %v1636_v21, %v1344_v37  ;;  %v3699_v3 = vld [vmem:[%s3950_s11 + $0x88] sm:$0xff] }
 0x136   : > { %3504 = vmatmul.msk.bf16.gmra.mxu0 %vm462_vm3, %v1503_v29  ;;  %v897_v16 = vpop.f32.mrf.mxu2  ;;  %3488 = vmatmul.msk.bf16.gmra.mxu3 %vm462_vm3, %v1164_v19  ;;  %v1512_v29 = vsel %vm1378_vm5, %v1502_v52, %v1511_v49  ;;  %v1516_v19 = vrot.slane %v1514_v58, 1  ;;  %v1523_v58 = vshrl.u32 %v3699_v3, 16 }
 0x137   : > { %v975_v60 = vadd.f32 %v897_v16, %v692_v62 }
 0x138   : > { %v693_v9 = vpop.f32.mrf.mxu1 }
 0x139   : > { %v1345_v24 = vadd.f32 %v1267_v34, %v975_v60  ;;  %v694_v15 = vadd.f32 %v693_v9, %v4279_v14  ;;  %v1277_v40 = vpop.f32.mrf.mxu3 }
 0x13b   : > { %v1641_v55 = vpop.f32.mrf.mxu0  ;;  %v4359_v21 = vadd.f32 %v1639_v18, %v1345_v24  ;;  %v1165_v18 = vrot.slane %v3699_v3, 1  ;;  %v1519_v24 = vrot.slane %v1517_v28, 2 }
 0x13d   : > { %v1166_v52 = vsel %vm767_vm4, %v1163_v2, %v1165_v18  ;;  %v1520_v59 = vor.u32 %v1519_v24, %v1516_v19  ;;  %v798_v2 = vsel %vm767_vm4, %v795_v54, %v797_v17  ;;  %v1526_v54 = vshll.u32 %v3699_v3, 16  ;;  %v3775_v3 = vld [vmem:[%s3950_s11 + $0x80] sm:$0xff] }
 0x13e   : > { %v899_v43 = vpop.f32.mrf.mxu2  ;;  %v799_v24 = vrot.slane %v3775_v3, 1 }
 0x13f   : > { %v976_v23 = vadd.f32 %v899_v43, %v694_v15 }
 0x140   : > { %v696_v36 = vpop.f32.mrf.mxu1 }
 0x141   : > { %v1346_v34 = vadd.f32 %v1269_v51, %v976_v23  ;;  %v697_v14 = vadd.f32 %v696_v36, %v4163_v31  ;;  %v1279_v11 = vpop.f32.mrf.mxu3 }
 0x143   : > { %v1644_v37 = vpop.f32.mrf.mxu0  ;;  %3379 = vmatmul.msk.bf16.gmra.mxu1 %vm462_vm3, %v4038_v38  ;;  %3401 = vmatmul.msk.bf16.gmra.mxu2 %vm462_vm3, %v796_v53  ;;  %v4369_v62 = vadd.f32 %v1641_v55, %v1346_v34  ;;  %v3700_v53 = vld [vmem:[%s3950_s11 + $0x90] sm:$0xff] }
 0x146   : > { %3505 = vmatmul.msk.bf16.gmra.mxu0 %vm462_vm3, %v1512_v29  ;;  %v902_v51 = vpop.f32.mrf.mxu2  ;;  %3489 = vmatmul.msk.bf16.gmra.mxu3 %vm462_vm3, %v1166_v52  ;;  %v1521_v29 = vsel %vm1378_vm5, %v1511_v49, %v1520_v59 }
 0x147   : > { %v977_v16 = vadd.f32 %v902_v51, %v697_v14 }
 0x148   : > { %v698_v60 = vpop.f32.mrf.mxu1 }
 0x149   : > { %v1347_v38 = vadd.f32 %v1272_v30, %v977_v16  ;;  %v699_v31 = vadd.f32 %v698_v60, %v4176_v45  ;;  %v1282_v15 = vpop.f32.mrf.mxu3 }
 0x14b   : > { %v1646_v9 = vpop.f32.mrf.mxu0  ;;  %v4375_v55 = vadd.f32 %v1644_v37, %v1347_v38  ;;  %v1167_v37 = vrot.slane %v3700_v53, 1  ;;  %v1525_v38 = vrot.slane %v1523_v58, 1 }
 0x14d   : > { %v1168_v16 = vsel %vm767_vm4, %v1165_v18, %v1167_v37 }
 0x14e   : > { %v904_v43 = vpop.f32.mrf.mxu2 }
 0x14f   : > { %v978_v23 = vadd.f32 %v904_v43, %v699_v31 }
 0x150   : > { %v701_v36 = vpop.f32.mrf.mxu1 }
 0x151   : > { %v1348_v30 = vadd.f32 %v1274_v32, %v978_v23  ;;  %v702_v14 = vadd.f32 %v701_v36, %v4187_v41  ;;  %v4389_v32 = vpop.f32.mrf.mxu3 }
 0x153   : > { %v1649_v34 = vpop.f32.mrf.mxu0  ;;  %3380 = vmatmul.msk.bf16.gmra.mxu1 %vm462_vm3, %v4072_v10  ;;  %3402 = vmatmul.msk.bf16.gmra.mxu2 %vm462_vm3, %v798_v2  ;;  %v4385_v45 = vadd.f32 %v1646_v9, %v1348_v30  ;;  %v1039_v10 = vld [vmem:[%s3950_s11 + $0x98] sm:$0x1]  ;;  %v1528_v9 = vrot.slane %v1526_v54, 2  ;;  %v800_v30 = vsel %vm767_vm4, %v797_v17, %v799_v24  ;;  %v1994_v54 = vld [vmem:[%s3950_s11 + $0x10] sm:$0xc]  ;;  %v1532_v17 = vshrl.u32 %v3700_v53, 16 }
 0x154   : > { %v1114_v19 = vunpack.c.l.b16 %v1039_v10 }
 0x155   : > { %v1529_v43 = vor.u32 %v1528_v9, %v1525_v38  ;;  %v4421_v9 = vld [vmem:[%s3950_s11 + $0x18] sm:$0xff] }
 0x156   : > { %3506 = vmatmul.msk.bf16.gmra.mxu0 %vm462_vm3, %v1521_v29  ;;  %v907_v28 = vpop.f32.mrf.mxu2  ;;  %3490 = vmatmul.msk.bf16.gmra.mxu3 %vm462_vm3, %v1168_v16  ;;  %v1133_v2 = vpack.c.b16 %v1114_v19, %v1114_v19 }
 0x157   : > { %v979_v51 = vadd.f32 %v907_v28, %v702_v14  ;;  %v1530_v58 = vsel %vm1378_vm5, %v1520_v59, %v1529_v43  ;;  %v1535_v59 = vshll.u32 %v3700_v53, 16  ;;  %v1373_v53 = vld [vmem:[%s3950_s11 + $0x98] sm:$0x3] }
 0x158   : > { %v703_v49 = vpop.f32.mrf.mxu1 }
 0x159   : > { %v1349_v60 = vadd.f32 %v1277_v40, %v979_v51  ;;  %v704_v31 = vadd.f32 %v703_v49, %v4202_v1  ;;  %v4398_v23 = vpop.f32.mrf.mxu3  ;;  %v2069_v1 = vunpack.c.l.b16 %v1994_v54  ;;  %v1169_v51 = vrot.slane %v1133_v2, 1 }
 0x15a   : > { %v2373_v2 = vshrl.u32 %v4421_v9, 16 }
 0x15b   : > { %v1651_v52 = vpop.f32.mrf.mxu0  ;;  %v4394_v41 = vadd.f32 %v1649_v34, %v1349_v60  ;;  %v4404_v34 = vld [vmem:[%s3950_s11 + $0x14] sm:$0xf] }
 0x15c   : > { %v5070_v28 = vunpack.c.l.b16 %v4404_v34 }
 0x15d   : > { %5080 = vst [vmem:[#allocation13_spill] sm:$0xff] %v4394_v41 }
 0x15e   : > { %v909_v18 = vpop.f32.mrf.mxu2 }
 0x15f   : > { %v980_v36 = vadd.f32 %v909_v18, %v704_v31  ;;  %v1534_v18 = vrot.slane %v1532_v17, 1 }
 0x160   : > { %v706_v40 = vpop.f32.mrf.mxu1 }
 0x161   : > { %v1350_v29 = vadd.f32 %v1279_v11, %v980_v36  ;;  %v707_v11 = vadd.f32 %v706_v40, %v4213_v7  ;;  %v4413_v16 = vpop.f32.mrf.mxu3  ;;  %v1537_v7 = vrot.slane %v1535_v59, 2 }
 0x163   : > { %v1654_v14 = vpop.f32.mrf.mxu0  ;;  %3381 = vmatmul.msk.bf16.gmra.mxu1 %vm462_vm3, %v3774_v33  ;;  %3403 = vmatmul.msk.bf16.gmra.mxu2 %vm462_vm3, %v800_v30  ;;  %v4409_v49 = vadd.f32 %v1651_v52, %v1350_v29  ;;  %v4417_v33 = vpack.c.b16 %v5070_v28, %v2069_v1  ;;  %v1170_v52 = vsel %vm767_vm4, %v1167_v37, %v1169_v51  ;;  %v2376_v30 = vshll.u32 %v4421_v9, 16  ;;  %v3776_v37 = vld [vmem:[%s3950_s11 + $0x88] sm:$0xff] }
 0x164   : > { %v1538_v54 = vor.u32 %v1537_v7, %v1534_v18  ;;  %v1376_v51 = vunpack.c.l.b16 %v1373_v53 }
 0x165   : > { %5081 = vst [vmem:[#allocation14_spill] sm:$0xff] %v4409_v49  ;;  %v2365_v36 = vshrl.u32 %v4417_v33, 16  ;;  %v2368_v40 = vshll.u32 %v4417_v33, 16  ;;  %v2378_v28 = vrot.slane %v2376_v30, 3 }
 0x166   : > { %3507 = vmatmul.msk.bf16.gmra.mxu0 %vm462_vm3, %v1530_v58  ;;  %v912_v10 = vpop.f32.mrf.mxu2  ;;  %3491 = vmatmul.msk.bf16.gmra.mxu3 %vm462_vm3, %v1170_v52  ;;  %v801_v58 = vrot.slane %v3776_v37, 1  ;;  %v2375_v52 = vrot.slane %v2373_v2, 2  ;;  %v4438_v41 = vpack.c.b16 %v1376_v51, %v1376_v51  ;;  %v803_v51 = vrot.slane %v4060_v61, 1 }
 0x167   : > { %v981_v60 = vadd.f32 %v912_v10, %v707_v11  ;;  %v2367_v17 = vrot.slane %v2365_v36, 2 }
 0x168   : > { %v708_v38 = vpop.f32.mrf.mxu1  ;;  %v802_v49 = vsel %vm767_vm4, %v799_v24, %v801_v58 }
 0x169   : > { %v1351_v19 = vadd.f32 %v1282_v15, %v981_v60  ;;  %v709_v15 = vadd.f32 %v708_v38, %v4228_v26  ;;  %v4433_v1 = vpop.f32.mrf.mxu3  ;;  %v2370_v60 = vrot.slane %v2368_v40, 3  ;;  %v2379_v38 = vor.u32 %v2378_v28, %v2375_v52  ;;  %v4452_v40 = vld [vmem:[%s3950_s11 + $0x20] sm:$0xff]  ;;  %v1745_v52 = vld [vmem:[%s3950_s11 + $0x8] sm:$0xc] }
 0x16a   : > { %v1749_v61 = vunpack.c.l.b16 %v1745_v52 }
 0x16b   : > { %v1656_v31 = vpop.f32.mrf.mxu0  ;;  %v4429_v29 = vadd.f32 %v1654_v14, %v1351_v19  ;;  %v2371_v26 = vor.u32 %v2370_v60, %v2367_v17 }
 0x16d   : > { %5082 = vst [vmem:[#allocation15_spill] sm:$0xff] %v4429_v29  ;;  %v1539_v29 = vsel %vm1378_vm5, %v1529_v43, %v1538_v54  ;;  %v1544_v43 = vshll.u32 %v4438_v41, 16 }
 0x16e   : > { %v914_v11 = vpop.f32.mrf.mxu2 }
 0x16f   : > { %v982_v59 = vadd.f32 %v914_v11, %v709_v15  ;;  %v1546_v30 = vrot.slane %v1544_v43, 2 }
 0x170   : > { %v711_v10 = vpop.f32.mrf.mxu1 }
 0x171   : > { %v1352_v14 = vadd.f32 %v4389_v32, %v982_v59  ;;  %v712_v24 = vadd.f32 %v711_v10, %v4239_v42  ;;  %v1541_v32 = vshrl.u32 %v4438_v41, 16  ;;  %v4448_v7 = vpop.f32.mrf.mxu3  ;;  %v2382_v42 = vshrl.u32 %v4452_v40, 16 }
 0x173   : > { %v1659_v19 = vpop.f32.mrf.mxu0  ;;  %3382 = vmatmul.msk.bf16.gmra.mxu1 %vm462_vm3, %v3775_v3  ;;  %3404 = vmatmul.msk.bf16.gmra.mxu2 %vm462_vm3, %v802_v49  ;;  %v4442_v18 = vadd.f32 %v1656_v31, %v1352_v14  ;;  %v2380_v49 = vsel %vm2363_vm6, %v2371_v26, %v2379_v38  ;;  %v1543_v2 = vrot.slane %v1541_v32, 1  ;;  %v2384_v14 = vrot.slane %v2382_v42, 2  ;;  %v4481_v42 = vld [vmem:[%s3950_s11 + $0x28] sm:$0xff] }
 0x175   : > { %v1547_v17 = vor.u32 %v1546_v30, %v1543_v2 }
 0x176   : > { %3508 = vmatmul.msk.bf16.gmra.mxu0 %vm462_vm3, %v1539_v29  ;;  %v917_v53 = vpop.f32.mrf.mxu2  ;;  %3618 = vmatmul.msk.bf16.vlgmr.msra.gmra.mxu3 %vm462_vm3, %v2380_v49  ;;  %v2385_v29 = vshll.u32 %v4452_v40, 16 }
 0x177   : > { %v983_v36 = vadd.f32 %v917_v53, %v712_v24  ;;  %v804_v24 = vsel %vm767_vm4, %v801_v58, %v803_v51  ;;  %v1548_v43 = vsel %vm1378_vm5, %v1538_v54, %v1547_v17  ;;  %v5083_v54 = vunpack.c.l.b16 %v4084_v27  ;;  %v3777_v17 = vld [vmem:[%s3950_s11 + $0x10] sm:$0xff] }
 0x178   : > { %v713_v3 = vpop.f32.mrf.mxu1  ;;  %v2387_v26 = vrot.slane %v2385_v29, 3  ;;  %v5084_v51 = vunpack.c.l.b16 %v4404_v34  ;;  %v2391_v27 = vshrl.u32 %v4481_v42, 16 }
 0x179   : > { %v1353_v28 = vadd.f32 %v4398_v23, %v983_v36  ;;  %v714_v11 = vadd.f32 %v713_v3, %v4254_v57  ;;  %v4462_v59 = vpop.f32.mrf.mxu3  ;;  %v2737_v57 = vld [vmem:[%s3950_s11 + $0x10] sm:$0x8] }
 0x17a   : > { %v2388_v53 = vor.u32 %v2387_v26, %v2384_v14  ;;  %v2740_v3 = vunpack.c.l.b16 %v2737_v57  ;;  %v2744_v14 = vrot.slane %v4421_v9, 3  ;;  %v2393_v57 = vrot.slane %v2391_v27, 2 }
 0x17b   : > { %v1661_v31 = vpop.f32.mrf.mxu0  ;;  %v4458_v15 = vadd.f32 %v1659_v19, %v1353_v28  ;;  %v1750_v28 = vpack.c.b16 %v5083_v54, %v1749_v61 }
 0x17c   : > { %v2389_v30 = vsel %vm2363_vm6, %v2379_v38, %v2388_v53  ;;  %v2125_v38 = vrot.slane %v4417_v33, 2 }
 0x17e   : > { %v919_v23 = vpop.f32.mrf.mxu2 }
 0x17f   : > { %v984_v10 = vadd.f32 %v919_v23, %v714_v11  ;;  %v2741_v11 = vpack.c.b16 %v5084_v51, %v2740_v3  ;;  %v1753_v23 = vrot.slane %v3777_v17, 2 }
 0x180   : > { %v716_v60 = vpop.f32.mrf.mxu1 }
 0x181   : > { %v1354_v32 = vadd.f32 %v4413_v16, %v984_v10  ;;  %v717_v58 = vadd.f32 %v716_v60, %v4263_v8  ;;  %v4475_v16 = vpop.f32.mrf.mxu3  ;;  %v1752_v8 = vrot.slane %v1750_v28, 2  ;;  %v2394_v10 = vshll.u32 %v4481_v42, 16 }
 0x182   : > { %v2743_v34 = vrot.slane %v2741_v11, 3 }
 0x183   : > { %v1664_v19 = vpop.f32.mrf.mxu0  ;;  %3383 = vmatmul.msk.bf16.gmra.mxu1 %vm462_vm3, %v3776_v37  ;;  %3405 = vmatmul.msk.bf16.gmra.mxu2 %vm462_vm3, %v804_v24  ;;  %v4471_v36 = vadd.f32 %v1661_v31, %v1354_v32  ;;  %v1754_v61 = vsel %vm1751_vm7, %v1752_v8, %v1753_v23  ;;  %v3778_v8 = vld [vmem:[%s3950_s11 + $0x18] sm:$0xff] }
 0x186   : > { %3509 = vmatmul.msk.bf16.gmra.mxu0 %vm462_vm3, %v1548_v43  ;;  %v922_v49 = vpop.f32.mrf.mxu2  ;;  %3619 = vmatmul.msk.bf16.gmra.mxu3 %vm462_vm3, %v2389_v30 }
 0x187   : > { %v985_v37 = vadd.f32 %v922_v49, %v717_v58 }
 0x188   : > { %v718_v2 = vpop.f32.mrf.mxu1 }
 0x189   : > { %v1355_v31 = vadd.f32 %v4433_v1, %v985_v37  ;;  %v2126_v1 = vrot.slane %v4421_v9, 2  ;;  %v719_v52 = vadd.f32 %v718_v2, %v4276_v48  ;;  %v1302_v26 = vpop.f32.mrf.mxu3  ;;  %v2745_v48 = vsel %vm2742_vm8, %v2743_v34, %v2744_v14 }
 0x18b   : > { %v1666_v29 = vpop.f32.mrf.mxu0  ;;  %v4490_v60 = vadd.f32 %v1664_v19, %v1355_v31  ;;  %v2396_v19 = vrot.slane %v2394_v10, 3  ;;  %v2127_v58 = vsel %vm1751_vm7, %v2125_v38, %v2126_v1  ;;  %v4508_v31 = vld [vmem:[%s3950_s11 + $0x30] sm:$0xff]  ;;  %v2128_v10 = vrot.slane %v4452_v40, 2 }
 0x18c   : > { %v2400_v17 = vshrl.u32 %v4508_v31, 16  ;;  %v2403_v27 = vshll.u32 %v4508_v31, 16 }
 0x18d   : > { %v2397_v9 = vor.u32 %v2396_v19, %v2393_v57  ;;  %v2129_v57 = vsel %vm1751_vm7, %v2126_v1, %v2128_v10 }
 0x18e   : > { %v924_v24 = vpop.f32.mrf.mxu2 }
 0x18f   : > { %v986_v32 = vadd.f32 %v924_v24, %v719_v52 }
 0x190   : > { %v721_v43 = vpop.f32.mrf.mxu1 }
 0x191   : > { %v1356_v33 = vadd.f32 %v4448_v7, %v986_v32  ;;  %v722_v54 = vadd.f32 %v721_v43, %v4174_v44  ;;  %v1304_v28 = vpop.f32.mrf.mxu3  ;;  %v2398_v7 = vsel %vm2363_vm6, %v2388_v53, %v2397_v9  ;;  %v2746_v53 = vrot.slane %v4452_v40, 3 }
 0x192   : > { %v2402_v43 = vrot.slane %v2400_v17, 2 }
 0x193   : > { %v1669_v3 = vpop.f32.mrf.mxu0  ;;  %3514 = vmatmul.msk.bf16.vlgmr.msra.gmra.mxu1 %vm462_vm3, %v1754_v61  ;;  %3600 = vmatmul.msk.bf16.vlgmr.msra.gmra.mxu2 %vm462_vm3, %v2127_v58  ;;  %v4502_v49 = vadd.f32 %v1666_v29, %v1356_v33  ;;  %v1755_v29 = vrot.slane %v3778_v8, 2  ;;  %v2405_v61 = vrot.slane %v2403_v27, 3  ;;  %v2747_v33 = vsel %vm2742_vm8, %v2744_v14, %v2746_v53 }
 0x195   : > { %v1756_v32 = vsel %vm1751_vm7, %v1753_v23, %v1755_v29 }
 0x196   : > { %3636 = vmatmul.msk.bf16.vlgmr.msra.gmra.mxu0 %vm462_vm3, %v2745_v48  ;;  %v927_v37 = vpop.f32.mrf.mxu2  ;;  %3620 = vmatmul.msk.bf16.gmra.mxu3 %vm462_vm3, %v2398_v7 }
 0x197   : > { %v987_v2 = vadd.f32 %v927_v37, %v722_v54  ;;  %v4532_v37 = vld [vmem:[%s3950_s11 + $0x38] sm:$0xff] }
 0x198   : > { %v723_v30 = vpop.f32.mrf.mxu1 }
 0x199   : > { %v1357_v51 = vadd.f32 %v4462_v59, %v987_v2  ;;  %v724_v38 = vadd.f32 %v723_v30, %v4185_v50  ;;  %v1307_v52 = vpop.f32.mrf.mxu3  ;;  %v2406_v50 = vor.u32 %v2405_v61, %v2402_v43  ;;  %v3779_v30 = vld [vmem:[%s3950_s11 + $0x20] sm:$0xff] }
 0x19a   : > { %v1757_v7 = vrot.slane %v3779_v30, 2 }
 0x19b   : > { %v1671_v11 = vpop.f32.mrf.mxu0  ;;  %v4515_v44 = vadd.f32 %v1669_v3, %v1357_v51  ;;  %v2409_v51 = vshrl.u32 %v4532_v37, 16 }
 0x19e   : > { %v929_v34 = vpop.f32.mrf.mxu2 }
 0x19f   : > { %v988_v59 = vadd.f32 %v929_v34, %v724_v38 }
 0x1a0   : > { %v726_v24 = vpop.f32.mrf.mxu1 }
 0x1a1   : > { %v1358_v19 = vadd.f32 %v4475_v16, %v988_v59  ;;  %v727_v23 = vadd.f32 %v726_v24, %v4200_v0  ;;  %v1309_v3 = vpop.f32.mrf.mxu3  ;;  %v2407_v16 = vsel %vm2363_vm6, %v2397_v9, %v2406_v50  ;;  %v2130_v0 = vrot.slane %v4481_v42, 2 }
 0x1a2   : > { %v2748_v9 = vrot.slane %v4481_v42, 3  ;;  %v1758_v59 = vsel %vm1751_vm7, %v1755_v29, %v1757_v7  ;;  %v2411_v24 = vrot.slane %v2409_v51, 2 }
 0x1a3   : > { %v1674_v58 = vpop.f32.mrf.mxu0  ;;  %3515 = vmatmul.msk.bf16.gmra.mxu1 %vm462_vm3, %v1756_v32  ;;  %3601 = vmatmul.msk.bf16.gmra.mxu2 %vm462_vm3, %v2129_v57  ;;  %v4526_v40 = vadd.f32 %v1671_v11, %v1358_v19  ;;  %v2412_v11 = vshll.u32 %v4532_v37, 16  ;;  %v2131_v43 = vsel %vm1751_vm7, %v2128_v10, %v2130_v0 }
 0x1a4   : > { %v2749_v19 = vsel %vm2742_vm8, %v2746_v53, %v2748_v9 }
 0x1a5   : > { %v2414_v32 = vrot.slane %v2412_v11, 3 }
 0x1a6   : > { %3637 = vmatmul.msk.bf16.gmra.mxu0 %vm462_vm3, %v2747_v33  ;;  %v932_v48 = vpop.f32.mrf.mxu2  ;;  %3621 = vmatmul.msk.bf16.gmra.mxu3 %vm462_vm3, %v2407_v16 }
 0x1a7   : > { %v989_v1 = vadd.f32 %v932_v48, %v727_v23  ;;  %v4554_v48 = vld [vmem:[%s3950_s11 + $0x40] sm:$0xff] }
 0x1a8   : > { %v728_v54 = vpop.f32.mrf.mxu1 }
 0x1a9   : > { %v1359_v14 = vadd.f32 %v1302_v26, %v989_v1  ;;  %v729_v17 = vadd.f32 %v728_v54, %v4211_v6  ;;  %v1312_v27 = vpop.f32.mrf.mxu3  ;;  %v2415_v6 = vor.u32 %v2414_v32, %v2411_v24  ;;  %v3780_v54 = vld [vmem:[%s3950_s11 + $0x28] sm:$0xff] }
 0x1aa   : > { %v1759_v16 = vrot.slane %v3780_v54, 2 }
 0x1ab   : > { %v1676_v2 = vpop.f32.mrf.mxu0  ;;  %v4538_v8 = vadd.f32 %v1674_v58, %v1359_v14  ;;  %v2418_v14 = vshrl.u32 %v4554_v48, 16 }
 0x1ae   : > { %v934_v38 = vpop.f32.mrf.mxu2 }
 0x1af   : > { %v990_v26 = vadd.f32 %v934_v38, %v729_v17 }
 0x1b0   : > { %v731_v34 = vpop.f32.mrf.mxu1 }
 0x1b1   : > { %v1360_v61 = vadd.f32 %v1304_v28, %v990_v26  ;;  %v732_v29 = vadd.f32 %v731_v34, %v4226_v25  ;;  %v1314_v58 = vpop.f32.mrf.mxu3  ;;  %v2416_v28 = vsel %vm2363_vm6, %v2406_v50, %v2415_v6  ;;  %v2132_v25 = vrot.slane %v4508_v31, 2 }
 0x1b2   : > { %v2750_v50 = vrot.slane %v4508_v31, 3  ;;  %v1760_v26 = vsel %vm1751_vm7, %v1757_v7, %v1759_v16  ;;  %v2420_v34 = vrot.slane %v2418_v14, 2 }
 0x1b3   : > { %v1679_v57 = vpop.f32.mrf.mxu0  ;;  %3516 = vmatmul.msk.bf16.gmra.mxu1 %vm462_vm3, %v1758_v59  ;;  %3602 = vmatmul.msk.bf16.gmra.mxu2 %vm462_vm3, %v2131_v43  ;;  %v4548_v42 = vadd.f32 %v1676_v2, %v1360_v61  ;;  %v2421_v2 = vshll.u32 %v4554_v48, 16  ;;  %v2133_v24 = vsel %vm1751_vm7, %v2130_v0, %v2132_v25 }
 0x1b4   : > { %v2751_v61 = vsel %vm2742_vm8, %v2748_v9, %v2750_v50 }
 0x1b5   : > { %v2423_v59 = vrot.slane %v2421_v2, 3 }
 0x1b6   : > { %3638 = vmatmul.msk.bf16.gmra.mxu0 %vm462_vm3, %v2749_v19  ;;  %v937_v33 = vpop.f32.mrf.mxu2  ;;  %3622 = vmatmul.msk.bf16.gmra.mxu3 %vm462_vm3, %v2416_v28 }
 0x1b7   : > { %v991_v23 = vadd.f32 %v937_v33, %v732_v29  ;;  %v4576_v33 = vld [vmem:[%s3950_s11 + $0x48] sm:$0xff] }
 0x1b8   : > { %v733_v10 = vpop.f32.mrf.mxu1 }
 0x1b9   : > { %v1361_v53 = vadd.f32 %v1307_v52, %v991_v23  ;;  %v734_v51 = vadd.f32 %v733_v10, %v4237_v35  ;;  %v1317_v11 = vpop.f32.mrf.mxu3  ;;  %v2424_v35 = vor.u32 %v2423_v59, %v2420_v34  ;;  %v3781_v10 = vld [vmem:[%s3950_s11 + $0x30] sm:$0xff] }
 0x1ba   : > { %v1761_v28 = vrot.slane %v3781_v10, 2 }
 0x1bb   : > { %v1681_v1 = vpop.f32.mrf.mxu0  ;;  %v4560_v30 = vadd.f32 %v1679_v57, %v1361_v53  ;;  %v2427_v53 = vshrl.u32 %v4576_v33, 16 }
 0x1be   : > { %v939_v17 = vpop.f32.mrf.mxu2 }
 0x1bf   : > { %v992_v52 = vadd.f32 %v939_v17, %v734_v51 }
 0x1c0   : > { %v736_v38 = vpop.f32.mrf.mxu1 }
 0x1c1   : > { %v1362_v32 = vadd.f32 %v1309_v3, %v992_v52  ;;  %v737_v7 = vadd.f32 %v736_v38, %v4252_v56  ;;  %v1319_v57 = vpop.f32.mrf.mxu3  ;;  %v2425_v3 = vsel %vm2363_vm6, %v2415_v6, %v2424_v35  ;;  %v2134_v56 = vrot.slane %v4532_v37, 2 }
 0x1c2   : > { %v2752_v6 = vrot.slane %v4532_v37, 3  ;;  %v1762_v52 = vsel %vm1751_vm7, %v1759_v16, %v1761_v28  ;;  %v2429_v38 = vrot.slane %v2427_v53, 2  ;;  %v5085_v53 = vld [vmem:[#allocation12_spill] sm:$0xff] }
 0x1c3   : > { %v1684_v43 = vpop.f32.mrf.mxu0  ;;  %3517 = vmatmul.msk.bf16.gmra.mxu1 %vm462_vm3, %v1760_v26  ;;  %3603 = vmatmul.msk.bf16.gmra.mxu2 %vm462_vm3, %v2133_v24  ;;  %v4570_v31 = vadd.f32 %v1681_v1, %v1362_v32  ;;  %v2430_v1 = vshll.u32 %v4576_v33, 16  ;;  %v2135_v34 = vsel %vm1751_vm7, %v2132_v25, %v2134_v56 }
 0x1c4   : > { %v2753_v32 = vsel %vm2742_vm8, %v2750_v50, %v2752_v6 }
 0x1c5   : > { %v2432_v26 = vrot.slane %v2430_v1, 3 }
 0x1c6   : > { %3639 = vmatmul.msk.bf16.gmra.mxu0 %vm462_vm3, %v2751_v61  ;;  %v942_v19 = vpop.f32.mrf.mxu2  ;;  %3623 = vmatmul.msk.bf16.gmra.mxu3 %vm462_vm3, %v2425_v3 }
 0x1c7   : > { %v993_v29 = vadd.f32 %v942_v19, %v737_v7  ;;  %v4598_v19 = vld [vmem:[%s3950_s11 + $0x50] sm:$0xff] }
 0x1c8   : > { %v738_v0 = vpop.f32.mrf.mxu1 }
 0x1c9   : > { %v1363_v9 = vadd.f32 %v1312_v27, %v993_v29  ;;  %v739_v14 = vadd.f32 %v738_v0, %v4261_v4  ;;  %v1322_v2 = vpop.f32.mrf.mxu3  ;;  %v2433_v4 = vor.u32 %v2432_v26, %v2429_v38  ;;  %v3782_v0 = vld [vmem:[%s3950_s11 + $0x38] sm:$0xff] }
 0x1ca   : > { %v1763_v3 = vrot.slane %v3782_v0, 2  ;;  %v3783_v0 = vld [vmem:[%s3950_s11 + $0x40] sm:$0xff] }
 0x1cb   : > { %v1686_v23 = vpop.f32.mrf.mxu0  ;;  %v4582_v54 = vadd.f32 %v1684_v43, %v1363_v9  ;;  %v2436_v9 = vshrl.u32 %v4598_v19, 16 }
 0x1ce   : > { %v944_v51 = vpop.f32.mrf.mxu2 }
 0x1cf   : > { %v994_v27 = vadd.f32 %v944_v51, %v739_v14 }
 0x1d0   : > { %v741_v17 = vpop.f32.mrf.mxu1 }
 0x1d1   : > { %v1364_v59 = vadd.f32 %v1314_v58, %v994_v27  ;;  %v742_v16 = vadd.f32 %v741_v17, %v4274_v47  ;;  %v1324_v43 = vpop.f32.mrf.mxu3  ;;  %v2434_v58 = vsel %vm2363_vm6, %v2424_v35, %v2433_v4  ;;  %v2136_v47 = vrot.slane %v4554_v48, 2 }
 0x1d2   : > { %v2754_v35 = vrot.slane %v4554_v48, 3  ;;  %v1764_v17 = vsel %vm1751_vm7, %v1761_v28, %v1763_v3  ;;  %v5086_v28 = vld [vmem:[#allocation6_spill] sm:$0xff] }
 0x1d3   : > { %v1689_v24 = vpop.f32.mrf.mxu0  ;;  %3518 = vmatmul.msk.bf16.gmra.mxu1 %vm462_vm3, %v1762_v52  ;;  %3604 = vmatmul.msk.bf16.gmra.mxu2 %vm462_vm3, %v2135_v34  ;;  %v4592_v37 = vadd.f32 %v1686_v23, %v1364_v59  ;;  %v2439_v23 = vshll.u32 %v4598_v19, 16  ;;  %v2438_v52 = vrot.slane %v2436_v9, 2  ;;  %v2137_v26 = vsel %vm1751_vm7, %v2134_v56, %v2136_v47 }
 0x1d4   : > { %v1765_v9 = vrot.slane %v3783_v0, 2  ;;  %v4642_v0 = vld [vmem:[%s3950_s11 + $0x60] sm:$0xff] }
 0x1d5   : > { %v2441_v38 = vrot.slane %v2439_v23, 3 }
 0x1d6   : > { %3640 = vmatmul.msk.bf16.gmra.mxu0 %vm462_vm3, %v2753_v32  ;;  %v947_v61 = vpop.f32.mrf.mxu2  ;;  %3624 = vmatmul.msk.bf16.gmra.mxu3 %vm462_vm3, %v2434_v58  ;;  %v4620_v58 = vld [vmem:[%s3950_s11 + $0x58] sm:$0xff] }
 0x1d7   : > { %v995_v7 = vadd.f32 %v947_v61, %v742_v16  ;;  %v2442_v48 = vor.u32 %v2441_v38, %v2438_v52  ;;  %v2448_v23 = vshll.u32 %v4620_v58, 16  ;;  %v1766_v38 = vsel %vm1751_vm7, %v1763_v3, %v1765_v9  ;;  %v5088_v3 = vld [vmem:[#allocation8_spill] sm:$0xff] }
 0x1d8   : > { %v743_v25 = vpop.f32.mrf.mxu1 }
 0x1d9   : > { %v1365_v50 = vadd.f32 %v1317_v11, %v995_v7  ;;  %v744_v1 = vadd.f32 %v743_v25, %v5085_v53  ;;  %v1327_v14 = vpop.f32.mrf.mxu3 }
 0x1db   : > { %v1691_v29 = vpop.f32.mrf.mxu0  ;;  %v4604_v10 = vadd.f32 %v1689_v24, %v1365_v50  ;;  %v2755_v24 = vsel %vm2742_vm8, %v2752_v6, %v2754_v35 }
 0x1de   : > { %v949_v51 = vpop.f32.mrf.mxu2 }
 0x1df   : > { %v996_v11 = vadd.f32 %v949_v51, %v744_v1  ;;  %v2138_v1 = vrot.slane %v4576_v33, 2  ;;  %v5087_v51 = vld [vmem:[#allocation7_spill] sm:$0xff] }
 0x1e0   : > { %v746_v27 = vpop.f32.mrf.mxu1 }
 0x1e1   : > { %v1366_v34 = vadd.f32 %v1319_v57, %v996_v11  ;;  %v747_v16 = vadd.f32 %v746_v27, %v5086_v28  ;;  %v1329_v61 = vpop.f32.mrf.mxu3  ;;  %v2443_v57 = vsel %vm2363_vm6, %v2433_v4, %v2442_v48  ;;  %v2756_v4 = vrot.slane %v4576_v33, 3 }
 0x1e3   : > { %v1694_v59 = vpop.f32.mrf.mxu0  ;;  %3519 = vmatmul.msk.bf16.gmra.mxu1 %vm462_vm3, %v1764_v17  ;;  %3605 = vmatmul.msk.bf16.gmra.mxu2 %vm462_vm3, %v2137_v26  ;;  %v4614_v32 = vadd.f32 %v1691_v29, %v1366_v34  ;;  %v2445_v29 = vshrl.u32 %v4620_v58, 16  ;;  %v2450_v34 = vrot.slane %v2448_v23, 3  ;;  %v3784_v23 = vld [vmem:[%s3950_s11 + $0x48] sm:$0xff] }
 0x1e5   : > { %v2447_v26 = vrot.slane %v2445_v29, 2 }
 0x1e6   : > { %3641 = vmatmul.msk.bf16.gmra.mxu0 %vm462_vm3, %v2755_v24  ;;  %v952_v7 = vpop.f32.mrf.mxu2  ;;  %3625 = vmatmul.msk.bf16.gmra.mxu3 %vm462_vm3, %v2443_v57  ;;  %v2139_v24 = vsel %vm1751_vm7, %v2136_v47, %v2138_v1 }
 0x1e7   : > { %v997_v25 = vadd.f32 %v952_v7, %v747_v16  ;;  %v2757_v16 = vsel %vm2742_vm8, %v2754_v35, %v2756_v4  ;;  %v2451_v33 = vor.u32 %v2450_v34, %v2447_v26 }
 0x1e8   : > { %v748_v56 = vpop.f32.mrf.mxu1 }
 0x1e9   : > { %v1367_v6 = vadd.f32 %v1322_v2, %v997_v25  ;;  %v749_v11 = vadd.f32 %v748_v56, %v5087_v51  ;;  %v1332_v27 = vpop.f32.mrf.mxu3  ;;  %v1767_v51 = vrot.slane %v3784_v23, 2 }
 0x1eb   : > { %v1696_v50 = vpop.f32.mrf.mxu0  ;;  %v4626_v53 = vadd.f32 %v1694_v59, %v1367_v6 }
 0x1ee   : > { %v954_v17 = vpop.f32.mrf.mxu2 }
 0x1ef   : > { %v998_v2 = vadd.f32 %v954_v17, %v749_v11  ;;  %v2457_v11 = vshll.u32 %v4642_v0, 16 }
 0x1f0   : > { %v751_v52 = vpop.f32.mrf.mxu1 }
 0x1f1   : > { %v1368_v28 = vadd.f32 %v1324_v43, %v998_v2  ;;  %v752_v25 = vadd.f32 %v751_v52, %v5088_v3  ;;  %v1334_v56 = vpop.f32.mrf.mxu3  ;;  %v2452_v43 = vsel %vm2363_vm6, %v2442_v48, %v2451_v33  ;;  %v2140_v2 = vrot.slane %v4598_v19, 2  ;;  %v5089_v52 = vld [vmem:[#allocation9_spill] sm:$0xff] }
 0x1f2   : > { %v2758_v48 = vrot.slane %v4598_v19, 3  ;;  %v2459_v3 = vrot.slane %v2457_v11, 3 }
 0x1f3   : > { %v1699_v59 = vpop.f32.mrf.mxu0  ;;  %3520 = vmatmul.msk.bf16.gmra.mxu1 %vm462_vm3, %v1766_v38  ;;  %3606 = vmatmul.msk.bf16.gmra.mxu2 %vm462_vm3, %v2139_v24  ;;  %v4636_v7 = vadd.f32 %v1696_v50, %v1368_v28  ;;  %v2454_v50 = vshrl.u32 %v4642_v0, 16  ;;  %v1768_v28 = vsel %vm1751_vm7, %v1765_v9, %v1767_v51  ;;  %v5090_v9 = vld [vmem:[#allocation10_spill] sm:$0xff] }
 0x1f6   : > { %3642 = vmatmul.msk.bf16.gmra.mxu0 %vm462_vm3, %v2757_v16  ;;  %v957_v57 = vpop.f32.mrf.mxu2  ;;  %3626 = vmatmul.msk.bf16.gmra.mxu3 %vm462_vm3, %v2452_v43  ;;  %v2456_v16 = vrot.slane %v2454_v50, 2 }
 0x1f7   : > { %v999_v6 = vadd.f32 %v957_v57, %v752_v25  ;;  %v2141_v25 = vsel %vm1751_vm7, %v2138_v1, %v2140_v2 }
 0x1f8   : > { %v753_v47 = vpop.f32.mrf.mxu1  ;;  %v2460_v19 = vor.u32 %v2459_v3, %v2456_v16  ;;  %v5091_v16 = vld [vmem:[#allocation11_spill] sm:$0xff] }
 0x1f9   : > { %v1369_v35 = vadd.f32 %v1327_v14, %v999_v6  ;;  %v754_v38 = vadd.f32 %v753_v47, %v5089_v52  ;;  %v2611_v26 = vpop.f32.mrf.mxu3  ;;  %v2759_v6 = vsel %vm2742_vm8, %v2756_v4, %v2758_v48  ;;  %v4666_v4 = vld [vmem:[%s3950_s11 + $0x68] sm:$0xff] }
 0x1fa   : > { %v2461_v50 = vsel %vm2363_vm6, %v2451_v33, %v2460_v19  ;;  %v2760_v33 = vrot.slane %v4620_v58, 3 }
 0x1fb   : > { %v1701_v29 = vpop.f32.mrf.mxu0  ;;  %v4648_v17 = vadd.f32 %v1699_v59, %v1369_v35 }
 0x1fe   : > { %v959_v34 = vpop.f32.mrf.mxu2 }
 0x1ff   : > { %v1000_v14 = vadd.f32 %v959_v34, %v754_v38  ;;  %v3785_v38 = vld [vmem:[%s3950_s11 + $0x50] sm:$0xff]  ;;  %v2463_v34 = vshrl.u32 %v4666_v4, 16 }
 0x200   : > { %v756_v24 = vpop.f32.mrf.mxu1 }
 0x201   : > { %v1370_v57 = vadd.f32 %v1329_v61, %v1000_v14  ;;  %v757_v43 = vadd.f32 %v756_v24, %v5090_v9  ;;  %v4662_v35 = vpop.f32.mrf.mxu3  ;;  %v2466_v14 = vshll.u32 %v4666_v4, 16 }
 0x203   : > { %v1704_v59 = vpop.f32.mrf.mxu0  ;;  %3521 = vmatmul.msk.bf16.gmra.mxu1 %vm462_vm3, %v1768_v28  ;;  %3607 = vmatmul.msk.bf16.gmra.mxu2 %vm462_vm3, %v2141_v25  ;;  %v4658_v47 = vadd.f32 %v1701_v29, %v1370_v57  ;;  %v1769_v29 = vrot.slane %v3785_v38, 2  ;;  %v2142_v28 = vrot.slane %v4620_v58, 2 }
 0x205   : > { %v1770_v9 = vsel %vm1751_vm7, %v1767_v51, %v1769_v29 }
 0x206   : > { %3643 = vmatmul.msk.bf16.gmra.mxu0 %vm462_vm3, %v2759_v6  ;;  %v962_v23 = vpop.f32.mrf.mxu2  ;;  %3627 = vmatmul.msk.bf16.gmra.mxu3 %vm462_vm3, %v2461_v50 }
 0x207   : > { %v1001_v1 = vadd.f32 %v962_v23, %v757_v43  ;;  %v2465_v43 = vrot.slane %v2463_v34, 2  ;;  %v2468_v23 = vrot.slane %v2466_v14, 3 }
 0x208   : > { %v758_v61 = vpop.f32.mrf.mxu1 }
 0x209   : > { %v1371_v11 = vadd.f32 %v1332_v27, %v1001_v1  ;;  %v759_v3 = vadd.f32 %v758_v61, %v5091_v16  ;;  %v4677_v25 = vpop.f32.mrf.mxu3  ;;  %v2143_v1 = vsel %vm1751_vm7, %v2140_v2, %v2142_v28  ;;  %v2469_v58 = vor.u32 %v2468_v23, %v2465_v43 }
 0x20a   : > { %v2762_v23 = vrot.slane %v4642_v0, 3 }
 0x20b   : > { %v1706_v52 = vpop.f32.mrf.mxu0  ;;  %v4672_v24 = vadd.f32 %v1704_v59, %v1371_v11  ;;  %v2761_v11 = vsel %vm2742_vm8, %v2758_v48, %v2760_v33  ;;  %v2470_v14 = vsel %vm2363_vm6, %v2460_v19, %v2469_v58  ;;  %v4692_v48 = vld [vmem:[%s3950_s11 + $0x70] sm:$0xff]  ;;  %v2144_v19 = vrot.slane %v4642_v0, 2 }
 0x20c   : > { %v2763_v0 = vsel %vm2742_vm8, %v2760_v33, %v2762_v23 }
 0x20e   : > { %v964_v27 = vpop.f32.mrf.mxu2 }
 0x20f   : > { %v1002_v57 = vadd.f32 %v964_v27, %v759_v3  ;;  %v4697_v3 = vld [vmem:[%s5067_s2] ss:$0 sm:$0xff]  ;;  %v3786_v27 = vld [vmem:[%s3950_s11 + $0x58] sm:$0xff] }
 0x210   : > { %v1868_v6 = vpop.f32.mrf.mxu1 }
 0x211   : > { %v1372_v59 = vadd.f32 %v1334_v56, %v1002_v57  ;;  %v1958_v51 = vadd.f32 %v1868_v6, %v4295_v12  ;;  %v4688_v38 = vpop.f32.mrf.mxu3  ;;  %v1771_v57 = vrot.slane %v3786_v27, 2  ;;  %v2472_v6 = vshrl.u32 %v4692_v48, 16 }
 0x213   : > { %v2846_v50 = vpop.f32.mrf.mxu0  ;;  %3522 = vmatmul.msk.bf16.gmra.mxu1 %vm462_vm3, %v1770_v9  ;;  %3608 = vmatmul.msk.bf16.gmra.mxu2 %vm462_vm3, %v2143_v1  ;;  %v4684_v61 = vadd.f32 %v1706_v52, %v1372_v59  ;;  %v2475_v9 = vshll.u32 %v4692_v48, 16 }
 0x216   : > { %3644 = vmatmul.msk.bf16.gmra.mxu0 %vm462_vm3, %v2761_v11  ;;  %v2232_v34 = vpop.f32.mrf.mxu2  ;;  %3628 = vmatmul.msk.bf16.gmra.mxu3 %vm462_vm3, %v2470_v14  ;;  %v1772_v11 = vsel %vm1751_vm7, %v1769_v29, %v1771_v57  ;;  %v2477_v14 = vrot.slane %v2475_v9, 3 }
 0x217   : > { %v2322_v2 = vadd.f32 %v2232_v34, %v1958_v51 }
 0x218   : > { %v1870_v56 = vpop.f32.mrf.mxu1 }
 0x219   : > { %v2701_v16 = vadd.f32 %v2611_v26, %v2322_v2  ;;  %v1959_v26 = vadd.f32 %v1870_v56, %v4305_v22  ;;  %v4707_v1 = vpop.f32.mrf.mxu3  ;;  %v2474_v2 = vrot.slane %v2472_v6, 2 }
 0x21b   : > { %v2848_v52 = vpop.f32.mrf.mxu0  ;;  %v2936_v12 = vadd.f32 %v2846_v50, %v2701_v16  ;;  %v2145_v16 = vsel %vm1751_vm7, %v2142_v28, %v2144_v19  ;;  %v2478_v29 = vor.u32 %v2477_v14, %v2474_v2  ;;  %v2146_v14 = vrot.slane %v4666_v4, 2 }
 0x21d   : > { %v2976_v43 = vadd.f32 %v4697_v3, %v2936_v12  ;;  %v2479_v33 = vsel %vm2363_vm6, %v2469_v58, %v2478_v29 }
 0x21e   : > { %v2234_v59 = vpop.f32.mrf.mxu2 }
 0x21f   : > { %v3012_v51 = vmax.f32 %v2976_v43, 0.0  ;;  %v2323_v50 = vadd.f32 %v2234_v59, %v1959_v26  ;;  %v4723_v59 = vld [vmem:[%s3950_s11 + $0x78] sm:$0xff] }
 0x220   : > { %v1873_v34 = vpop.f32.mrf.mxu1  ;;  %v2484_v2 = vshll.u32 %v4723_v59, 16 }
 0x221   : > { %3049 = vst.msk [vmem:[#allocation2] sm:$0xff] %vm3048_vm9, %v3012_v51  ;;  %v2702_v27 = vadd.f32 %v4662_v35, %v2323_v50  ;;  %v1960_v28 = vadd.f32 %v1873_v34, %v4311_v5  ;;  %v4719_v6 = vpop.f32.mrf.mxu3  ;;  %v3787_v51 = vld [vmem:[%s3950_s11 + $0x60] sm:$0xff]  ;;  %v2481_v34 = vshrl.u32 %v4723_v59, 16 }
 0x222   : > { %v1773_v50 = vrot.slane %v3787_v51, 2 }
 0x223   : > { %v2851_v22 = vpop.f32.mrf.mxu0  ;;  %3523 = vmatmul.msk.bf16.gmra.mxu1 %vm462_vm3, %v1772_v11  ;;  %v2937_v56 = vadd.f32 %v2848_v52, %v2702_v27  ;;  %3609 = vmatmul.msk.bf16.gmra.mxu2 %vm462_vm3, %v2145_v16  ;;  %v2764_v27 = vrot.slane %v4666_v4, 3 }
 0x225   : > { %v2977_v12 = vadd.f32 %v4697_v3, %v2937_v56  ;;  %v1774_v56 = vsel %vm1751_vm7, %v1771_v57, %v1773_v50  ;;  %v2765_v4 = vsel %vm2742_vm8, %v2762_v23, %v2764_v27 }
 0x226   : > { %3645 = vmatmul.msk.bf16.gmra.mxu0 %vm462_vm3, %v2763_v0  ;;  %v2237_v35 = vpop.f32.mrf.mxu2  ;;  %3629 = vmatmul.msk.bf16.gmra.mxu3 %vm462_vm3, %v2479_v33 }
 0x227   : > { %v3013_v9 = vmax.f32 %v2977_v12, 0.0  ;;  %v2324_v43 = vadd.f32 %v2237_v35, %v1960_v28  ;;  %v2483_v35 = vrot.slane %v2481_v34, 2 }
 0x228   : > { %v1875_v26 = vpop.f32.mrf.mxu1 }
 0x229   : > { %3050 = vst.msk [vmem:[#allocation2 + $0x8] sm:$0xff] %vm3048_vm9, %v3013_v9  ;;  %v2703_v52 = vadd.f32 %v4677_v25, %v2324_v43  ;;  %v1961_v16 = vadd.f32 %v1875_v26, %v4321_v63  ;;  %v4735_v0 = vpop.f32.mrf.mxu3  ;;  %v2486_v9 = vrot.slane %v2484_v2, 3  ;;  %v2147_v43 = vsel %vm1751_vm7, %v2144_v19, %v2146_v14 }
 0x22b   : > { %v2853_v11 = vpop.f32.mrf.mxu0  ;;  %v2938_v5 = vadd.f32 %v2851_v22, %v2703_v52  ;;  %v2487_v57 = vor.u32 %v2486_v9, %v2483_v35 }
 0x22d   : > { %v2978_v58 = vadd.f32 %v4697_v3, %v2938_v5  ;;  %v2488_v23 = vsel %vm2363_vm6, %v2478_v29, %v2487_v57  ;;  %v2148_v29 = vrot.slane %v4692_v48, 2 }
 0x22e   : > { %v2239_v25 = vpop.f32.mrf.mxu2 }
 0x22f   : > { %v3014_v12 = vmax.f32 %v2978_v58, 0.0  ;;  %v2325_v28 = vadd.f32 %v2239_v25, %v1961_v16  ;;  %v4751_v58 = vld [vmem:[%s3950_s11 + $0x80] sm:$0xff]  ;;  %v4756_v25 = vld [vmem:[%s3950_s11 + $0x68] sm:$0xff] }
 0x230   : > { %v1878_v22 = vpop.f32.mrf.mxu1 }
 0x231   : > { %3051 = vst.msk [vmem:[#allocation2 + $0x10] sm:$0xff] %vm3048_vm9, %v3014_v12  ;;  %v2704_v33 = vadd.f32 %v4688_v38, %v2325_v28  ;;  %v1962_v19 = vadd.f32 %v1878_v22, %v4327_v13  ;;  %v4747_v51 = vpop.f32.mrf.mxu3  ;;  %v2490_v12 = vshrl.u32 %v4751_v58, 16  ;;  %v2493_v28 = vshll.u32 %v4751_v58, 16 }
 0x233   : > { %v2856_v63 = vpop.f32.mrf.mxu0  ;;  %3524 = vmatmul.msk.bf16.gmra.mxu1 %vm462_vm3, %v1774_v56  ;;  %v2939_v26 = vadd.f32 %v2853_v11, %v2704_v33  ;;  %3610 = vmatmul.msk.bf16.gmra.mxu2 %vm462_vm3, %v2147_v43  ;;  %v1775_v56 = vrot.slane %v4756_v25, 2 }
 0x235   : > { %v2979_v52 = vadd.f32 %v4697_v3, %v2939_v26  ;;  %v1776_v33 = vsel %vm1751_vm7, %v1773_v50, %v1775_v56 }
 0x236   : > { %3646 = vmatmul.msk.bf16.gmra.mxu0 %vm462_vm3, %v2765_v4  ;;  %v2242_v38 = vpop.f32.mrf.mxu2  ;;  %3630 = vmatmul.msk.bf16.gmra.mxu3 %vm462_vm3, %v2488_v23 }
 0x237   : > { %v3015_v5 = vmax.f32 %v2979_v52, 0.0  ;;  %v2326_v34 = vadd.f32 %v2242_v38, %v1962_v19  ;;  %v2492_v52 = vrot.slane %v2490_v12, 2  ;;  %v2495_v19 = vrot.slane %v2493_v28, 3 }
 0x238   : > { %v1880_v2 = vpop.f32.mrf.mxu1  ;;  %v2149_v38 = vsel %vm1751_vm7, %v2146_v14, %v2148_v29 }
 0x239   : > { %3052 = vst.msk [vmem:[#allocation2 + $0x18] sm:$0xff] %vm3048_vm9, %v3015_v5  ;;  %v2705_v11 = vadd.f32 %v4707_v1, %v2326_v34  ;;  %v1963_v35 = vadd.f32 %v1880_v2, %v4337_v39  ;;  %v2766_v1 = vrot.slane %v4692_v48, 3  ;;  %v4766_v9 = vpop.f32.mrf.mxu3  ;;  %v4781_v2 = vor.u32 %v2495_v19, %v2492_v52  ;;  %v3789_v52 = vld [vmem:[%s3950_s11 + $0x70] sm:$0xff] }
 0x23a   : > { %v1777_v19 = vrot.slane %v3789_v52, 2 }
 0x23b   : > { %v2858_v16 = vpop.f32.mrf.mxu0  ;;  %v2940_v13 = vadd.f32 %v2856_v63, %v2705_v11  ;;  %v2767_v34 = vsel %vm2742_vm8, %v2764_v27, %v2766_v1  ;;  %v3085_v11 = vld [vmem:[#allocation2] ss:$2 sm:$0xff] }
 0x23d   : > { %v2980_v22 = vadd.f32 %v4697_v3, %v2940_v13  ;;  %v3087_v13 = vld [vmem:[#allocation2 + $0x1] ss:$2 sm:$0xff] }
 0x23e   : > { %v2244_v43 = vpop.f32.mrf.mxu2 }
 0x23f   : > { %v3016_v63 = vmax.f32 %v2980_v22, 0.0  ;;  %v2327_v4 = vadd.f32 %v2244_v43, %v1963_v35  ;;  %v2497_v22 = vsel %vm2363_vm6, %v2487_v57, %v4781_v2  ;;  %v4792_v35 = vld [vmem:[%s3950_s11 + $0x88] sm:$0xff] }
 0x240   : > { %v1883_v26 = vpop.f32.mrf.mxu1  ;;  %v2499_v57 = vshrl.u32 %v4792_v35, 16 }
 0x241   : > { %3053 = vst.msk [vmem:[#allocation2 + $0x20] sm:$0xff] %vm3048_vm9, %v3016_v63  ;;  %v2706_v39 = vadd.f32 %v4719_v6, %v2327_v4  ;;  %v1964_v23 = vadd.f32 %v1883_v26, %v4343_v20  ;;  %v4786_v6 = vpop.f32.mrf.mxu3  ;;  %v3092_v63 = vmax.f32 %v3085_v11, %v3087_v13  ;;  %v2768_v11 = vrot.slane %v4723_v59, 3 }
 0x243   : > { %v2861_v5 = vpop.f32.mrf.mxu0  ;;  %3525 = vmatmul.msk.bf16.gmra.mxu1 %vm462_vm3, %v1776_v33  ;;  %v2941_v50 = vadd.f32 %v2858_v16, %v2706_v39  ;;  %3611 = vmatmul.msk.bf16.gmra.mxu2 %vm462_vm3, %v2149_v38 }
 0x245   : > { %v2981_v14 = vadd.f32 %v4697_v3, %v2941_v50  ;;  %v2150_v50 = vrot.slane %v4723_v59, 2 }
 0x246   : > { %3647 = vmatmul.msk.bf16.gmra.mxu0 %vm462_vm3, %v2767_v34  ;;  %v2247_v27 = vpop.f32.mrf.mxu2  ;;  %3631 = vmatmul.msk.bf16.gmra.mxu3 %vm462_vm3, %v2497_v22  ;;  %v2502_v34 = vshll.u32 %v4792_v35, 16 }
 0x247   : > { %v3017_v12 = vmax.f32 %v2981_v14, 0.0  ;;  %v2328_v16 = vadd.f32 %v2247_v27, %v1964_v23 }
 0x248   : > { %v1885_v28 = vpop.f32.mrf.mxu1  ;;  %v3089_v43 = vld [vmem:[#allocation2 + $0x12] ss:$2 sm:$0xff]  ;;  %v3091_v33 = vld [vmem:[#allocation2 + $0x13] ss:$2 sm:$0xff] }
 0x249   : > { %v3093_v20 = vmax.f32 %v3089_v43, %v3091_v33  ;;  %3054 = vst.msk [vmem:[#allocation2 + $0x28] sm:$0xff] %vm3048_vm9, %v3017_v12  ;;  %v2707_v4 = vadd.f32 %v4735_v0, %v2328_v16  ;;  %v1965_v0 = vadd.f32 %v1885_v28, %v4353_v46  ;;  %v4806_v13 = vpop.f32.mrf.mxu3  ;;  %v2501_v43 = vrot.slane %v2499_v57, 2 }
 0x24a   : > { %v2504_v33 = vrot.slane %v2502_v34, 3  ;;  %v2151_v46 = vsel %vm1751_vm7, %v2148_v29, %v2150_v50  ;;  %v3790_v34 = vld [vmem:[%s3950_s11 + $0x78] sm:$0xff] }
 0x24b   : > { %v2863_v26 = vpop.f32.mrf.mxu0  ;;  %v3094_v38 = vmax.f32 %v3092_v63, %v3093_v20  ;;  %v2942_v39 = vadd.f32 %v2861_v5, %v2707_v4  ;;  %v1778_v5 = vsel %vm1751_vm7, %v1775_v56, %v1777_v19  ;;  %v2769_v56 = vsel %vm2742_vm8, %v2766_v1, %v2768_v11 }
 0x24c   : > { %v2505_v63 = vor.u32 %v2504_v33, %v2501_v43 }
 0x24d   : > { %v3095_v14 = vpack.c.bf16 %v3094_v38, %v3094_v38  ;;  %v2982_v23 = vadd.f32 %v4697_v3, %v2942_v39 }
 0x24e   : > { %v2249_v27 = vpop.f32.mrf.mxu2  ;;  %v2506_v1 = vsel %vm2363_vm6, %v4781_v2, %v2505_v63 }
 0x24f   : > { %v3018_v12 = vmax.f32 %v2982_v23, 0.0  ;;  %v2329_v16 = vadd.f32 %v2249_v27, %v1965_v0  ;;  %3097 = vst.msk [vmem:[%s4811_s10] sm:$0xf] %vm3096_vm10, %v3095_v14  ;;  %v1779_v14 = vrot.slane %v3790_v34, 2  ;;  %v2152_v27 = vrot.slane %v4751_v58, 2  ;;  %v4863_v34 = vld [vmem:[%s3950_s11 + $0x98] sm:$0xff] }
 0x250   : > { %v1888_v22 = vpop.f32.mrf.mxu1 }
 0x251   : > { %3055 = vst.msk [vmem:[#allocation2 + $0x30] sm:$0xff] %vm3048_vm9, %v3018_v12  ;;  %v2708_v59 = vadd.f32 %v4747_v51, %v2329_v16  ;;  %v1966_v20 = vadd.f32 %v1888_v22, %v4359_v21  ;;  %v4828_v51 = vpop.f32.mrf.mxu3  ;;  %v2770_v12 = vrot.slane %v4751_v58, 3  ;;  %v1780_v22 = vsel %vm1751_vm7, %v1777_v19, %v1779_v14 }
 0x253   : > { %v2866_v25 = vpop.f32.mrf.mxu0  ;;  %3526 = vmatmul.msk.bf16.gmra.mxu1 %vm462_vm3, %v1778_v5  ;;  %v2943_v28 = vadd.f32 %v2863_v26, %v2708_v59  ;;  %3612 = vmatmul.msk.bf16.gmra.mxu2 %vm462_vm3, %v2151_v46  ;;  %v4833_v26 = vld [vmem:[%s3950_s11 + $0x90] sm:$0xff] }
 0x254   : > { %v2508_v23 = vshrl.u32 %v4833_v26, 16  ;;  %v2511_v0 = vshll.u32 %v4833_v26, 16 }
 0x255   : > { %v2983_v29 = vadd.f32 %v4697_v3, %v2943_v28 }
 0x256   : > { %3648 = vmatmul.msk.bf16.gmra.mxu0 %vm462_vm3, %v2769_v56  ;;  %v2252_v4 = vpop.f32.mrf.mxu2  ;;  %3632 = vmatmul.msk.bf16.gmra.mxu3 %vm462_vm3, %v2506_v1  ;;  %v2510_v59 = vrot.slane %v2508_v23, 2  ;;  %v2153_v56 = vsel %vm1751_vm7, %v2150_v50, %v2152_v27 }
 0x257   : > { %v3019_v52 = vmax.f32 %v2983_v29, 0.0  ;;  %v2330_v48 = vadd.f32 %v2252_v4, %v1966_v20 }
 0x258   : > { %v1890_v38 = vpop.f32.mrf.mxu1 }
 0x259   : > { %3056 = vst.msk [vmem:[#allocation2 + $0x38] sm:$0xff] %vm3048_vm9, %v3019_v52  ;;  %v2709_v39 = vadd.f32 %v4766_v9, %v2330_v48  ;;  %v1967_v5 = vadd.f32 %v1890_v38, %v4369_v62  ;;  %v4845_v16 = vpop.f32.mrf.mxu3  ;;  %v2771_v62 = vsel %vm2742_vm8, %v2768_v11, %v2770_v12  ;;  %v3101_v48 = vld [vmem:[#allocation2 + $0x25] ss:$2 sm:$0xff] }
 0x25b   : > { %v2868_v57 = vpop.f32.mrf.mxu0  ;;  %v2944_v21 = vadd.f32 %v2866_v25, %v2709_v39  ;;  %v2513_v25 = vrot.slane %v2511_v0, 3 }
 0x25d   : > { %v2984_v2 = vadd.f32 %v4697_v3, %v2944_v21  ;;  %v2514_v20 = vor.u32 %v2513_v25, %v2510_v59  ;;  %v2154_v59 = vrot.slane %v4792_v35, 2 }
 0x25e   : > { %v2254_v9 = vpop.f32.mrf.mxu2 }
 0x25f   : > { %v3020_v43 = vmax.f32 %v2984_v2, 0.0  ;;  %v2331_v33 = vadd.f32 %v2254_v9, %v1967_v5  ;;  %v3791_v9 = vld [vmem:[%s3950_s11 + $0x80] sm:$0xff] }
 0x260   : > { %v1893_v46 = vpop.f32.mrf.mxu1 }
 0x261   : > { %3057 = vst.msk [vmem:[#allocation2 + $0x40] sm:$0xff] %vm3048_vm9, %v3020_v43  ;;  %v2710_v28 = vadd.f32 %v4786_v6, %v2331_v33  ;;  %v1968_v4 = vadd.f32 %v1893_v46, %v4375_v55  ;;  %v4859_v52 = vpop.f32.mrf.mxu3  ;;  %v3099_v6 = vld [vmem:[#allocation2 + $0x24] ss:$2 sm:$0xff]  ;;  %v2520_v46 = vshll.u32 %v4863_v34, 16 }
 0x262   : > { %v3106_v0 = vmax.f32 %v3099_v6, %v3101_v48 }
 0x263   : > { %v2871_v29 = vpop.f32.mrf.mxu0  ;;  %3527 = vmatmul.msk.bf16.gmra.mxu1 %vm462_vm3, %v1780_v22  ;;  %v2945_v19 = vadd.f32 %v2868_v57, %v2710_v28  ;;  %3613 = vmatmul.msk.bf16.gmra.mxu2 %vm462_vm3, %v2153_v56  ;;  %v2515_v57 = vsel %vm2363_vm6, %v2505_v63, %v2514_v20  ;;  %v1781_v22 = vrot.slane %v3791_v9, 2  ;;  %v2517_v63 = vshrl.u32 %v4863_v34, 16 }
 0x265   : > { %v2985_v50 = vadd.f32 %v4697_v3, %v2945_v19  ;;  %v2519_v48 = vrot.slane %v2517_v63, 2  ;;  %v3792_v63 = vld [vmem:[%s3950_s11 + $0x88] sm:$0xff] }
 0x266   : > { %3649 = vmatmul.msk.bf16.gmra.mxu0 %vm462_vm3, %v2771_v62  ;;  %v2257_v38 = vpop.f32.mrf.mxu2  ;;  %3633 = vmatmul.msk.bf16.gmra.mxu3 %vm462_vm3, %v2515_v57 }
 0x267   : > { %v3021_v11 = vmax.f32 %v2985_v50, 0.0  ;;  %v2332_v1 = vadd.f32 %v2257_v38, %v1968_v4  ;;  %v2522_v38 = vrot.slane %v2520_v46, 3  ;;  %v1783_v46 = vrot.slane %v3792_v63, 2  ;;  %v3793_v63 = vld [vmem:[%s3950_s11 + $0x90] sm:$0xff] }
 0x268   : > { %v1895_v39 = vpop.f32.mrf.mxu1  ;;  %v3103_v21 = vld [vmem:[#allocation2 + $0x36] ss:$2 sm:$0xff]  ;;  %v3105_v23 = vld [vmem:[#allocation2 + $0x37] ss:$2 sm:$0xff] }
 0x269   : > { %v3107_v2 = vmax.f32 %v3103_v21, %v3105_v23  ;;  %3058 = vst.msk [vmem:[#allocation2 + $0x48] sm:$0xff] %vm3048_vm9, %v3021_v11  ;;  %v2711_v55 = vadd.f32 %v4806_v13, %v2332_v1  ;;  %v1969_v28 = vadd.f32 %v1895_v39, %v4385_v45  ;;  %v2772_v13 = vrot.slane %v4792_v35, 3  ;;  %v4875_v62 = vpop.f32.mrf.mxu3  ;;  %v2358_v39 = vld [vmem:[%s3950_s11 + $0xa0] sm:$0x7]  ;;  %v5092_v23 = vld [vmem:[#allocation13_spill] sm:$0xff] }
 0x26a   : > { %v2155_v11 = vsel %vm1751_vm7, %v2152_v27, %v2154_v59  ;;  %v2523_v57 = vor.u32 %v2522_v38, %v2519_v48  ;;  %v2361_v21 = vunpack.c.l.b16 %v2358_v39  ;;  %v1784_v48 = vsel %vm1751_vm7, %v1781_v22, %v1783_v46 }
 0x26b   : > { %v2873_v5 = vpop.f32.mrf.mxu0  ;;  %v3108_v43 = vmax.f32 %v3106_v0, %v3107_v2  ;;  %v2946_v33 = vadd.f32 %v2871_v29, %v2711_v55  ;;  %v1782_v29 = vsel %vm1751_vm7, %v1779_v14, %v1781_v22  ;;  %v2773_v35 = vsel %vm2742_vm8, %v2770_v12, %v2772_v13 }
 0x26c   : > { %v2524_v9 = vsel %vm2363_vm6, %v2514_v20, %v2523_v57 }
 0x26d   : > { %v3109_v25 = vpack.c.bf16 %v3108_v43, %v3108_v43  ;;  %v2986_v56 = vadd.f32 %v4697_v3, %v2946_v33 }
 0x26e   : > { %v2259_v19 = vpop.f32.mrf.mxu2 }
 0x26f   : > { %v3022_v50 = vmax.f32 %v2986_v56, 0.0  ;;  %v2333_v4 = vadd.f32 %v2259_v19, %v1969_v28  ;;  %3654 = vst.msk [vmem:[%s4811_s10 + $0x4] sm:$0xf] %vm3096_vm10, %v3109_v25  ;;  %v2156_v19 = vrot.slane %v4833_v26, 2 }
 0x270   : > { %v1898_v6 = vpop.f32.mrf.mxu1 }
 0x271   : > { %3059 = vst.msk [vmem:[#allocation2 + $0x50] sm:$0xff] %vm3048_vm9, %v3022_v50  ;;  %v2712_v45 = vadd.f32 %v4828_v51, %v2333_v4  ;;  %v1970_v51 = vadd.f32 %v1898_v6, %v5092_v23  ;;  %v4892_v0 = vpop.f32.mrf.mxu3  ;;  %v2774_v4 = vrot.slane %v4833_v26, 3  ;;  %v2157_v39 = vsel %vm1751_vm7, %v2154_v59, %v2156_v19 }
 0x273   : > { %v2876_v1 = vpop.f32.mrf.mxu0  ;;  %3528 = vmatmul.msk.bf16.gmra.mxu1 %vm462_vm3, %v1782_v29  ;;  %v2947_v14 = vadd.f32 %v2873_v5, %v2712_v45  ;;  %3614 = vmatmul.msk.bf16.gmra.mxu2 %vm462_vm3, %v2155_v11  ;;  %v4895_v5 = vpack.c.b16 %v2361_v21, %v2361_v21  ;;  %v5093_v29 = vld [vmem:[#allocation14_spill] sm:$0xff] }
 0x275   : > { %v2987_v27 = vadd.f32 %v4697_v3, %v2947_v14  ;;  %v2526_v56 = vshrl.u32 %v4895_v5, 16  ;;  %v2529_v28 = vshll.u32 %v4895_v5, 16 }
 0x276   : > { %3650 = vmatmul.msk.bf16.gmra.mxu0 %vm462_vm3, %v2773_v35  ;;  %v2262_v58 = vpop.f32.mrf.mxu2  ;;  %3634 = vmatmul.msk.bf16.gmra.mxu3 %vm462_vm3, %v2524_v9 }
 0x277   : > { %v3023_v2 = vmax.f32 %v2987_v27, 0.0  ;;  %v2334_v12 = vadd.f32 %v2262_v58, %v1970_v51  ;;  %v2531_v35 = vrot.slane %v2529_v28, 3  ;;  %v2775_v27 = vsel %vm2742_vm8, %v2772_v13, %v2774_v4  ;;  %v5094_v51 = vld [vmem:[#allocation15_spill] sm:$0xff] }
 0x278   : > { %v1900_v55 = vpop.f32.mrf.mxu1 }
 0x279   : > { %3060 = vst.msk [vmem:[#allocation2 + $0x58] sm:$0xff] %vm3048_vm9, %v3023_v2  ;;  %v2713_v43 = vadd.f32 %v4845_v16, %v2334_v12  ;;  %v1971_v50 = vadd.f32 %v1900_v55, %v5093_v29  ;;  %v4907_v6 = vpop.f32.mrf.mxu3  ;;  %v2776_v29 = vrot.slane %v4863_v34, 3 }
 0x27b   : > { %v2878_v33 = vpop.f32.mrf.mxu0  ;;  %v2948_v25 = vadd.f32 %v2876_v1, %v2713_v43  ;;  %v2528_v1 = vrot.slane %v2526_v56, 2  ;;  %v2158_v56 = vrot.slane %v4863_v34, 2 }
 0x27d   : > { %v2988_v20 = vadd.f32 %v4697_v3, %v2948_v25  ;;  %v2532_v22 = vor.u32 %v2531_v35, %v2528_v1  ;;  %v1785_v25 = vrot.slane %v3793_v63, 2 }
 0x27e   : > { %v2264_v16 = vpop.f32.mrf.mxu2 }
 0x27f   : > { %v3024_v38 = vmax.f32 %v2988_v20, 0.0  ;;  %v2335_v11 = vadd.f32 %v2264_v16, %v1971_v50  ;;  %v2533_v13 = vsel %vm2363_vm6, %v2523_v57, %v2532_v22  ;;  %v3113_v57 = vld [vmem:[#allocation2 + $0x48] ss:$2 sm:$0xff]  ;;  %v3115_v16 = vld [vmem:[#allocation2 + $0x49] ss:$2 sm:$0xff] }
 0x280   : > { %v1903_v45 = vpop.f32.mrf.mxu1 }
 0x281   : > { %3061 = vst.msk [vmem:[#allocation2 + $0x60] sm:$0xff] %vm3048_vm9, %v3024_v38  ;;  %v2714_v14 = vadd.f32 %v4859_v52, %v2335_v11  ;;  %v1972_v59 = vadd.f32 %v1903_v45, %v5094_v51  ;;  %v4919_v58 = vpop.f32.mrf.mxu3  ;;  %v1786_v45 = vsel %vm1751_vm7, %v1783_v46, %v1785_v25 }
 0x283   : > { %v2881_v21 = vpop.f32.mrf.mxu0  ;;  %3529 = vmatmul.msk.bf16.gmra.mxu1 %vm462_vm3, %v1784_v48  ;;  %v2949_v26 = vadd.f32 %v2878_v33, %v2714_v14  ;;  %3615 = vmatmul.msk.bf16.gmra.mxu2 %vm462_vm3, %v2157_v39  ;;  %v2159_v39 = vsel %vm1751_vm7, %v2156_v19, %v2158_v56  ;;  %v3120_v14 = vmax.f32 %v3113_v57, %v3115_v16 }
 0x285   : > { %v2989_v23 = vadd.f32 %v4697_v3, %v2949_v26  ;;  %v2030_v26 = vld [vmem:[%s3950_s11 + $0xa0] sm:$0x3] }
 0x286   : > { %3651 = vmatmul.msk.bf16.gmra.mxu0 %vm462_vm3, %v2775_v27  ;;  %v2267_v2 = vpop.f32.mrf.mxu2  ;;  %3635 = vmatmul.msk.bf16.gmra.mxu3 %vm462_vm3, %v2533_v13  ;;  %v2777_v27 = vsel %vm2742_vm8, %v2774_v4, %v2776_v29  ;;  %v2105_v46 = vunpack.c.l.b16 %v2030_v26 }
 0x287   : > { %v3025_v52 = vmax.f32 %v2989_v23, 0.0  ;;  %v2336_v12 = vadd.f32 %v2267_v2, %v1972_v59 }
 0x288   : > { %v1905_v55 = vpop.f32.mrf.mxu1 }
 0x289   : > { %3062 = vst.msk [vmem:[#allocation2 + $0x68] sm:$0xff] %vm3048_vm9, %v3025_v52  ;;  %v2715_v9 = vadd.f32 %v4875_v62, %v2336_v12  ;;  %v1973_v20 = vadd.f32 %v1905_v55, %v4442_v18  ;;  %v4930_v50 = vpop.f32.mrf.mxu3  ;;  %v2124_v55 = vpack.c.b16 %v2105_v46, %v2105_v46 }
 0x28b   : > { %v2883_v43 = vpop.f32.mrf.mxu0  ;;  %v2950_v33 = vadd.f32 %v2881_v21, %v2715_v9  ;;  %v2160_v63 = vrot.slane %v2124_v55, 2 }
 0x28d   : > { %v2990_v28 = vadd.f32 %v4697_v3, %v2950_v33  ;;  %v1787_v33 = vrot.slane %v4438_v41, 2 }
 0x28e   : > { %v2269_v62 = vpop.f32.mrf.mxu2 }
 0x28f   : > { %v3026_v48 = vmax.f32 %v2990_v28, 0.0  ;;  %v2337_v38 = vadd.f32 %v2269_v62, %v1973_v20  ;;  %v2778_v20 = vrot.slane %v4895_v5, 3 }
 0x290   : > { %v1908_v11 = vpop.f32.mrf.mxu1  ;;  %v3117_v1 = vld [vmem:[#allocation2 + $0x5a] ss:$2 sm:$0xff]  ;;  %v3119_v35 = vld [vmem:[#allocation2 + $0x5b] ss:$2 sm:$0xff] }
 0x291   : > { %v3121_v21 = vmax.f32 %v3117_v1, %v3119_v35  ;;  %3063 = vst.msk [vmem:[#allocation2 + $0x70] sm:$0xff] %vm3048_vm9, %v3026_v48  ;;  %v2716_v18 = vadd.f32 %v4892_v0, %v2337_v38  ;;  %v1974_v59 = vadd.f32 %v1908_v11, %v4458_v15  ;;  %v2658_v0 = vpop.f32.mrf.mxu3  ;;  %v1788_v11 = vsel %vm1751_vm7, %v1785_v25, %v1787_v33 }
 0x292   : > { %v2779_v1 = vsel %vm2742_vm8, %v2776_v29, %v2778_v20 }
 0x293   : > { %v2886_v34 = vpop.f32.mrf.mxu0  ;;  %3530 = vmatmul.msk.bf16.gmra.mxu1 %vm462_vm3, %v1786_v45  ;;  %v3122_v22 = vmax.f32 %v3120_v14, %v3121_v21  ;;  %v2951_v23 = vadd.f32 %v2883_v43, %v2716_v18  ;;  %3616 = vmatmul.msk.bf16.gmra.mxu2 %vm462_vm3, %v2159_v39 }
 0x295   : > { %v3123_v19 = vpack.c.bf16 %v3122_v22, %v3122_v22  ;;  %v2991_v51 = vadd.f32 %v4697_v3, %v2951_v23 }
 0x296   : > { %3652 = vmatmul.msk.bf16.gmra.mxu0 %vm462_vm3, %v2777_v27  ;;  %v2272_v2 = vpop.f32.mrf.mxu2 }
 0x297   : > { %v3027_v52 = vmax.f32 %v2991_v51, 0.0  ;;  %v2338_v4 = vadd.f32 %v2272_v2, %v1974_v59  ;;  %3655 = vst.msk [vmem:[%s4811_s10 + $0x8] sm:$0xf] %vm3096_vm10, %v3123_v19 }
 0x298   : > { %v1910_v12 = vpop.f32.mrf.mxu1 }
 0x299   : > { %3064 = vst.msk [vmem:[#allocation2 + $0x78] sm:$0xff] %vm3048_vm9, %v3027_v52  ;;  %v2717_v13 = vadd.f32 %v4907_v6, %v2338_v4  ;;  %v1975_v15 = vadd.f32 %v1910_v12, %v4471_v36  ;;  %v2661_v57 = vpop.f32.mrf.mxu3  ;;  %v2161_v6 = vsel %vm1751_vm7, %v2158_v56, %v2160_v63 }
 0x29b   : > { %v2888_v9 = vpop.f32.mrf.mxu0  ;;  %v2952_v43 = vadd.f32 %v2886_v34, %v2717_v13 }
 0x29d   : > { %v2992_v28 = vadd.f32 %v4697_v3, %v2952_v43 }
 0x29e   : > { %v2274_v16 = vpop.f32.mrf.mxu2 }
 0x29f   : > { %v3028_v62 = vmax.f32 %v2992_v28, 0.0  ;;  %v2339_v48 = vadd.f32 %v2274_v16, %v1975_v15 }
 0x2a0   : > { %v1913_v38 = vpop.f32.mrf.mxu1  ;;  %v3127_v26 = vld [vmem:[#allocation2 + $0x6c] ss:$2 sm:$0xff]  ;;  %v3129_v22 = vld [vmem:[#allocation2 + $0x6d] ss:$2 sm:$0xff] }
 0x2a1   : > { %3065 = vst.msk [vmem:[#allocation2 + $0x80] sm:$0xff] %vm3048_vm9, %v3028_v62  ;;  %v2718_v41 = vadd.f32 %v4919_v58, %v2339_v48  ;;  %v1976_v25 = vadd.f32 %v1913_v38, %v4490_v60  ;;  %v2663_v35 = vpop.f32.mrf.mxu3  ;;  %v3134_v52 = vmax.f32 %v3127_v26, %v3129_v22 }
 0x2a3   : > { %v2891_v45 = vpop.f32.mrf.mxu0  ;;  %3531 = vmatmul.msk.bf16.gmra.mxu1 %vm462_vm3, %v1788_v11  ;;  %v2953_v36 = vadd.f32 %v2888_v9, %v2718_v41  ;;  %3617 = vmatmul.msk.bf16.gmra.mxu2 %vm462_vm3, %v2161_v6 }
 0x2a5   : > { %v2993_v5 = vadd.f32 %v4697_v3, %v2953_v36 }
 0x2a6   : > { %3653 = vmatmul.msk.bf16.gmra.mxu0 %vm462_vm3, %v2779_v1  ;;  %v2277_v56 = vpop.f32.mrf.mxu2 }
 0x2a7   : > { %v3029_v39 = vmax.f32 %v2993_v5, 0.0  ;;  %v2340_v14 = vadd.f32 %v2277_v56, %v1976_v25 }
 0x2a8   : > { %v1915_v21 = vpop.f32.mrf.mxu1 }
 0x2a9   : > { %3066 = vst.msk [vmem:[#allocation2 + $0x88] sm:$0xff] %vm3048_vm9, %v3029_v39  ;;  %v2719_v58 = vadd.f32 %v4930_v50, %v2340_v14  ;;  %v1977_v27 = vadd.f32 %v1915_v21, %v4502_v49  ;;  %v2666_v46 = vpop.f32.mrf.mxu3 }
 0x2ab   : > { %v2893_v29 = vpop.f32.mrf.mxu0  ;;  %v2954_v18 = vadd.f32 %v2891_v45, %v2719_v58 }
 0x2ad   : > { %v2994_v34 = vadd.f32 %v4697_v3, %v2954_v18 }
 0x2ae   : > { %v2279_v23 = vpop.f32.mrf.mxu2 }
 0x2af   : > { %v3030_v60 = vmax.f32 %v2994_v34, 0.0  ;;  %v2341_v19 = vadd.f32 %v2279_v23, %v1977_v27 }
 0x2b0   : > { %v1918_v51 = vpop.f32.mrf.mxu1  ;;  %v3131_v59 = vld [vmem:[#allocation2 + $0x7e] ss:$2 sm:$0xff]  ;;  %v3133_v2 = vld [vmem:[#allocation2 + $0x7f] ss:$2 sm:$0xff] }
 0x2b1   : > { %v3135_v4 = vmax.f32 %v3131_v59, %v3133_v2  ;;  %3067 = vst.msk [vmem:[#allocation2 + $0x90] sm:$0xff] %vm3048_vm9, %v3030_v60  ;;  %v2720_v50 = vadd.f32 %v2658_v0, %v2341_v19  ;;  %v1978_v43 = vadd.f32 %v1918_v51, %v4515_v44  ;;  %v2668_v20 = vpop.f32.mrf.mxu3 }
 0x2b3   : > { %v2896_v12 = vpop.f32.mrf.mxu0  ;;  %v3136_v55 = vmax.f32 %v3134_v52, %v3135_v4  ;;  %v2955_v13 = vadd.f32 %v2893_v29, %v2720_v50 }
 0x2b5   : > { %v3137_v9 = vpack.c.bf16 %v3136_v55, %v3136_v55  ;;  %v2995_v49 = vadd.f32 %v4697_v3, %v2955_v13 }
 0x2b6   : > { %v2282_v33 = vpop.f32.mrf.mxu2 }
 0x2b7   : > { %v3031_v63 = vmax.f32 %v2995_v49, 0.0  ;;  %v2342_v28 = vadd.f32 %v2282_v33, %v1978_v43  ;;  %3656 = vst.msk [vmem:[%s4811_s10 + $0xc] sm:$0xf] %vm3096_vm10, %v3137_v9 }
 0x2b8   : > { %v1920_v15 = vpop.f32.mrf.mxu1 }
 0x2b9   : > { %3068 = vst.msk [vmem:[#allocation2 + $0x98] sm:$0xff] %vm3048_vm9, %v3031_v63  ;;  %v2721_v16 = vadd.f32 %v2661_v57, %v2342_v28  ;;  %v1979_v38 = vadd.f32 %v1920_v15, %v4526_v40  ;;  %v2671_v36 = vpop.f32.mrf.mxu3 }
 0x2bb   : > { %v2898_v62 = vpop.f32.mrf.mxu0  ;;  %v2956_v0 = vadd.f32 %v2896_v12, %v2721_v16 }
 0x2bd   : > { %v2996_v48 = vadd.f32 %v4697_v3, %v2956_v0 }
 0x2be   : > { %v2284_v11 = vpop.f32.mrf.mxu2 }
 0x2bf   : > { %v3032_v6 = vmax.f32 %v2996_v48, 0.0  ;;  %v2343_v41 = vadd.f32 %v2284_v11, %v1979_v38 }
 0x2c0   : > { %v1923_v44 = vpop.f32.mrf.mxu1  ;;  %v3141_v59 = vld [vmem:[#allocation2 + $0x90] ss:$2 sm:$0xff]  ;;  %v3143_v2 = vld [vmem:[#allocation2 + $0x91] ss:$2 sm:$0xff] }
 0x2c1   : > { %3069 = vst.msk [vmem:[#allocation2 + $0xa0] sm:$0xff] %vm3048_vm9, %v3032_v6  ;;  %v2722_v45 = vadd.f32 %v2663_v35, %v2343_v41  ;;  %v1980_v57 = vadd.f32 %v1923_v44, %v4538_v8  ;;  %v2673_v18 = vpop.f32.mrf.mxu3  ;;  %v3148_v9 = vmax.f32 %v3141_v59, %v3143_v2 }
 0x2c3   : > { %v2901_v1 = vpop.f32.mrf.mxu0  ;;  %v2957_v5 = vadd.f32 %v2898_v62, %v2722_v45 }
 0x2c5   : > { %v2997_v25 = vadd.f32 %v4697_v3, %v2957_v5 }
 0x2c6   : > { %v2287_v56 = vpop.f32.mrf.mxu2 }
 0x2c7   : > { %v3033_v39 = vmax.f32 %v2997_v25, 0.0  ;;  %v2344_v14 = vadd.f32 %v2287_v56, %v1980_v57 }
 0x2c8   : > { %v1925_v21 = vpop.f32.mrf.mxu1 }
 0x2c9   : > { %3070 = vst.msk [vmem:[#allocation2 + $0xa8] sm:$0xff] %vm3048_vm9, %v3033_v39  ;;  %v2723_v40 = vadd.f32 %v2666_v46, %v2344_v14  ;;  %v1981_v35 = vadd.f32 %v1925_v21, %v4548_v42  ;;  %v2676_v4 = vpop.f32.mrf.mxu3 }
 0x2cb   : > { %v2903_v58 = vpop.f32.mrf.mxu0  ;;  %v2958_v29 = vadd.f32 %v2901_v1, %v2723_v40 }
 0x2cd   : > { %v2998_v34 = vadd.f32 %v4697_v3, %v2958_v29 }
 0x2ce   : > { %v2289_v27 = vpop.f32.mrf.mxu2 }
 0x2cf   : > { %v3034_v26 = vmax.f32 %v2998_v34, 0.0  ;;  %v2345_v22 = vadd.f32 %v2289_v27, %v1981_v35 }
 0x2d0   : > { %v1928_v23 = vpop.f32.mrf.mxu1 }
 0x2d1   : > { %3071 = vst.msk [vmem:[#allocation2 + $0xb0] sm:$0xff] %vm3048_vm9, %v3034_v26  ;;  %v2724_v8 = vadd.f32 %v2668_v20, %v2345_v22  ;;  %v1982_v46 = vadd.f32 %v1928_v23, %v4560_v30  ;;  %v2678_v38 = vpop.f32.mrf.mxu3 }
 0x2d3   : > { %v2906_v60 = vpop.f32.mrf.mxu0  ;;  %v2959_v19 = vadd.f32 %v2903_v58, %v2724_v8 }
 0x2d5   : > { %v2999_v51 = vadd.f32 %v4697_v3, %v2959_v19 }
 0x2d6   : > { %v2292_v52 = vpop.f32.mrf.mxu2 }
 0x2d7   : > { %v3035_v50 = vmax.f32 %v2999_v51, 0.0  ;;  %v2346_v12 = vadd.f32 %v2292_v52, %v1982_v46 }
 0x2d8   : > { %v1930_v42 = vpop.f32.mrf.mxu1  ;;  %v3145_v55 = vld [vmem:[#allocation2 + $0xa2] ss:$2 sm:$0xff]  ;;  %v3147_v13 = vld [vmem:[#allocation2 + $0xa3] ss:$2 sm:$0xff] }
 0x2d9   : > { %v3149_v49 = vmax.f32 %v3145_v55, %v3147_v13  ;;  %3072 = vst.msk [vmem:[#allocation2 + $0xb8] sm:$0xff] %vm3048_vm9, %v3035_v50  ;;  %v2725_v43 = vadd.f32 %v2671_v36, %v2346_v12  ;;  %v1983_v20 = vadd.f32 %v1930_v42, %v4570_v31  ;;  %v2681_v56 = vpop.f32.mrf.mxu3 }
 0x2db   : > { %v2908_v33 = vpop.f32.mrf.mxu0  ;;  %v3150_v63 = vmax.f32 %v3148_v9, %v3149_v49  ;;  %v2960_v28 = vadd.f32 %v2906_v60, %v2725_v43 }
 0x2dd   : > { %v3151_v15 = vpack.c.bf16 %v3150_v63, %v3150_v63  ;;  %v3000_v30 = vadd.f32 %v4697_v3, %v2960_v28 }
 0x2de   : > { %v2294_v16 = vpop.f32.mrf.mxu2 }
 0x2df   : > { %v3036_v62 = vmax.f32 %v3000_v30, 0.0  ;;  %v2347_v0 = vadd.f32 %v2294_v16, %v1983_v20  ;;  %3657 = vst.msk [vmem:[%s4811_s10 + $0x10] sm:$0xf] %vm3096_vm10, %v3151_v15  ;;  %v5005_v20 = vld [vmem:[%s5067_s2] ss:$0 sm:$0xff] }
 0x2e0   : > { %v1933_v48 = vpop.f32.mrf.mxu1 }
 0x2e1   : > { %3073 = vst.msk [vmem:[#allocation2 + $0xc0] sm:$0xff] %vm3048_vm9, %v3036_v62  ;;  %v2726_v11 = vadd.f32 %v2673_v18, %v2347_v0  ;;  %v1984_v45 = vadd.f32 %v1933_v48, %v4582_v54  ;;  %v2683_v27 = vpop.f32.mrf.mxu3 }
 0x2e3   : > { %v2911_v6 = vpop.f32.mrf.mxu0  ;;  %v2961_v41 = vadd.f32 %v2908_v33, %v2726_v11 }
 0x2e5   : > { %v3001_v44 = vadd.f32 %v4697_v3, %v2961_v41 }
 0x2e6   : > { %v2297_v1 = vpop.f32.mrf.mxu2 }
 0x2e7   : > { %v3037_v36 = vmax.f32 %v3001_v44, 0.0  ;;  %v2348_v5 = vadd.f32 %v2297_v1, %v1984_v45 }
 0x2e8   : > { %v1935_v31 = vpop.f32.mrf.mxu1  ;;  %v3155_v23 = vld [vmem:[#allocation2 + $0xb4] ss:$2 sm:$0xff]  ;;  %v3157_v8 = vld [vmem:[#allocation2 + $0xb5] ss:$2 sm:$0xff] }
 0x2e9   : > { %3074 = vst.msk [vmem:[#allocation2 + $0xc8] sm:$0xff] %vm3048_vm9, %v3037_v36  ;;  %v2727_v25 = vadd.f32 %v2676_v4, %v2348_v5  ;;  %v1985_v21 = vadd.f32 %v1935_v31, %v4592_v37  ;;  %v3162_v2 = vmax.f32 %v3155_v23, %v3157_v8  ;;  %v2686_v49 = vpop.f32.mrf.mxu3 }
 0x2eb   : > { %v2913_v57 = vpop.f32.mrf.mxu0  ;;  %v2962_v39 = vadd.f32 %v2911_v6, %v2727_v25 }
 0x2ed   : > { %v3002_v14 = vadd.f32 %v4697_v3, %v2962_v39 }
 0x2ee   : > { %v2299_v40 = vpop.f32.mrf.mxu2 }
 0x2ef   : > { %v3038_v58 = vmax.f32 %v3002_v14, 0.0  ;;  %v2349_v29 = vadd.f32 %v2299_v40, %v1985_v21 }
 0x2f0   : > { %v1938_v18 = vpop.f32.mrf.mxu1 }
 0x2f1   : > { %3075 = vst.msk [vmem:[#allocation2 + $0xd0] sm:$0xff] %vm3048_vm9, %v3038_v58  ;;  %v2728_v54 = vadd.f32 %v2678_v38, %v2349_v29  ;;  %v1986_v22 = vadd.f32 %v1938_v18, %v4604_v10  ;;  %v2688_v38 = vpop.f32.mrf.mxu3 }
 0x2f3   : > { %v2916_v34 = vpop.f32.mrf.mxu0  ;;  %v2963_v35 = vadd.f32 %v2913_v57, %v2728_v54 }
 0x2f5   : > { %v3003_v26 = vadd.f32 %v4697_v3, %v2963_v35 }
 0x2f6   : > { %v2302_v60 = vpop.f32.mrf.mxu2 }
 0x2f7   : > { %v3039_v19 = vmax.f32 %v3003_v26, 0.0  ;;  %v2350_v51 = vadd.f32 %v2302_v60, %v1986_v22 }
 0x2f8   : > { %v1940_v37 = vpop.f32.mrf.mxu1  ;;  %v3159_v46 = vld [vmem:[#allocation2 + $0xc6] ss:$2 sm:$0xff]  ;;  %v3161_v59 = vld [vmem:[#allocation2 + $0xc7] ss:$2 sm:$0xff] }
 0x2f9   : > { %v3163_v52 = vmax.f32 %v3159_v46, %v3161_v59  ;;  %3076 = vst.msk [vmem:[#allocation2 + $0xd8] sm:$0xff] %vm3048_vm9, %v3039_v19  ;;  %v2729_v4 = vadd.f32 %v2681_v56, %v2350_v51  ;;  %v1987_v13 = vadd.f32 %v1940_v37, %v4614_v32  ;;  %v2691_v25 = vpop.f32.mrf.mxu3 }
 0x2fb   : > { %v2918_v50 = vpop.f32.mrf.mxu0  ;;  %v3164_v12 = vmax.f32 %v3162_v2, %v3163_v52  ;;  %v2964_v42 = vadd.f32 %v2916_v34, %v2729_v4 }
 0x2fd   : > { %v3165_v55 = vpack.c.bf16 %v3164_v12, %v3164_v12  ;;  %v3004_v10 = vadd.f32 %v4697_v3, %v2964_v42 }
 0x2fe   : > { %v2304_v9 = vpop.f32.mrf.mxu2 }
 0x2ff   : > { %v3040_v43 = vmax.f32 %v3004_v10, 0.0  ;;  %v2351_v33 = vadd.f32 %v2304_v9, %v1987_v13  ;;  %3658 = vst.msk [vmem:[%s4811_s10 + $0x14] sm:$0xf] %vm3096_vm10, %v3165_v55 }
 0x300   : > { %v1943_v63 = vpop.f32.mrf.mxu1 }
 0x301   : > { %3077 = vst.msk [vmem:[#allocation2 + $0xe0] sm:$0xff] %vm3048_vm9, %v3040_v43  ;;  %v2730_v28 = vadd.f32 %v2683_v27, %v2351_v33  ;;  %v1988_v32 = vadd.f32 %v1943_v63, %v4626_v53  ;;  %v2693_v54 = vpop.f32.mrf.mxu3 }
 0x303   : > { %v2921_v15 = vpop.f32.mrf.mxu0  ;;  %v2965_v30 = vadd.f32 %v2918_v50, %v2730_v28 }
 0x305   : > { %v3005_v3 = vadd.f32 %v5005_v20, %v2965_v30 }
 0x306   : > { %v2307_v16 = vpop.f32.mrf.mxu2 }
 0x307   : > { %v3041_v62 = vmax.f32 %v3005_v3, 0.0  ;;  %v2352_v0 = vadd.f32 %v2307_v16, %v1988_v32 }
 0x308   : > { %v1945_v48 = vpop.f32.mrf.mxu1  ;;  %v3169_v27 = vld [vmem:[#allocation2 + $0xd8] ss:$2 sm:$0xff]  ;;  %v3171_v26 = vld [vmem:[#allocation2 + $0xd9] ss:$2 sm:$0xff] }
 0x309   : > { %3078 = vst.msk [vmem:[#allocation2 + $0xe8] sm:$0xff] %vm3048_vm9, %v3041_v62  ;;  %v2731_v11 = vadd.f32 %v2686_v49, %v2352_v0  ;;  %v1989_v45 = vadd.f32 %v1945_v48, %v4636_v7  ;;  %v3176_v37 = vmax.f32 %v3169_v27, %v3171_v26  ;;  %v2696_v12 = vpop.f32.mrf.mxu3 }
 0x30b   : > { %v2923_v6 = vpop.f32.mrf.mxu0  ;;  %v2966_v41 = vadd.f32 %v2921_v15, %v2731_v11 }
 0x30d   : > { %v3006_v44 = vadd.f32 %v5005_v20, %v2966_v41 }
 0x30e   : > { %v2309_v1 = vpop.f32.mrf.mxu2 }
 0x30f   : > { %v3042_v36 = vmax.f32 %v3006_v44, 0.0  ;;  %v2353_v5 = vadd.f32 %v2309_v1, %v1989_v45 }
 0x310   : > { %v1948_v31 = vpop.f32.mrf.mxu1 }
 0x311   : > { %3079 = vst.msk [vmem:[#allocation2 + $0xf0] sm:$0xff] %vm3048_vm9, %v3042_v36  ;;  %v2732_v53 = vadd.f32 %v2688_v38, %v2353_v5  ;;  %v1990_v14 = vadd.f32 %v1948_v31, %v4648_v17  ;;  %v2698_v30 = vpop.f32.mrf.mxu3 }
 0x313   : > { %v2967_v57 = vadd.f32 %v2923_v6, %v2732_v53  ;;  %v2926_v56 = vpop.f32.mrf.mxu0 }
 0x315   : > { %v3007_v39 = vadd.f32 %v5005_v20, %v2967_v57 }
 0x316   : > { %v2312_v21 = vpop.f32.mrf.mxu2 }
 0x317   : > { %v3043_v40 = vmax.f32 %v3007_v39, 0.0  ;;  %v2354_v58 = vadd.f32 %v2312_v21, %v1990_v14 }
 0x318   : > { %v1950_v29 = vpop.f32.mrf.mxu1 }
 0x319   : > { %3080 = vst.msk [vmem:[#allocation2 + $0xf8] sm:$0xff] %vm3048_vm9, %v3043_v40  ;;  %v2733_v7 = vadd.f32 %v2691_v25, %v2354_v58  ;;  %v1991_v35 = vadd.f32 %v1950_v29, %v4658_v47 }
 0x31b   : > { %v2968_v18 = vadd.f32 %v2926_v56, %v2733_v7  ;;  %v2928_v22 = vpop.f32.mrf.mxu0 }
 0x31d   : > { %v3008_v34 = vadd.f32 %v5005_v20, %v2968_v18 }
 0x31e   : > { %v2314_v23 = vpop.f32.mrf.mxu2 }
 0x31f   : > { %v3044_v8 = vmax.f32 %v3008_v34, 0.0  ;;  %v2355_v60 = vadd.f32 %v2314_v23, %v1991_v35 }
 0x320   : > { %v3173_v17 = vld [vmem:[#allocation2 + $0xea] ss:$2 sm:$0xff]  ;;  %v3175_v19 = vld [vmem:[#allocation2 + $0xeb] ss:$2 sm:$0xff]  ;;  %v1953_v51 = vpop.f32.mrf.mxu1 }
 0x321   : > { %v3177_v46 = vmax.f32 %v3173_v17, %v3175_v19  ;;  %3081 = vst.msk [vmem:[#allocation2 + $0x100] sm:$0xff] %vm3048_vm9, %v3044_v8  ;;  %v2734_v59 = vadd.f32 %v2693_v54, %v2355_v60  ;;  %v1992_v50 = vadd.f32 %v1953_v51, %v4672_v24 }
 0x323   : > { %v3178_v2 = vmax.f32 %v3176_v37, %v3177_v46  ;;  %v2969_v52 = vadd.f32 %v2928_v22, %v2734_v59  ;;  %v2931_v13 = vpop.f32.mrf.mxu0 }
 0x325   : > { %v3179_v4 = vpack.c.bf16 %v3178_v2, %v3178_v2  ;;  %v3009_v47 = vadd.f32 %v5005_v20, %v2969_v52 }
 0x326   : > { %v2317_v42 = vpop.f32.mrf.mxu2 }
 0x327   : > { %v3045_v55 = vmax.f32 %v3009_v47, 0.0  ;;  %v2356_v10 = vadd.f32 %v2317_v42, %v1992_v50  ;;  %3659 = vst.msk [vmem:[%s4811_s10 + $0x18] sm:$0xf] %vm3096_vm10, %v3179_v4 }
 0x328   : > { %v1955_v49 = vpop.f32.mrf.mxu1 }
 0x329   : > { %3082 = vst.msk [vmem:[#allocation2 + $0x108] sm:$0xff] %vm3048_vm9, %v3045_v55  ;;  %v2735_v9 = vadd.f32 %v2696_v12, %v2356_v10  ;;  %v1993_v63 = vadd.f32 %v1955_v49, %v4684_v61 }
 0x32b   : > { %v2970_v43 = vadd.f32 %v2931_v13, %v2735_v9  ;;  %v2933_v32 = vpop.f32.mrf.mxu0 }
 0x32d   : > { %v3010_v33 = vadd.f32 %v5005_v20, %v2970_v43 }
 0x32e   : > { %v2319_v28 = vpop.f32.mrf.mxu2 }
 0x32f   : > { %v3046_v15 = vmax.f32 %v3010_v33, 0.0  ;;  %v2357_v24 = vadd.f32 %v2319_v28, %v1993_v63 }
 0x330   : > { %v3183_v48 = vld [vmem:[#allocation2 + $0xfc] ss:$2 sm:$0xff]  ;;  %v3185_v61 = vld [vmem:[#allocation2 + $0xfd] ss:$2 sm:$0xff] }
 0x331   : > { %3083 = vst.msk [vmem:[#allocation2 + $0x110] sm:$0xff] %vm3048_vm9, %v3046_v15  ;;  %v2736_v3 = vadd.f32 %v2698_v30, %v2357_v24  ;;  %v3190_v6 = vmax.f32 %v3183_v48, %v3185_v61 }
 0x333   : > { %v2971_v16 = vadd.f32 %v2933_v32, %v2736_v3 }
 0x335   : > { %v3011_v62 = vadd.f32 %v5005_v20, %v2971_v16 }
 0x337   : > { %v3047_v0 = vmax.f32 %v3011_v62, 0.0 }
 0x339   : > { %3084 = vst.msk [vmem:[#allocation2 + $0x118] sm:$0xff] %vm3048_vm9, %v3047_v0 }
 0x340   : > { %v3187_v38 = vld [vmem:[#allocation2 + $0x10e] ss:$2 sm:$0xff]  ;;  %v3189_v11 = vld [vmem:[#allocation2 + $0x10f] ss:$2 sm:$0xff] }
 0x341   : > { %v3191_v41 = vmax.f32 %v3187_v38, %v3189_v11 }
 0x343   : > { %v3192_v20 = vmax.f32 %v3190_v6, %v3191_v41 }
 0x345   : > { %v3193_v44 = vpack.c.bf16 %v3192_v20, %v3192_v20 }
 0x347   : > { %3660 = vst.msk [vmem:[%s4811_s10 + $0x1c] sm:$0xf] %vm3096_vm10, %v3193_v44 }
 0x348   : > { %3822 = shalt.err (!%p3819_p3)
}
 0x349   : > { %s3860_s8 = smov 64   ;;  %s3861_s9 = smov 4  }
 0x34a   : > { %3731 = dma.vmem_to_hbm [thread:$0]  (%p3920_p5), %s3210_s26, 512, %s3212_s27, %s3197_s16, %s3860_s8, %s3860_s8, %s3861_s9  }
 0x34b PF: > { %p3737_p4 = scmp.ge.s32.totalorder %s3857_s15, 2  ;;  %s3226_s10 = sand.u32 1, %s3845_s12  }
 0x34c   : > { %s3227_s11 = scalar_lea.sflag [#allocation4], %s3226_s10 }
 0x34d   : > { %p3734_p7 = pnand %p3737_p4, %p3924_p6 }
 0x34f   : > { %p3735_p8 = pneg %p3734_p7 }
 0x351   : > { %3840 = dma.done.wait (%p3735_p8), %s3227_s11, 512  }
 0x352   : > { %3842 = vsyncadd (%p3735_p8), %s3227_s11, 4294966784  ;;  %p13_p9 = scmp.ge.s32.totalorder %s3907_s18, 4   ;;  %s5095_s12 = smov %s3849_s13 }
 0x353   : > { %s5096_s13 = smov %s3853_s14  ;;  %s5097_s14 = smov %s3918_s21 }
 0x354   : > { %s5098_s15 = smov %s3907_s18  ;;  %15 = sbr.rel (!%p13_p9) target bundleno = 3 (0x3), region = 105 }
 0x359   :  { %3233 = vsyncpa [#allocation4], 1 }
 0x35a   :  { %3235 = vsyncpa [#allocation4 + $0x1], 1 }

</bundles_post_ra>
